<compile_context>
chip_gen: v6e
topology: v6e:2x2x1
jax: 0.10.0
libtpu: 0.0.40
codegen_flags: <defaults>
</compile_context>

<pallas_src>
import jax
import jax.numpy as jnp
from jax import lax
from jax.experimental import pallas as pl
from jax.experimental.pallas import tpu as pltpu

# ----------------------- small config (consistent with the module) ----------
IMAGE_SIZE = 16
PATCH_SIZE = 4
CHANNELS = 3
DIM = 32
DEPTH = 2
HEADS = 4
DIM_HEAD = 8
MLP_DIM = 64
NUM_CLASSES = 10
BATCH = 2

NUM_PATCHES = (IMAGE_SIZE // PATCH_SIZE) ** 2           # 16
PATCH_DIM = CHANNELS * PATCH_SIZE * PATCH_SIZE          # 48
SEQ = NUM_PATCHES + 1                                   # 17 (cls token + patches)
INNER = HEADS * DIM_HEAD                                # 32
SCALE = DIM_HEAD ** -0.5
EPS = 1e-5                                              # nn.LayerNorm default
OUT_PAD = 128                                           # lane-dense logits width

# ---------------- packed vector-table row layout (one (40,128) array) --------
R_LN0G, R_LN0B = 0, 1                                   # width PATCH_DIM
R_BP, R_LN1G, R_LN1B, R_CLS, R_LNFG, R_LNFB = 2, 3, 4, 5, 6, 7   # width DIM
R_BH = 8                                                # width OUT_PAD (padded)
R_LYR = 9                                               # 7 rows per layer:
#   +0 alng, +1 alnb, +2 bo, +3 flng, +4 flnb, +5 b1 (MLP_DIM), +6 b2
R_POS = R_LYR + 7 * DEPTH                               # SEQ rows of pos (width DIM)
NVEC = R_POS + SEQ                                      # 40

# ---------------- packed per-layer weight slab layout (DEPTH, 96, 192) -------
#   rows 0:DIM        lanes 0:3*INNER        -> wqkv  (32, 96)
#   rows 0:INNER      lanes 3*INNER:128      -> wo    (32, 32)
#   rows 0:DIM        lanes 128:128+MLP_DIM  -> w1    (32, 64)
#   rows DIM:DIM+MLP  lanes 0:DIM            -> w2    (64, 32)
WL_ROWS = DIM + MLP_DIM                                 # 96
WL_LANES = 192


# ----------------------------- in-kernel math helpers ------------------------
def _layernorm(x, g, b):
    mu = jnp.mean(x, axis=-1, keepdims=True)
    var = jnp.mean(jnp.square(x - mu), axis=-1, keepdims=True)
    return (x - mu) * lax.rsqrt(var + EPS) * g + b


def _erf(x):
    # Abramowitz & Stegun 7.1.26 (max abs err ~1.5e-7, f32-exact for practical
    # purposes). Kept instead of lax.erf (not guaranteed to lower in Mosaic) to
    # preserve torch.nn.GELU()'s exact-erf semantics; GELU work is on a tiny
    # (17,64) tile so the VALU cost is negligible in this overhead-bound kernel.
    a1, a2, a3, a4, a5 = 0.254829592, -0.284496736, 1.421413741, -1.453152027, 1.061405429
    p = 0.3275911
    sign = jnp.where(x >= 0.0, 1.0, -1.0)
    ax = jnp.abs(x)
    t = 1.0 / (1.0 + p * ax)
    poly = ((((a5 * t + a4) * t + a3) * t + a2) * t + a1) * t
    return sign * (1.0 - poly * jnp.exp(-ax * ax))


def _gelu(x):
    # Exact (erf-based) GELU, matching torch.nn.GELU() default.
    return 0.5 * x * (1.0 + _erf(x * 0.7071067811865476))


def _softmax(x):
    m = jnp.max(x, axis=-1, keepdims=True)
    e = jnp.exp(x - m)
    return e * pl.reciprocal(jnp.sum(e, axis=-1, keepdims=True), approx=True)


# ------------------------------------ kernel --------------------------------
def vit_kernel(patches_ref, vecs_ref, wp_ref, wlyr_ref, wh_ref, out_ref, x_sc):
    # patches_ref: (1, SEQ, PATCH_DIM); row 0 is a zero dummy that is replaced
    # by the cls token after patch embedding (overwrite-before-use).
    xp = patches_ref[0]                                          # (SEQ, PATCH_DIM)

    # --- unpack vector table (static slices; one DMA'd (40,128) array) ---
    ln0g = vecs_ref[R_LN0G:R_LN0G + 1, 0:PATCH_DIM]
    ln0b = vecs_ref[R_LN0B:R_LN0B + 1, 0:PATCH_DIM]
    bp = vecs_ref[R_BP:R_BP + 1, 0:DIM]
    ln1g = vecs_ref[R_LN1G:R_LN1G + 1, 0:DIM]
    ln1b = vecs_ref[R_LN1B:R_LN1B + 1, 0:DIM]
    cls = vecs_ref[R_CLS:R_CLS + 1, 0:DIM]
    lnfg = vecs_ref[R_LNFG:R_LNFG + 1, 0:DIM]
    lnfb = vecs_ref[R_LNFB:R_LNFB + 1, 0:DIM]
    bh = vecs_ref[R_BH:R_BH + 1, :]                              # (1, OUT_PAD)
    pos = vecs_ref[R_POS:R_POS + SEQ, 0:DIM]                     # (SEQ, DIM)

    # --- to_patch_embedding: LayerNorm(patch_dim) -> Linear -> LayerNorm(dim) ---
    x = _layernorm(xp, ln0g, ln0b)
    x = jnp.dot(x, wp_ref[...], preferred_element_type=jnp.float32) + bp
    x = _layernorm(x, ln1g, ln1b)                                # (SEQ, DIM)

    # --- cls token via direct row write, then positional embedding ---
    x_sc[...] = x
    x_sc[0:1, :] = cls
    x = x_sc[...] + pos

    # --- transformer ---
    for l in range(DEPTH):
        base = R_LYR + 7 * l
        alng = vecs_ref[base + 0:base + 1, 0:DIM]
        alnb = vecs_ref[base + 1:base + 2, 0:DIM]
        bo = vecs_ref[base + 2:base + 3, 0:DIM]
        flng = vecs_ref[base + 3:base + 4, 0:DIM]
        flnb = vecs_ref[base + 4:base + 5, 0:DIM]
        b1 = vecs_ref[base + 5:base + 6, 0:MLP_DIM]
        b2 = vecs_ref[base + 6:base + 7, 0:DIM]

        wqkv = wlyr_ref[l, 0:DIM, 0:3 * INNER]                   # (32, 96)
        wo = wlyr_ref[l, 0:INNER, 3 * INNER:3 * INNER + DIM]     # (32, 32)
        w1 = wlyr_ref[l, 0:DIM, 128:128 + MLP_DIM]               # (32, 64)
        w2 = wlyr_ref[l, DIM:DIM + MLP_DIM, 0:DIM]               # (64, 32)

        # --- attention block (pre-norm), fused QKV + fused output proj ---
        xn = _layernorm(x, alng, alnb)
        qkv = jnp.dot(xn, wqkv, preferred_element_type=jnp.float32)  # (SEQ, 3*INNER)
        heads = []
        for h in range(HEADS):
            qh = qkv[:, h * DIM_HEAD:(h + 1) * DIM_HEAD]
            kh = qkv[:, INNER + h * DIM_HEAD:INNER + (h + 1) * DIM_HEAD]
            vh = qkv[:, 2 * INNER + h * DIM_HEAD:2 * INNER + (h + 1) * DIM_HEAD]
            dots = lax.dot_general(qh, kh, (((1,), (1,)), ((), ())),
                                   preferred_element_type=jnp.float32) * SCALE
            p = _softmax(dots)
            heads.append(jnp.dot(p, vh, preferred_element_type=jnp.float32))
        head_cat = jnp.concatenate(heads, axis=-1)               # (SEQ, INNER)
        x = jnp.dot(head_cat, wo, preferred_element_type=jnp.float32) + bo + x

        # --- feed-forward block (pre-norm) ---
        xn = _layernorm(x, flng, flnb)
        hdn = jnp.dot(xn, w1, preferred_element_type=jnp.float32) + b1
        hdn = _gelu(hdn)
        x = jnp.dot(hdn, w2, preferred_element_type=jnp.float32) + b2 + x

    # --- final norm on cls row only (LN is per-row => exact), then head ---
    cls_out = _layernorm(x[0:1, :], lnfg, lnfb)                  # (1, DIM)
    logits = jnp.dot(cls_out, wh_ref[...],
                     preferred_element_type=jnp.float32) + bh    # (1, OUT_PAD)
    out_ref[0] = logits


# ------------------------------- param packing -------------------------------
def _pack_vecs(p):
    vecs = jnp.zeros((NVEC, 128), jnp.float32)
    vecs = vecs.at[R_LN0G, :PATCH_DIM].set(p["ln0g"])
    vecs = vecs.at[R_LN0B, :PATCH_DIM].set(p["ln0b"])
    vecs = vecs.at[R_BP, :DIM].set(p["bp"])
    vecs = vecs.at[R_LN1G, :DIM].set(p["ln1g"])
    vecs = vecs.at[R_LN1B, :DIM].set(p["ln1b"])
    vecs = vecs.at[R_CLS, :DIM].set(p["cls"])
    vecs = vecs.at[R_LNFG, :DIM].set(p["lnfg"])
    vecs = vecs.at[R_LNFB, :DIM].set(p["lnfb"])
    vecs = vecs.at[R_BH, :NUM_CLASSES].set(p["bh"])
    for l in range(DEPTH):
        base = R_LYR + 7 * l
        vecs = vecs.at[base + 0, :DIM].set(p["alng"][l])
        vecs = vecs.at[base + 1, :DIM].set(p["alnb"][l])
        vecs = vecs.at[base + 2, :DIM].set(p["bo"][l])
        vecs = vecs.at[base + 3, :DIM].set(p["flng"][l])
        vecs = vecs.at[base + 4, :DIM].set(p["flnb"][l])
        vecs = vecs.at[base + 5, :MLP_DIM].set(p["b1"][l])
        vecs = vecs.at[base + 6, :DIM].set(p["b2"][l])
    vecs = vecs.at[R_POS:R_POS + SEQ, :DIM].set(p["pos"])
    return vecs


def _pack_wlyr(p):
    wl = jnp.zeros((DEPTH, WL_ROWS, WL_LANES), jnp.float32)
    wl = wl.at[:, :DIM, :3 * INNER].set(p["wqkv"])
    wl = wl.at[:, :INNER, 3 * INNER:3 * INNER + DIM].set(p["wo"])
    wl = wl.at[:, :DIM, 128:128 + MLP_DIM].set(p["w1"])
    wl = wl.at[:, DIM:DIM + MLP_DIM, :DIM].set(p["w2"])
    return wl


# ----------------------------------- wrapper ---------------------------------
def vit_forward(img, params):
    B, C, H, W = img.shape
    p = PATCH_SIZE
    # Rearrange 'b c (h p1) (w p2) -> b (h w) (p1 p2 c)'  (plain-JAX glue)
    patches = img.reshape(B, C, H // p, p, W // p, p)
    patches = patches.transpose(0, 2, 4, 3, 5, 1).reshape(B, NUM_PATCHES, PATCH_DIM)
    # prepend a zero dummy row (becomes the cls-token slot inside the kernel)
    patches = jnp.concatenate(
        [jnp.zeros((B, 1, PATCH_DIM), patches.dtype), patches], axis=1)  # (B, SEQ, PATCH_DIM)

    vecs = _pack_vecs(params)                                   # (40, 128)
    wp = params["wp"]                                           # (48, 32)
    wlyr = _pack_wlyr(params)                                   # (2, 96, 192)
    wh_pad = jnp.zeros((DIM, OUT_PAD), jnp.float32).at[:, :NUM_CLASSES].set(params["wh"])

    out = pl.pallas_call(
        vit_kernel,
        out_shape=jax.ShapeDtypeStruct((B, 1, OUT_PAD), jnp.float32),
        grid_spec=pltpu.PrefetchScalarGridSpec(
            num_scalar_prefetch=0,
            grid=(B,),
            in_specs=[
                pl.BlockSpec((1, SEQ, PATCH_DIM), lambda b: (b, 0, 0)),
                pl.BlockSpec((NVEC, 128), lambda b: (0, 0)),
                pl.BlockSpec((PATCH_DIM, DIM), lambda b: (0, 0)),
                pl.BlockSpec((DEPTH, WL_ROWS, WL_LANES), lambda b: (0, 0, 0)),
                pl.BlockSpec((DIM, OUT_PAD), lambda b: (0, 0)),
            ],
            out_specs=pl.BlockSpec((1, 1, OUT_PAD), lambda b: (b, 0, 0)),
            scratch_shapes=[pltpu.VMEM((SEQ, DIM), jnp.float32)],
        ),
        compiler_params=pltpu.CompilerParams(
            dimension_semantics=("parallel",)),
    )(patches, vecs, wp, wlyr, wh_pad)
    return out[:, 0, :NUM_CLASSES]                               # (B, NUM_CLASSES)


# ----------------------------- deterministic params --------------------------
def init_params(key):
    keys = iter(jax.random.split(key, 16))

    def rnd(shape, scale=0.02):
        return (scale * jax.random.normal(next(keys), shape)).astype(jnp.float32)

    params = {
        # ViT parameters (torch.randn init in the module)
        "cls":  rnd((DIM,), 1.0),
        "pos":  rnd((SEQ, DIM), 1.0),
        # patch embedding: LN(patch_dim) -> Linear(patch_dim, dim) -> LN(dim)
        "ln0g": jnp.ones((PATCH_DIM,), jnp.float32),
        "ln0b": jnp.zeros((PATCH_DIM,), jnp.float32),
        "wp":   rnd((PATCH_DIM, DIM)),
        "bp":   jnp.zeros((DIM,), jnp.float32),
        "ln1g": jnp.ones((DIM,), jnp.float32),
        "ln1b": jnp.zeros((DIM,), jnp.float32),
        # attention (per layer, heads fused along the last axis: Q|K|V, head-major)
        "alng": jnp.ones((DEPTH, DIM), jnp.float32),
        "alnb": jnp.zeros((DEPTH, DIM), jnp.float32),
        "wqkv": rnd((DEPTH, DIM, 3 * INNER)),
        "wo":   rnd((DEPTH, INNER, DIM)),
        "bo":   jnp.zeros((DEPTH, DIM), jnp.float32),
        # feed-forward (per layer)
        "flng": jnp.ones((DEPTH, DIM), jnp.float32),
        "flnb": jnp.zeros((DEPTH, DIM), jnp.float32),
        "w1":   rnd((DEPTH, DIM, MLP_DIM)),
        "b1":   jnp.zeros((DEPTH, MLP_DIM), jnp.float32),
        "w2":   rnd((DEPTH, MLP_DIM, DIM)),
        "b2":   jnp.zeros((DEPTH, DIM), jnp.float32),
        # final norm + mlp head
        "lnfg": jnp.ones((DIM,), jnp.float32),
        "lnfb": jnp.zeros((DIM,), jnp.float32),
        "wh":   rnd((DIM, NUM_CLASSES)),
        "bh":   jnp.zeros((NUM_CLASSES,), jnp.float32),
    }
    return params


if __name__ == "__main__":
    key = jax.random.PRNGKey(0)
    k_img, k_par = jax.random.split(key)
    img = jax.random.normal(k_img, (BATCH, CHANNELS, IMAGE_SIZE, IMAGE_SIZE),
                            dtype=jnp.float32)
    params = init_params(k_par)

    logits = vit_forward(img, params)
    jax.block_until_ready(logits)
    assert logits.shape == (BATCH, NUM_CLASSES)
    assert bool(jnp.all(jnp.isfinite(logits)))
    print("KERNEL_OK")
</pallas_src>

<mosaic_0001>
module attributes {stable_mosaic.version = 11 : i64} {
  func.func @vit_kernel(%arg0: i32, %arg1: memref<1x17x48xf32, #tpu.memory_space<vmem>>, %arg2: memref<40x128xf32, #tpu.memory_space<vmem>>, %arg3: memref<48x32xf32, #tpu.memory_space<vmem>>, %arg4: memref<2x96x192xf32, #tpu.memory_space<vmem>>, %arg5: memref<32x128xf32, #tpu.memory_space<vmem>>, %arg6: memref<1x1x128xf32, #tpu.memory_space<vmem>>, %arg7: memref<17x32xf32, #tpu.memory_space<vmem>>) attributes {dimension_semantics = [#tpu.dimension_semantics<parallel>], iteration_bounds = array<i64: 2>, scalar_prefetch = 0 : i64, scratch_operands = 1 : i64, tpu.core_type = #tpu.core_type<tc>, window_params = [{transform_indices = @transform_0, window_bounds = array<i64: 1, 17, 48>}, {pipeline_mode = #tpu.pipeline_mode<synchronous>, transform_indices = @transform_1, window_bounds = array<i64: 40, 128>}, {pipeline_mode = #tpu.pipeline_mode<synchronous>, transform_indices = @transform_2, window_bounds = array<i64: 48, 32>}, {pipeline_mode = #tpu.pipeline_mode<synchronous>, transform_indices = @transform_3, window_bounds = array<i64: 2, 96, 192>}, {pipeline_mode = #tpu.pipeline_mode<synchronous>, transform_indices = @transform_4, window_bounds = array<i64: 32, 128>}, {transform_indices = @transform_5, window_bounds = array<i64: 1, 1, 128>}]} {
    %c0 = arith.constant 0 : index
    %c0_0 = arith.constant 0 : index
    %c0_1 = arith.constant 0 : index
    %0 = vector.load %arg1[%c0, %c0_0, %c0_1] : memref<1x17x48xf32, #tpu.memory_space<vmem>>, vector<1x17x48xf32>
    %1 = vector.shape_cast %0 : vector<1x17x48xf32> to vector<17x48xf32>
    %c0_2 = arith.constant 0 : index
    %c0_3 = arith.constant 0 : index
    %2 = vector.load %arg2[%c0_2, %c0_3] : memref<40x128xf32, #tpu.memory_space<vmem>>, vector<1x48xf32>
    %c1 = arith.constant 1 : index
    %c0_4 = arith.constant 0 : index
    %3 = vector.load %arg2[%c1, %c0_4] : memref<40x128xf32, #tpu.memory_space<vmem>>, vector<1x48xf32>
    %c2 = arith.constant 2 : index
    %c0_5 = arith.constant 0 : index
    %4 = vector.load %arg2[%c2, %c0_5] : memref<40x128xf32, #tpu.memory_space<vmem>>, vector<1x32xf32>
    %c3 = arith.constant 3 : index
    %c0_6 = arith.constant 0 : index
    %5 = vector.load %arg2[%c3, %c0_6] : memref<40x128xf32, #tpu.memory_space<vmem>>, vector<1x32xf32>
    %c4 = arith.constant 4 : index
    %c0_7 = arith.constant 0 : index
    %6 = vector.load %arg2[%c4, %c0_7] : memref<40x128xf32, #tpu.memory_space<vmem>>, vector<1x32xf32>
    %c5 = arith.constant 5 : index
    %c0_8 = arith.constant 0 : index
    %7 = vector.load %arg2[%c5, %c0_8] : memref<40x128xf32, #tpu.memory_space<vmem>>, vector<1x32xf32>
    %c6 = arith.constant 6 : index
    %c0_9 = arith.constant 0 : index
    %8 = vector.load %arg2[%c6, %c0_9] : memref<40x128xf32, #tpu.memory_space<vmem>>, vector<1x32xf32>
    %c7 = arith.constant 7 : index
    %c0_10 = arith.constant 0 : index
    %9 = vector.load %arg2[%c7, %c0_10] : memref<40x128xf32, #tpu.memory_space<vmem>>, vector<1x32xf32>
    %c8 = arith.constant 8 : index
    %c0_11 = arith.constant 0 : index
    %10 = vector.load %arg2[%c8, %c0_11] : memref<40x128xf32, #tpu.memory_space<vmem>>, vector<1x128xf32>
    %c23 = arith.constant 23 : index
    %c0_12 = arith.constant 0 : index
    %11 = vector.load %arg2[%c23, %c0_12] : memref<40x128xf32, #tpu.memory_space<vmem>>, vector<17x32xf32>
    %cst = arith.constant dense<0.000000e+00> : vector<17xf32>
    %12 = vector.multi_reduction <add>, %1, %cst [1] : vector<17x48xf32> to vector<17xf32>
    %13 = vector.shape_cast %12 : vector<17xf32> to vector<17x1xf32>
    %cst_13 = arith.constant 4.800000e+01 : f32
    %14 = vector.broadcast %cst_13 : f32 to vector<17x1xf32>
    %15 = arith.divf %13, %14 : vector<17x1xf32>
    %16 = vector.broadcast %15 : vector<17x1xf32> to vector<17x48xf32>
    %17 = arith.subf %1, %16 : vector<17x48xf32>
    %18 = arith.mulf %17, %17 : vector<17x48xf32>
    %cst_14 = arith.constant dense<0.000000e+00> : vector<17xf32>
    %19 = vector.multi_reduction <add>, %18, %cst_14 [1] : vector<17x48xf32> to vector<17xf32>
    %20 = vector.shape_cast %19 : vector<17xf32> to vector<17x1xf32>
    %cst_15 = arith.constant 4.800000e+01 : f32
    %21 = vector.broadcast %cst_15 : f32 to vector<17x1xf32>
    %22 = arith.divf %20, %21 : vector<17x1xf32>
    %23 = vector.broadcast %15 : vector<17x1xf32> to vector<17x48xf32>
    %24 = arith.subf %1, %23 : vector<17x48xf32>
    %cst_16 = arith.constant 9.99999974E-6 : f32
    %25 = vector.broadcast %cst_16 : f32 to vector<17x1xf32>
    %26 = arith.addf %22, %25 : vector<17x1xf32>
    %27 = math.rsqrt %26 : vector<17x1xf32>
    %28 = vector.broadcast %27 : vector<17x1xf32> to vector<17x48xf32>
    %29 = arith.mulf %24, %28 : vector<17x48xf32>
    %30 = vector.broadcast %2 : vector<1x48xf32> to vector<17x48xf32>
    %31 = arith.mulf %29, %30 : vector<17x48xf32>
    %32 = vector.broadcast %3 : vector<1x48xf32> to vector<17x48xf32>
    %33 = arith.addf %31, %32 : vector<17x48xf32>
    %c0_17 = arith.constant 0 : index
    %c0_18 = arith.constant 0 : index
    %34 = vector.load %arg3[%c0_17, %c0_18] : memref<48x32xf32, #tpu.memory_space<vmem>>, vector<48x32xf32>
    %cst_19 = arith.constant dense<0.000000e+00> : vector<17x32xf32>
    %35 = tpu.matmul %33, %34, %cst_19 {dimension_numbers = #tpu.dot_dimension_numbers<[1], [0], [0], [1], [0, 0, 1, 1], [], []>} : vector<17x48xf32>, vector<48x32xf32>, vector<17x32xf32> -> vector<17x32xf32>
    %36 = vector.broadcast %4 : vector<1x32xf32> to vector<17x32xf32>
    %37 = arith.addf %35, %36 : vector<17x32xf32>
    %cst_20 = arith.constant dense<0.000000e+00> : vector<17xf32>
    %38 = vector.multi_reduction <add>, %37, %cst_20 [1] : vector<17x32xf32> to vector<17xf32>
    %39 = vector.shape_cast %38 : vector<17xf32> to vector<17x1xf32>
    %cst_21 = arith.constant 3.200000e+01 : f32
    %40 = vector.broadcast %cst_21 : f32 to vector<17x1xf32>
    %41 = arith.divf %39, %40 : vector<17x1xf32>
    %42 = vector.broadcast %41 : vector<17x1xf32> to vector<17x32xf32>
    %43 = arith.subf %37, %42 : vector<17x32xf32>
    %44 = arith.mulf %43, %43 : vector<17x32xf32>
    %cst_22 = arith.constant dense<0.000000e+00> : vector<17xf32>
    %45 = vector.multi_reduction <add>, %44, %cst_22 [1] : vector<17x32xf32> to vector<17xf32>
    %46 = vector.shape_cast %45 : vector<17xf32> to vector<17x1xf32>
    %cst_23 = arith.constant 3.200000e+01 : f32
    %47 = vector.broadcast %cst_23 : f32 to vector<17x1xf32>
    %48 = arith.divf %46, %47 : vector<17x1xf32>
    %49 = vector.broadcast %41 : vector<17x1xf32> to vector<17x32xf32>
    %50 = arith.subf %37, %49 : vector<17x32xf32>
    %cst_24 = arith.constant 9.99999974E-6 : f32
    %51 = vector.broadcast %cst_24 : f32 to vector<17x1xf32>
    %52 = arith.addf %48, %51 : vector<17x1xf32>
    %53 = math.rsqrt %52 : vector<17x1xf32>
    %54 = vector.broadcast %53 : vector<17x1xf32> to vector<17x32xf32>
    %55 = arith.mulf %50, %54 : vector<17x32xf32>
    %56 = vector.broadcast %5 : vector<1x32xf32> to vector<17x32xf32>
    %57 = arith.mulf %55, %56 : vector<17x32xf32>
    %58 = vector.broadcast %6 : vector<1x32xf32> to vector<17x32xf32>
    %59 = arith.addf %57, %58 : vector<17x32xf32>
    %c0_25 = arith.constant 0 : index
    %c0_26 = arith.constant 0 : index
    %60 = vector.load %arg7[%c0_25, %c0_26] : memref<17x32xf32, #tpu.memory_space<vmem>>, vector<17x32xf32>
    tpu.vector_store %arg7[%c0_25, %c0_26], %59 {strides = array<i32>} : memref<17x32xf32, #tpu.memory_space<vmem>>, vector<17x32xf32>,
    %c0_27 = arith.constant 0 : index
    %c0_28 = arith.constant 0 : index
    %61 = vector.load %arg7[%c0_27, %c0_28] : memref<17x32xf32, #tpu.memory_space<vmem>>, vector<1x32xf32>
    tpu.vector_store %arg7[%c0_27, %c0_28], %7 {strides = array<i32>} : memref<17x32xf32, #tpu.memory_space<vmem>>, vector<1x32xf32>,
    %c0_29 = arith.constant 0 : index
    %c0_30 = arith.constant 0 : index
    %62 = vector.load %arg7[%c0_29, %c0_30] : memref<17x32xf32, #tpu.memory_space<vmem>>, vector<17x32xf32>
    %63 = arith.addf %62, %11 : vector<17x32xf32>
    %c9 = arith.constant 9 : index
    %c0_31 = arith.constant 0 : index
    %64 = vector.load %arg2[%c9, %c0_31] : memref<40x128xf32, #tpu.memory_space<vmem>>, vector<1x32xf32>
    %c10 = arith.constant 10 : index
    %c0_32 = arith.constant 0 : index
    %65 = vector.load %arg2[%c10, %c0_32] : memref<40x128xf32, #tpu.memory_space<vmem>>, vector<1x32xf32>
    %c11 = arith.constant 11 : index
    %c0_33 = arith.constant 0 : index
    %66 = vector.load %arg2[%c11, %c0_33] : memref<40x128xf32, #tpu.memory_space<vmem>>, vector<1x32xf32>
    %c12 = arith.constant 12 : index
    %c0_34 = arith.constant 0 : index
    %67 = vector.load %arg2[%c12, %c0_34] : memref<40x128xf32, #tpu.memory_space<vmem>>, vector<1x32xf32>
    %c13 = arith.constant 13 : index
    %c0_35 = arith.constant 0 : index
    %68 = vector.load %arg2[%c13, %c0_35] : memref<40x128xf32, #tpu.memory_space<vmem>>, vector<1x32xf32>
    %c14 = arith.constant 14 : index
    %c0_36 = arith.constant 0 : index
    %69 = vector.load %arg2[%c14, %c0_36] : memref<40x128xf32, #tpu.memory_space<vmem>>, vector<1x64xf32>
    %c15 = arith.constant 15 : index
    %c0_37 = arith.constant 0 : index
    %70 = vector.load %arg2[%c15, %c0_37] : memref<40x128xf32, #tpu.memory_space<vmem>>, vector<1x32xf32>
    %c0_38 = arith.constant 0 : index
    %c0_39 = arith.constant 0 : index
    %c0_40 = arith.constant 0 : index
    %71 = vector.load %arg4[%c0_38, %c0_39, %c0_40] : memref<2x96x192xf32, #tpu.memory_space<vmem>>, vector<1x32x96xf32>
    %72 = vector.shape_cast %71 : vector<1x32x96xf32> to vector<32x96xf32>
    %c0_41 = arith.constant 0 : index
    %c0_42 = arith.constant 0 : index
    %c96 = arith.constant 96 : index
    %73 = vector.load %arg4[%c0_41, %c0_42, %c96] : memref<2x96x192xf32, #tpu.memory_space<vmem>>, vector<1x32x32xf32>
    %74 = vector.shape_cast %73 : vector<1x32x32xf32> to vector<32x32xf32>
    %c0_43 = arith.constant 0 : index
    %c0_44 = arith.constant 0 : index
    %c128 = arith.constant 128 : index
    %75 = vector.load %arg4[%c0_43, %c0_44, %c128] : memref<2x96x192xf32, #tpu.memory_space<vmem>>, vector<1x32x64xf32>
    %76 = vector.shape_cast %75 : vector<1x32x64xf32> to vector<32x64xf32>
    %c0_45 = arith.constant 0 : index
    %c32 = arith.constant 32 : index
    %c0_46 = arith.constant 0 : index
    %77 = vector.load %arg4[%c0_45, %c32, %c0_46] : memref<2x96x192xf32, #tpu.memory_space<vmem>>, vector<1x64x32xf32>
    %78 = vector.shape_cast %77 : vector<1x64x32xf32> to vector<64x32xf32>
    %cst_47 = arith.constant dense<0.000000e+00> : vector<17xf32>
    %79 = vector.multi_reduction <add>, %63, %cst_47 [1] : vector<17x32xf32> to vector<17xf32>
    %80 = vector.shape_cast %79 : vector<17xf32> to vector<17x1xf32>
    %cst_48 = arith.constant 3.200000e+01 : f32
    %81 = vector.broadcast %cst_48 : f32 to vector<17x1xf32>
    %82 = arith.divf %80, %81 : vector<17x1xf32>
    %83 = vector.broadcast %82 : vector<17x1xf32> to vector<17x32xf32>
    %84 = arith.subf %63, %83 : vector<17x32xf32>
    %85 = arith.mulf %84, %84 : vector<17x32xf32>
    %cst_49 = arith.constant dense<0.000000e+00> : vector<17xf32>
    %86 = vector.multi_reduction <add>, %85, %cst_49 [1] : vector<17x32xf32> to vector<17xf32>
    %87 = vector.shape_cast %86 : vector<17xf32> to vector<17x1xf32>
    %cst_50 = arith.constant 3.200000e+01 : f32
    %88 = vector.broadcast %cst_50 : f32 to vector<17x1xf32>
    %89 = arith.divf %87, %88 : vector<17x1xf32>
    %90 = vector.broadcast %82 : vector<17x1xf32> to vector<17x32xf32>
    %91 = arith.subf %63, %90 : vector<17x32xf32>
    %cst_51 = arith.constant 9.99999974E-6 : f32
    %92 = vector.broadcast %cst_51 : f32 to vector<17x1xf32>
    %93 = arith.addf %89, %92 : vector<17x1xf32>
    %94 = math.rsqrt %93 : vector<17x1xf32>
    %95 = vector.broadcast %94 : vector<17x1xf32> to vector<17x32xf32>
    %96 = arith.mulf %91, %95 : vector<17x32xf32>
    %97 = vector.broadcast %64 : vector<1x32xf32> to vector<17x32xf32>
    %98 = arith.mulf %96, %97 : vector<17x32xf32>
    %99 = vector.broadcast %65 : vector<1x32xf32> to vector<17x32xf32>
    %100 = arith.addf %98, %99 : vector<17x32xf32>
    %cst_52 = arith.constant dense<0.000000e+00> : vector<17x96xf32>
    %101 = tpu.matmul %100, %72, %cst_52 {dimension_numbers = #tpu.dot_dimension_numbers<[1], [0], [0], [1], [0, 0, 1, 1], [], []>} : vector<17x32xf32>, vector<32x96xf32>, vector<17x96xf32> -> vector<17x96xf32>
    %102 = vector.extract_strided_slice %101 {offsets = [0, 0], sizes = [17, 8], strides = [1, 1]} : vector<17x96xf32> to vector<17x8xf32>
    %103 = vector.extract_strided_slice %101 {offsets = [0, 32], sizes = [17, 8], strides = [1, 1]} : vector<17x96xf32> to vector<17x8xf32>
    %104 = vector.extract_strided_slice %101 {offsets = [0, 64], sizes = [17, 8], strides = [1, 1]} : vector<17x96xf32> to vector<17x8xf32>
    %cst_53 = arith.constant dense<0.000000e+00> : vector<17x17xf32>
    %105 = tpu.matmul %102, %103, %cst_53 {dimension_numbers = #tpu.dot_dimension_numbers<[1], [1], [0], [0], [0, 0, 1, 0], [], []>} : vector<17x8xf32>, vector<17x8xf32>, vector<17x17xf32> -> vector<17x17xf32>
    %cst_54 = arith.constant 0.353553385 : f32
    %106 = vector.broadcast %cst_54 : f32 to vector<17x17xf32>
    %107 = arith.mulf %105, %106 : vector<17x17xf32>
    %cst_55 = arith.constant dense<0xFF800000> : vector<17xf32>
    %108 = vector.multi_reduction <maximumf>, %107, %cst_55 [1] : vector<17x17xf32> to vector<17xf32>
    %109 = vector.shape_cast %108 : vector<17xf32> to vector<17x1xf32>
    %110 = vector.broadcast %109 : vector<17x1xf32> to vector<17x17xf32>
    %111 = arith.subf %107, %110 : vector<17x17xf32>
    %112 = math.exp %111 : vector<17x17xf32>
    %cst_56 = arith.constant dense<0.000000e+00> : vector<17xf32>
    %113 = vector.multi_reduction <add>, %112, %cst_56 [1] : vector<17x17xf32> to vector<17xf32>
    %114 = vector.shape_cast %113 : vector<17xf32> to vector<17x1xf32>
    %115 = tpu.reciprocal %114 {approx = true} : vector<17x1xf32> -> vector<17x1xf32>
    %116 = vector.broadcast %115 : vector<17x1xf32> to vector<17x17xf32>
    %117 = arith.mulf %112, %116 : vector<17x17xf32>
    %cst_57 = arith.constant dense<0.000000e+00> : vector<17x8xf32>
    %118 = tpu.matmul %117, %104, %cst_57 {dimension_numbers = #tpu.dot_dimension_numbers<[1], [0], [0], [1], [0, 0, 1, 1], [], []>} : vector<17x17xf32>, vector<17x8xf32>, vector<17x8xf32> -> vector<17x8xf32>
    %119 = vector.extract_strided_slice %101 {offsets = [0, 8], sizes = [17, 8], strides = [1, 1]} : vector<17x96xf32> to vector<17x8xf32>
    %120 = vector.extract_strided_slice %101 {offsets = [0, 40], sizes = [17, 8], strides = [1, 1]} : vector<17x96xf32> to vector<17x8xf32>
    %121 = vector.extract_strided_slice %101 {offsets = [0, 72], sizes = [17, 8], strides = [1, 1]} : vector<17x96xf32> to vector<17x8xf32>
    %cst_58 = arith.constant dense<0.000000e+00> : vector<17x17xf32>
    %122 = tpu.matmul %119, %120, %cst_58 {dimension_numbers = #tpu.dot_dimension_numbers<[1], [1], [0], [0], [0, 0, 1, 0], [], []>} : vector<17x8xf32>, vector<17x8xf32>, vector<17x17xf32> -> vector<17x17xf32>
    %cst_59 = arith.constant 0.353553385 : f32
    %123 = vector.broadcast %cst_59 : f32 to vector<17x17xf32>
    %124 = arith.mulf %122, %123 : vector<17x17xf32>
    %cst_60 = arith.constant dense<0xFF800000> : vector<17xf32>
    %125 = vector.multi_reduction <maximumf>, %124, %cst_60 [1] : vector<17x17xf32> to vector<17xf32>
    %126 = vector.shape_cast %125 : vector<17xf32> to vector<17x1xf32>
    %127 = vector.broadcast %126 : vector<17x1xf32> to vector<17x17xf32>
    %128 = arith.subf %124, %127 : vector<17x17xf32>
    %129 = math.exp %128 : vector<17x17xf32>
    %cst_61 = arith.constant dense<0.000000e+00> : vector<17xf32>
    %130 = vector.multi_reduction <add>, %129, %cst_61 [1] : vector<17x17xf32> to vector<17xf32>
    %131 = vector.shape_cast %130 : vector<17xf32> to vector<17x1xf32>
    %132 = tpu.reciprocal %131 {approx = true} : vector<17x1xf32> -> vector<17x1xf32>
    %133 = vector.broadcast %132 : vector<17x1xf32> to vector<17x17xf32>
    %134 = arith.mulf %129, %133 : vector<17x17xf32>
    %cst_62 = arith.constant dense<0.000000e+00> : vector<17x8xf32>
    %135 = tpu.matmul %134, %121, %cst_62 {dimension_numbers = #tpu.dot_dimension_numbers<[1], [0], [0], [1], [0, 0, 1, 1], [], []>} : vector<17x17xf32>, vector<17x8xf32>, vector<17x8xf32> -> vector<17x8xf32>
    %136 = vector.extract_strided_slice %101 {offsets = [0, 16], sizes = [17, 8], strides = [1, 1]} : vector<17x96xf32> to vector<17x8xf32>
    %137 = vector.extract_strided_slice %101 {offsets = [0, 48], sizes = [17, 8], strides = [1, 1]} : vector<17x96xf32> to vector<17x8xf32>
    %138 = vector.extract_strided_slice %101 {offsets = [0, 80], sizes = [17, 8], strides = [1, 1]} : vector<17x96xf32> to vector<17x8xf32>
    %cst_63 = arith.constant dense<0.000000e+00> : vector<17x17xf32>
    %139 = tpu.matmul %136, %137, %cst_63 {dimension_numbers = #tpu.dot_dimension_numbers<[1], [1], [0], [0], [0, 0, 1, 0], [], []>} : vector<17x8xf32>, vector<17x8xf32>, vector<17x17xf32> -> vector<17x17xf32>
    %cst_64 = arith.constant 0.353553385 : f32
    %140 = vector.broadcast %cst_64 : f32 to vector<17x17xf32>
    %141 = arith.mulf %139, %140 : vector<17x17xf32>
    %cst_65 = arith.constant dense<0xFF800000> : vector<17xf32>
    %142 = vector.multi_reduction <maximumf>, %141, %cst_65 [1] : vector<17x17xf32> to vector<17xf32>
    %143 = vector.shape_cast %142 : vector<17xf32> to vector<17x1xf32>
    %144 = vector.broadcast %143 : vector<17x1xf32> to vector<17x17xf32>
    %145 = arith.subf %141, %144 : vector<17x17xf32>
    %146 = math.exp %145 : vector<17x17xf32>
    %cst_66 = arith.constant dense<0.000000e+00> : vector<17xf32>
    %147 = vector.multi_reduction <add>, %146, %cst_66 [1] : vector<17x17xf32> to vector<17xf32>
    %148 = vector.shape_cast %147 : vector<17xf32> to vector<17x1xf32>
    %149 = tpu.reciprocal %148 {approx = true} : vector<17x1xf32> -> vector<17x1xf32>
    %150 = vector.broadcast %149 : vector<17x1xf32> to vector<17x17xf32>
    %151 = arith.mulf %146, %150 : vector<17x17xf32>
    %cst_67 = arith.constant dense<0.000000e+00> : vector<17x8xf32>
    %152 = tpu.matmul %151, %138, %cst_67 {dimension_numbers = #tpu.dot_dimension_numbers<[1], [0], [0], [1], [0, 0, 1, 1], [], []>} : vector<17x17xf32>, vector<17x8xf32>, vector<17x8xf32> -> vector<17x8xf32>
    %153 = vector.extract_strided_slice %101 {offsets = [0, 24], sizes = [17, 8], strides = [1, 1]} : vector<17x96xf32> to vector<17x8xf32>
    %154 = vector.extract_strided_slice %101 {offsets = [0, 56], sizes = [17, 8], strides = [1, 1]} : vector<17x96xf32> to vector<17x8xf32>
    %155 = vector.extract_strided_slice %101 {offsets = [0, 88], sizes = [17, 8], strides = [1, 1]} : vector<17x96xf32> to vector<17x8xf32>
    %cst_68 = arith.constant dense<0.000000e+00> : vector<17x17xf32>
    %156 = tpu.matmul %153, %154, %cst_68 {dimension_numbers = #tpu.dot_dimension_numbers<[1], [1], [0], [0], [0, 0, 1, 0], [], []>} : vector<17x8xf32>, vector<17x8xf32>, vector<17x17xf32> -> vector<17x17xf32>
    %cst_69 = arith.constant 0.353553385 : f32
    %157 = vector.broadcast %cst_69 : f32 to vector<17x17xf32>
    %158 = arith.mulf %156, %157 : vector<17x17xf32>
    %cst_70 = arith.constant dense<0xFF800000> : vector<17xf32>
    %159 = vector.multi_reduction <maximumf>, %158, %cst_70 [1] : vector<17x17xf32> to vector<17xf32>
    %160 = vector.shape_cast %159 : vector<17xf32> to vector<17x1xf32>
    %161 = vector.broadcast %160 : vector<17x1xf32> to vector<17x17xf32>
    %162 = arith.subf %158, %161 : vector<17x17xf32>
    %163 = math.exp %162 : vector<17x17xf32>
    %cst_71 = arith.constant dense<0.000000e+00> : vector<17xf32>
    %164 = vector.multi_reduction <add>, %163, %cst_71 [1] : vector<17x17xf32> to vector<17xf32>
    %165 = vector.shape_cast %164 : vector<17xf32> to vector<17x1xf32>
    %166 = tpu.reciprocal %165 {approx = true} : vector<17x1xf32> -> vector<17x1xf32>
    %167 = vector.broadcast %166 : vector<17x1xf32> to vector<17x17xf32>
    %168 = arith.mulf %163, %167 : vector<17x17xf32>
    %cst_72 = arith.constant dense<0.000000e+00> : vector<17x8xf32>
    %169 = tpu.matmul %168, %155, %cst_72 {dimension_numbers = #tpu.dot_dimension_numbers<[1], [0], [0], [1], [0, 0, 1, 1], [], []>} : vector<17x17xf32>, vector<17x8xf32>, vector<17x8xf32> -> vector<17x8xf32>
    %170 = tpu.concatenate %118, %135, %152, %169 in 1 : vector<17x8xf32>, vector<17x8xf32>, vector<17x8xf32>, vector<17x8xf32> -> vector<17x32xf32>
    %cst_73 = arith.constant dense<0.000000e+00> : vector<17x32xf32>
    %171 = tpu.matmul %170, %74, %cst_73 {dimension_numbers = #tpu.dot_dimension_numbers<[1], [0], [0], [1], [0, 0, 1, 1], [], []>} : vector<17x32xf32>, vector<32x32xf32>, vector<17x32xf32> -> vector<17x32xf32>
    %172 = vector.broadcast %66 : vector<1x32xf32> to vector<17x32xf32>
    %173 = arith.addf %171, %172 : vector<17x32xf32>
    %174 = arith.addf %173, %63 : vector<17x32xf32>
    %cst_74 = arith.constant dense<0.000000e+00> : vector<17xf32>
    %175 = vector.multi_reduction <add>, %174, %cst_74 [1] : vector<17x32xf32> to vector<17xf32>
    %176 = vector.shape_cast %175 : vector<17xf32> to vector<17x1xf32>
    %cst_75 = arith.constant 3.200000e+01 : f32
    %177 = vector.broadcast %cst_75 : f32 to vector<17x1xf32>
    %178 = arith.divf %176, %177 : vector<17x1xf32>
    %179 = vector.broadcast %178 : vector<17x1xf32> to vector<17x32xf32>
    %180 = arith.subf %174, %179 : vector<17x32xf32>
    %181 = arith.mulf %180, %180 : vector<17x32xf32>
    %cst_76 = arith.constant dense<0.000000e+00> : vector<17xf32>
    %182 = vector.multi_reduction <add>, %181, %cst_76 [1] : vector<17x32xf32> to vector<17xf32>
    %183 = vector.shape_cast %182 : vector<17xf32> to vector<17x1xf32>
    %cst_77 = arith.constant 3.200000e+01 : f32
    %184 = vector.broadcast %cst_77 : f32 to vector<17x1xf32>
    %185 = arith.divf %183, %184 : vector<17x1xf32>
    %186 = vector.broadcast %178 : vector<17x1xf32> to vector<17x32xf32>
    %187 = arith.subf %174, %186 : vector<17x32xf32>
    %cst_78 = arith.constant 9.99999974E-6 : f32
    %188 = vector.broadcast %cst_78 : f32 to vector<17x1xf32>
    %189 = arith.addf %185, %188 : vector<17x1xf32>
    %190 = math.rsqrt %189 : vector<17x1xf32>
    %191 = vector.broadcast %190 : vector<17x1xf32> to vector<17x32xf32>
    %192 = arith.mulf %187, %191 : vector<17x32xf32>
    %193 = vector.broadcast %67 : vector<1x32xf32> to vector<17x32xf32>
    %194 = arith.mulf %192, %193 : vector<17x32xf32>
    %195 = vector.broadcast %68 : vector<1x32xf32> to vector<17x32xf32>
    %196 = arith.addf %194, %195 : vector<17x32xf32>
    %cst_79 = arith.constant dense<0.000000e+00> : vector<17x64xf32>
    %197 = tpu.matmul %196, %76, %cst_79 {dimension_numbers = #tpu.dot_dimension_numbers<[1], [0], [0], [1], [0, 0, 1, 1], [], []>} : vector<17x32xf32>, vector<32x64xf32>, vector<17x64xf32> -> vector<17x64xf32>
    %198 = vector.broadcast %69 : vector<1x64xf32> to vector<17x64xf32>
    %199 = arith.addf %197, %198 : vector<17x64xf32>
    %cst_80 = arith.constant 5.000000e-01 : f32
    %200 = vector.broadcast %cst_80 : f32 to vector<17x64xf32>
    %201 = arith.mulf %200, %199 : vector<17x64xf32>
    %cst_81 = arith.constant 0.707106769 : f32
    %202 = vector.broadcast %cst_81 : f32 to vector<17x64xf32>
    %203 = arith.mulf %199, %202 : vector<17x64xf32>
    %cst_82 = arith.constant 0.000000e+00 : f32
    %204 = vector.broadcast %cst_82 : f32 to vector<17x64xf32>
    %205 = arith.cmpf oge, %203, %204 : vector<17x64xf32>
    %cst_83 = arith.constant 1.000000e+00 : f32
    %cst_84 = arith.constant -1.000000e+00 : f32
    %206 = vector.broadcast %cst_83 : f32 to vector<17x64xf32>
    %207 = vector.broadcast %cst_84 : f32 to vector<17x64xf32>
    %208 = arith.select %205, %206, %207 : vector<17x64xi1>, vector<17x64xf32>
    %209 = math.absf %203 : vector<17x64xf32>
    %cst_85 = arith.constant 0.327591091 : f32
    %210 = vector.broadcast %cst_85 : f32 to vector<17x64xf32>
    %211 = arith.mulf %210, %209 : vector<17x64xf32>
    %cst_86 = arith.constant 1.000000e+00 : f32
    %212 = vector.broadcast %cst_86 : f32 to vector<17x64xf32>
    %213 = arith.addf %212, %211 : vector<17x64xf32>
    %cst_87 = arith.constant 1.000000e+00 : f32
    %214 = vector.broadcast %cst_87 : f32 to vector<17x64xf32>
    %215 = arith.divf %214, %213 : vector<17x64xf32>
    %cst_88 = arith.constant 1.06140542 : f32
    %216 = vector.broadcast %cst_88 : f32 to vector<17x64xf32>
    %217 = arith.mulf %216, %215 : vector<17x64xf32>
    %cst_89 = arith.constant -1.45315206 : f32
    %218 = vector.broadcast %cst_89 : f32 to vector<17x64xf32>
    %219 = arith.addf %217, %218 : vector<17x64xf32>
    %220 = arith.mulf %219, %215 : vector<17x64xf32>
    %cst_90 = arith.constant 1.42141378 : f32
    %221 = vector.broadcast %cst_90 : f32 to vector<17x64xf32>
    %222 = arith.addf %220, %221 : vector<17x64xf32>
    %223 = arith.mulf %222, %215 : vector<17x64xf32>
    %cst_91 = arith.constant -0.284496725 : f32
    %224 = vector.broadcast %cst_91 : f32 to vector<17x64xf32>
    %225 = arith.addf %223, %224 : vector<17x64xf32>
    %226 = arith.mulf %225, %215 : vector<17x64xf32>
    %cst_92 = arith.constant 0.254829586 : f32
    %227 = vector.broadcast %cst_92 : f32 to vector<17x64xf32>
    %228 = arith.addf %226, %227 : vector<17x64xf32>
    %229 = arith.mulf %228, %215 : vector<17x64xf32>
    %cst_93 = arith.constant 0.000000e+00 : f32
    %230 = vector.broadcast %cst_93 : f32 to vector<17x64xf32>
    %231 = arith.subf %230, %209 : vector<17x64xf32>
    %232 = arith.mulf %231, %209 : vector<17x64xf32>
    %233 = math.exp %232 : vector<17x64xf32>
    %234 = arith.mulf %229, %233 : vector<17x64xf32>
    %cst_94 = arith.constant 1.000000e+00 : f32
    %235 = vector.broadcast %cst_94 : f32 to vector<17x64xf32>
    %236 = arith.subf %235, %234 : vector<17x64xf32>
    %237 = arith.mulf %208, %236 : vector<17x64xf32>
    %cst_95 = arith.constant 1.000000e+00 : f32
    %238 = vector.broadcast %cst_95 : f32 to vector<17x64xf32>
    %239 = arith.addf %238, %237 : vector<17x64xf32>
    %240 = arith.mulf %201, %239 : vector<17x64xf32>
    %cst_96 = arith.constant dense<0.000000e+00> : vector<17x32xf32>
    %241 = tpu.matmul %240, %78, %cst_96 {dimension_numbers = #tpu.dot_dimension_numbers<[1], [0], [0], [1], [0, 0, 1, 1], [], []>} : vector<17x64xf32>, vector<64x32xf32>, vector<17x32xf32> -> vector<17x32xf32>
    %242 = vector.broadcast %70 : vector<1x32xf32> to vector<17x32xf32>
    %243 = arith.addf %241, %242 : vector<17x32xf32>
    %244 = arith.addf %243, %174 : vector<17x32xf32>
    %c16 = arith.constant 16 : index
    %c0_97 = arith.constant 0 : index
    %245 = vector.load %arg2[%c16, %c0_97] : memref<40x128xf32, #tpu.memory_space<vmem>>, vector<1x32xf32>
    %c17 = arith.constant 17 : index
    %c0_98 = arith.constant 0 : index
    %246 = vector.load %arg2[%c17, %c0_98] : memref<40x128xf32, #tpu.memory_space<vmem>>, vector<1x32xf32>
    %c18 = arith.constant 18 : index
    %c0_99 = arith.constant 0 : index
    %247 = vector.load %arg2[%c18, %c0_99] : memref<40x128xf32, #tpu.memory_space<vmem>>, vector<1x32xf32>
    %c19 = arith.constant 19 : index
    %c0_100 = arith.constant 0 : index
    %248 = vector.load %arg2[%c19, %c0_100] : memref<40x128xf32, #tpu.memory_space<vmem>>, vector<1x32xf32>
    %c20 = arith.constant 20 : index
    %c0_101 = arith.constant 0 : index
    %249 = vector.load %arg2[%c20, %c0_101] : memref<40x128xf32, #tpu.memory_space<vmem>>, vector<1x32xf32>
    %c21 = arith.constant 21 : index
    %c0_102 = arith.constant 0 : index
    %250 = vector.load %arg2[%c21, %c0_102] : memref<40x128xf32, #tpu.memory_space<vmem>>, vector<1x64xf32>
    %c22 = arith.constant 22 : index
    %c0_103 = arith.constant 0 : index
    %251 = vector.load %arg2[%c22, %c0_103] : memref<40x128xf32, #tpu.memory_space<vmem>>, vector<1x32xf32>
    %c1_104 = arith.constant 1 : index
    %c0_105 = arith.constant 0 : index
    %c0_106 = arith.constant 0 : index
    %252 = vector.load %arg4[%c1_104, %c0_105, %c0_106] : memref<2x96x192xf32, #tpu.memory_space<vmem>>, vector<1x32x96xf32>
    %253 = vector.shape_cast %252 : vector<1x32x96xf32> to vector<32x96xf32>
    %c1_107 = arith.constant 1 : index
    %c0_108 = arith.constant 0 : index
    %c96_109 = arith.constant 96 : index
    %254 = vector.load %arg4[%c1_107, %c0_108, %c96_109] : memref<2x96x192xf32, #tpu.memory_space<vmem>>, vector<1x32x32xf32>
    %255 = vector.shape_cast %254 : vector<1x32x32xf32> to vector<32x32xf32>
    %c1_110 = arith.constant 1 : index
    %c0_111 = arith.constant 0 : index
    %c128_112 = arith.constant 128 : index
    %256 = vector.load %arg4[%c1_110, %c0_111, %c128_112] : memref<2x96x192xf32, #tpu.memory_space<vmem>>, vector<1x32x64xf32>
    %257 = vector.shape_cast %256 : vector<1x32x64xf32> to vector<32x64xf32>
    %c1_113 = arith.constant 1 : index
    %c32_114 = arith.constant 32 : index
    %c0_115 = arith.constant 0 : index
    %258 = vector.load %arg4[%c1_113, %c32_114, %c0_115] : memref<2x96x192xf32, #tpu.memory_space<vmem>>, vector<1x64x32xf32>
    %259 = vector.shape_cast %258 : vector<1x64x32xf32> to vector<64x32xf32>
    %cst_116 = arith.constant dense<0.000000e+00> : vector<17xf32>
    %260 = vector.multi_reduction <add>, %244, %cst_116 [1] : vector<17x32xf32> to vector<17xf32>
    %261 = vector.shape_cast %260 : vector<17xf32> to vector<17x1xf32>
    %cst_117 = arith.constant 3.200000e+01 : f32
    %262 = vector.broadcast %cst_117 : f32 to vector<17x1xf32>
    %263 = arith.divf %261, %262 : vector<17x1xf32>
    %264 = vector.broadcast %263 : vector<17x1xf32> to vector<17x32xf32>
    %265 = arith.subf %244, %264 : vector<17x32xf32>
    %266 = arith.mulf %265, %265 : vector<17x32xf32>
    %cst_118 = arith.constant dense<0.000000e+00> : vector<17xf32>
    %267 = vector.multi_reduction <add>, %266, %cst_118 [1] : vector<17x32xf32> to vector<17xf32>
    %268 = vector.shape_cast %267 : vector<17xf32> to vector<17x1xf32>
    %cst_119 = arith.constant 3.200000e+01 : f32
    %269 = vector.broadcast %cst_119 : f32 to vector<17x1xf32>
    %270 = arith.divf %268, %269 : vector<17x1xf32>
    %271 = vector.broadcast %263 : vector<17x1xf32> to vector<17x32xf32>
    %272 = arith.subf %244, %271 : vector<17x32xf32>
    %cst_120 = arith.constant 9.99999974E-6 : f32
    %273 = vector.broadcast %cst_120 : f32 to vector<17x1xf32>
    %274 = arith.addf %270, %273 : vector<17x1xf32>
    %275 = math.rsqrt %274 : vector<17x1xf32>
    %276 = vector.broadcast %275 : vector<17x1xf32> to vector<17x32xf32>
    %277 = arith.mulf %272, %276 : vector<17x32xf32>
    %278 = vector.broadcast %245 : vector<1x32xf32> to vector<17x32xf32>
    %279 = arith.mulf %277, %278 : vector<17x32xf32>
    %280 = vector.broadcast %246 : vector<1x32xf32> to vector<17x32xf32>
    %281 = arith.addf %279, %280 : vector<17x32xf32>
    %cst_121 = arith.constant dense<0.000000e+00> : vector<17x96xf32>
    %282 = tpu.matmul %281, %253, %cst_121 {dimension_numbers = #tpu.dot_dimension_numbers<[1], [0], [0], [1], [0, 0, 1, 1], [], []>} : vector<17x32xf32>, vector<32x96xf32>, vector<17x96xf32> -> vector<17x96xf32>
    %283 = vector.extract_strided_slice %282 {offsets = [0, 0], sizes = [17, 8], strides = [1, 1]} : vector<17x96xf32> to vector<17x8xf32>
    %284 = vector.extract_strided_slice %282 {offsets = [0, 32], sizes = [17, 8], strides = [1, 1]} : vector<17x96xf32> to vector<17x8xf32>
    %285 = vector.extract_strided_slice %282 {offsets = [0, 64], sizes = [17, 8], strides = [1, 1]} : vector<17x96xf32> to vector<17x8xf32>
    %cst_122 = arith.constant dense<0.000000e+00> : vector<17x17xf32>
    %286 = tpu.matmul %283, %284, %cst_122 {dimension_numbers = #tpu.dot_dimension_numbers<[1], [1], [0], [0], [0, 0, 1, 0], [], []>} : vector<17x8xf32>, vector<17x8xf32>, vector<17x17xf32> -> vector<17x17xf32>
    %cst_123 = arith.constant 0.353553385 : f32
    %287 = vector.broadcast %cst_123 : f32 to vector<17x17xf32>
    %288 = arith.mulf %286, %287 : vector<17x17xf32>
    %cst_124 = arith.constant dense<0xFF800000> : vector<17xf32>
    %289 = vector.multi_reduction <maximumf>, %288, %cst_124 [1] : vector<17x17xf32> to vector<17xf32>
    %290 = vector.shape_cast %289 : vector<17xf32> to vector<17x1xf32>
    %291 = vector.broadcast %290 : vector<17x1xf32> to vector<17x17xf32>
    %292 = arith.subf %288, %291 : vector<17x17xf32>
    %293 = math.exp %292 : vector<17x17xf32>
    %cst_125 = arith.constant dense<0.000000e+00> : vector<17xf32>
    %294 = vector.multi_reduction <add>, %293, %cst_125 [1] : vector<17x17xf32> to vector<17xf32>
    %295 = vector.shape_cast %294 : vector<17xf32> to vector<17x1xf32>
    %296 = tpu.reciprocal %295 {approx = true} : vector<17x1xf32> -> vector<17x1xf32>
    %297 = vector.broadcast %296 : vector<17x1xf32> to vector<17x17xf32>
    %298 = arith.mulf %293, %297 : vector<17x17xf32>
    %cst_126 = arith.constant dense<0.000000e+00> : vector<17x8xf32>
    %299 = tpu.matmul %298, %285, %cst_126 {dimension_numbers = #tpu.dot_dimension_numbers<[1], [0], [0], [1], [0, 0, 1, 1], [], []>} : vector<17x17xf32>, vector<17x8xf32>, vector<17x8xf32> -> vector<17x8xf32>
    %300 = vector.extract_strided_slice %282 {offsets = [0, 8], sizes = [17, 8], strides = [1, 1]} : vector<17x96xf32> to vector<17x8xf32>
    %301 = vector.extract_strided_slice %282 {offsets = [0, 40], sizes = [17, 8], strides = [1, 1]} : vector<17x96xf32> to vector<17x8xf32>
    %302 = vector.extract_strided_slice %282 {offsets = [0, 72], sizes = [17, 8], strides = [1, 1]} : vector<17x96xf32> to vector<17x8xf32>
    %cst_127 = arith.constant dense<0.000000e+00> : vector<17x17xf32>
    %303 = tpu.matmul %300, %301, %cst_127 {dimension_numbers = #tpu.dot_dimension_numbers<[1], [1], [0], [0], [0, 0, 1, 0], [], []>} : vector<17x8xf32>, vector<17x8xf32>, vector<17x17xf32> -> vector<17x17xf32>
    %cst_128 = arith.constant 0.353553385 : f32
    %304 = vector.broadcast %cst_128 : f32 to vector<17x17xf32>
    %305 = arith.mulf %303, %304 : vector<17x17xf32>
    %cst_129 = arith.constant dense<0xFF800000> : vector<17xf32>
    %306 = vector.multi_reduction <maximumf>, %305, %cst_129 [1] : vector<17x17xf32> to vector<17xf32>
    %307 = vector.shape_cast %306 : vector<17xf32> to vector<17x1xf32>
    %308 = vector.broadcast %307 : vector<17x1xf32> to vector<17x17xf32>
    %309 = arith.subf %305, %308 : vector<17x17xf32>
    %310 = math.exp %309 : vector<17x17xf32>
    %cst_130 = arith.constant dense<0.000000e+00> : vector<17xf32>
    %311 = vector.multi_reduction <add>, %310, %cst_130 [1] : vector<17x17xf32> to vector<17xf32>
    %312 = vector.shape_cast %311 : vector<17xf32> to vector<17x1xf32>
    %313 = tpu.reciprocal %312 {approx = true} : vector<17x1xf32> -> vector<17x1xf32>
    %314 = vector.broadcast %313 : vector<17x1xf32> to vector<17x17xf32>
    %315 = arith.mulf %310, %314 : vector<17x17xf32>
    %cst_131 = arith.constant dense<0.000000e+00> : vector<17x8xf32>
    %316 = tpu.matmul %315, %302, %cst_131 {dimension_numbers = #tpu.dot_dimension_numbers<[1], [0], [0], [1], [0, 0, 1, 1], [], []>} : vector<17x17xf32>, vector<17x8xf32>, vector<17x8xf32> -> vector<17x8xf32>
    %317 = vector.extract_strided_slice %282 {offsets = [0, 16], sizes = [17, 8], strides = [1, 1]} : vector<17x96xf32> to vector<17x8xf32>
    %318 = vector.extract_strided_slice %282 {offsets = [0, 48], sizes = [17, 8], strides = [1, 1]} : vector<17x96xf32> to vector<17x8xf32>
    %319 = vector.extract_strided_slice %282 {offsets = [0, 80], sizes = [17, 8], strides = [1, 1]} : vector<17x96xf32> to vector<17x8xf32>
    %cst_132 = arith.constant dense<0.000000e+00> : vector<17x17xf32>
    %320 = tpu.matmul %317, %318, %cst_132 {dimension_numbers = #tpu.dot_dimension_numbers<[1], [1], [0], [0], [0, 0, 1, 0], [], []>} : vector<17x8xf32>, vector<17x8xf32>, vector<17x17xf32> -> vector<17x17xf32>
    %cst_133 = arith.constant 0.353553385 : f32
    %321 = vector.broadcast %cst_133 : f32 to vector<17x17xf32>
    %322 = arith.mulf %320, %321 : vector<17x17xf32>
    %cst_134 = arith.constant dense<0xFF800000> : vector<17xf32>
    %323 = vector.multi_reduction <maximumf>, %322, %cst_134 [1] : vector<17x17xf32> to vector<17xf32>
    %324 = vector.shape_cast %323 : vector<17xf32> to vector<17x1xf32>
    %325 = vector.broadcast %324 : vector<17x1xf32> to vector<17x17xf32>
    %326 = arith.subf %322, %325 : vector<17x17xf32>
    %327 = math.exp %326 : vector<17x17xf32>
    %cst_135 = arith.constant dense<0.000000e+00> : vector<17xf32>
    %328 = vector.multi_reduction <add>, %327, %cst_135 [1] : vector<17x17xf32> to vector<17xf32>
    %329 = vector.shape_cast %328 : vector<17xf32> to vector<17x1xf32>
    %330 = tpu.reciprocal %329 {approx = true} : vector<17x1xf32> -> vector<17x1xf32>
    %331 = vector.broadcast %330 : vector<17x1xf32> to vector<17x17xf32>
    %332 = arith.mulf %327, %331 : vector<17x17xf32>
    %cst_136 = arith.constant dense<0.000000e+00> : vector<17x8xf32>
    %333 = tpu.matmul %332, %319, %cst_136 {dimension_numbers = #tpu.dot_dimension_numbers<[1], [0], [0], [1], [0, 0, 1, 1], [], []>} : vector<17x17xf32>, vector<17x8xf32>, vector<17x8xf32> -> vector<17x8xf32>
    %334 = vector.extract_strided_slice %282 {offsets = [0, 24], sizes = [17, 8], strides = [1, 1]} : vector<17x96xf32> to vector<17x8xf32>
    %335 = vector.extract_strided_slice %282 {offsets = [0, 56], sizes = [17, 8], strides = [1, 1]} : vector<17x96xf32> to vector<17x8xf32>
    %336 = vector.extract_strided_slice %282 {offsets = [0, 88], sizes = [17, 8], strides = [1, 1]} : vector<17x96xf32> to vector<17x8xf32>
    %cst_137 = arith.constant dense<0.000000e+00> : vector<17x17xf32>
    %337 = tpu.matmul %334, %335, %cst_137 {dimension_numbers = #tpu.dot_dimension_numbers<[1], [1], [0], [0], [0, 0, 1, 0], [], []>} : vector<17x8xf32>, vector<17x8xf32>, vector<17x17xf32> -> vector<17x17xf32>
    %cst_138 = arith.constant 0.353553385 : f32
    %338 = vector.broadcast %cst_138 : f32 to vector<17x17xf32>
    %339 = arith.mulf %337, %338 : vector<17x17xf32>
    %cst_139 = arith.constant dense<0xFF800000> : vector<17xf32>
    %340 = vector.multi_reduction <maximumf>, %339, %cst_139 [1] : vector<17x17xf32> to vector<17xf32>
    %341 = vector.shape_cast %340 : vector<17xf32> to vector<17x1xf32>
    %342 = vector.broadcast %341 : vector<17x1xf32> to vector<17x17xf32>
    %343 = arith.subf %339, %342 : vector<17x17xf32>
    %344 = math.exp %343 : vector<17x17xf32>
    %cst_140 = arith.constant dense<0.000000e+00> : vector<17xf32>
    %345 = vector.multi_reduction <add>, %344, %cst_140 [1] : vector<17x17xf32> to vector<17xf32>
    %346 = vector.shape_cast %345 : vector<17xf32> to vector<17x1xf32>
    %347 = tpu.reciprocal %346 {approx = true} : vector<17x1xf32> -> vector<17x1xf32>
    %348 = vector.broadcast %347 : vector<17x1xf32> to vector<17x17xf32>
    %349 = arith.mulf %344, %348 : vector<17x17xf32>
    %cst_141 = arith.constant dense<0.000000e+00> : vector<17x8xf32>
    %350 = tpu.matmul %349, %336, %cst_141 {dimension_numbers = #tpu.dot_dimension_numbers<[1], [0], [0], [1], [0, 0, 1, 1], [], []>} : vector<17x17xf32>, vector<17x8xf32>, vector<17x8xf32> -> vector<17x8xf32>
    %351 = tpu.concatenate %299, %316, %333, %350 in 1 : vector<17x8xf32>, vector<17x8xf32>, vector<17x8xf32>, vector<17x8xf32> -> vector<17x32xf32>
    %cst_142 = arith.constant dense<0.000000e+00> : vector<17x32xf32>
    %352 = tpu.matmul %351, %255, %cst_142 {dimension_numbers = #tpu.dot_dimension_numbers<[1], [0], [0], [1], [0, 0, 1, 1], [], []>} : vector<17x32xf32>, vector<32x32xf32>, vector<17x32xf32> -> vector<17x32xf32>
    %353 = vector.broadcast %247 : vector<1x32xf32> to vector<17x32xf32>
    %354 = arith.addf %352, %353 : vector<17x32xf32>
    %355 = arith.addf %354, %244 : vector<17x32xf32>
    %cst_143 = arith.constant dense<0.000000e+00> : vector<17xf32>
    %356 = vector.multi_reduction <add>, %355, %cst_143 [1] : vector<17x32xf32> to vector<17xf32>
    %357 = vector.shape_cast %356 : vector<17xf32> to vector<17x1xf32>
    %cst_144 = arith.constant 3.200000e+01 : f32
    %358 = vector.broadcast %cst_144 : f32 to vector<17x1xf32>
    %359 = arith.divf %357, %358 : vector<17x1xf32>
    %360 = vector.broadcast %359 : vector<17x1xf32> to vector<17x32xf32>
    %361 = arith.subf %355, %360 : vector<17x32xf32>
    %362 = arith.mulf %361, %361 : vector<17x32xf32>
    %cst_145 = arith.constant dense<0.000000e+00> : vector<17xf32>
    %363 = vector.multi_reduction <add>, %362, %cst_145 [1] : vector<17x32xf32> to vector<17xf32>
    %364 = vector.shape_cast %363 : vector<17xf32> to vector<17x1xf32>
    %cst_146 = arith.constant 3.200000e+01 : f32
    %365 = vector.broadcast %cst_146 : f32 to vector<17x1xf32>
    %366 = arith.divf %364, %365 : vector<17x1xf32>
    %367 = vector.broadcast %359 : vector<17x1xf32> to vector<17x32xf32>
    %368 = arith.subf %355, %367 : vector<17x32xf32>
    %cst_147 = arith.constant 9.99999974E-6 : f32
    %369 = vector.broadcast %cst_147 : f32 to vector<17x1xf32>
    %370 = arith.addf %366, %369 : vector<17x1xf32>
    %371 = math.rsqrt %370 : vector<17x1xf32>
    %372 = vector.broadcast %371 : vector<17x1xf32> to vector<17x32xf32>
    %373 = arith.mulf %368, %372 : vector<17x32xf32>
    %374 = vector.broadcast %248 : vector<1x32xf32> to vector<17x32xf32>
    %375 = arith.mulf %373, %374 : vector<17x32xf32>
    %376 = vector.broadcast %249 : vector<1x32xf32> to vector<17x32xf32>
    %377 = arith.addf %375, %376 : vector<17x32xf32>
    %cst_148 = arith.constant dense<0.000000e+00> : vector<17x64xf32>
    %378 = tpu.matmul %377, %257, %cst_148 {dimension_numbers = #tpu.dot_dimension_numbers<[1], [0], [0], [1], [0, 0, 1, 1], [], []>} : vector<17x32xf32>, vector<32x64xf32>, vector<17x64xf32> -> vector<17x64xf32>
    %379 = vector.broadcast %250 : vector<1x64xf32> to vector<17x64xf32>
    %380 = arith.addf %378, %379 : vector<17x64xf32>
    %cst_149 = arith.constant 5.000000e-01 : f32
    %381 = vector.broadcast %cst_149 : f32 to vector<17x64xf32>
    %382 = arith.mulf %381, %380 : vector<17x64xf32>
    %cst_150 = arith.constant 0.707106769 : f32
    %383 = vector.broadcast %cst_150 : f32 to vector<17x64xf32>
    %384 = arith.mulf %380, %383 : vector<17x64xf32>
    %cst_151 = arith.constant 0.000000e+00 : f32
    %385 = vector.broadcast %cst_151 : f32 to vector<17x64xf32>
    %386 = arith.cmpf oge, %384, %385 : vector<17x64xf32>
    %cst_152 = arith.constant 1.000000e+00 : f32
    %cst_153 = arith.constant -1.000000e+00 : f32
    %387 = vector.broadcast %cst_152 : f32 to vector<17x64xf32>
    %388 = vector.broadcast %cst_153 : f32 to vector<17x64xf32>
    %389 = arith.select %386, %387, %388 : vector<17x64xi1>, vector<17x64xf32>
    %390 = math.absf %384 : vector<17x64xf32>
    %cst_154 = arith.constant 0.327591091 : f32
    %391 = vector.broadcast %cst_154 : f32 to vector<17x64xf32>
    %392 = arith.mulf %391, %390 : vector<17x64xf32>
    %cst_155 = arith.constant 1.000000e+00 : f32
    %393 = vector.broadcast %cst_155 : f32 to vector<17x64xf32>
    %394 = arith.addf %393, %392 : vector<17x64xf32>
    %cst_156 = arith.constant 1.000000e+00 : f32
    %395 = vector.broadcast %cst_156 : f32 to vector<17x64xf32>
    %396 = arith.divf %395, %394 : vector<17x64xf32>
    %cst_157 = arith.constant 1.06140542 : f32
    %397 = vector.broadcast %cst_157 : f32 to vector<17x64xf32>
    %398 = arith.mulf %397, %396 : vector<17x64xf32>
    %cst_158 = arith.constant -1.45315206 : f32
    %399 = vector.broadcast %cst_158 : f32 to vector<17x64xf32>
    %400 = arith.addf %398, %399 : vector<17x64xf32>
    %401 = arith.mulf %400, %396 : vector<17x64xf32>
    %cst_159 = arith.constant 1.42141378 : f32
    %402 = vector.broadcast %cst_159 : f32 to vector<17x64xf32>
    %403 = arith.addf %401, %402 : vector<17x64xf32>
    %404 = arith.mulf %403, %396 : vector<17x64xf32>
    %cst_160 = arith.constant -0.284496725 : f32
    %405 = vector.broadcast %cst_160 : f32 to vector<17x64xf32>
    %406 = arith.addf %404, %405 : vector<17x64xf32>
    %407 = arith.mulf %406, %396 : vector<17x64xf32>
    %cst_161 = arith.constant 0.254829586 : f32
    %408 = vector.broadcast %cst_161 : f32 to vector<17x64xf32>
    %409 = arith.addf %407, %408 : vector<17x64xf32>
    %410 = arith.mulf %409, %396 : vector<17x64xf32>
    %cst_162 = arith.constant 0.000000e+00 : f32
    %411 = vector.broadcast %cst_162 : f32 to vector<17x64xf32>
    %412 = arith.subf %411, %390 : vector<17x64xf32>
    %413 = arith.mulf %412, %390 : vector<17x64xf32>
    %414 = math.exp %413 : vector<17x64xf32>
    %415 = arith.mulf %410, %414 : vector<17x64xf32>
    %cst_163 = arith.constant 1.000000e+00 : f32
    %416 = vector.broadcast %cst_163 : f32 to vector<17x64xf32>
    %417 = arith.subf %416, %415 : vector<17x64xf32>
    %418 = arith.mulf %389, %417 : vector<17x64xf32>
    %cst_164 = arith.constant 1.000000e+00 : f32
    %419 = vector.broadcast %cst_164 : f32 to vector<17x64xf32>
    %420 = arith.addf %419, %418 : vector<17x64xf32>
    %421 = arith.mulf %382, %420 : vector<17x64xf32>
    %cst_165 = arith.constant dense<0.000000e+00> : vector<17x32xf32>
    %422 = tpu.matmul %421, %259, %cst_165 {dimension_numbers = #tpu.dot_dimension_numbers<[1], [0], [0], [1], [0, 0, 1, 1], [], []>} : vector<17x64xf32>, vector<64x32xf32>, vector<17x32xf32> -> vector<17x32xf32>
    %423 = vector.broadcast %251 : vector<1x32xf32> to vector<17x32xf32>
    %424 = arith.addf %422, %423 : vector<17x32xf32>
    %425 = arith.addf %424, %355 : vector<17x32xf32>
    %426 = vector.extract_strided_slice %425 {offsets = [0, 0], sizes = [1, 32], strides = [1, 1]} : vector<17x32xf32> to vector<1x32xf32>
    %cst_166 = arith.constant dense<0.000000e+00> : vector<1xf32>
    %427 = vector.multi_reduction <add>, %426, %cst_166 [1] : vector<1x32xf32> to vector<1xf32>
    %428 = vector.shape_cast %427 : vector<1xf32> to vector<1x1xf32>
    %cst_167 = arith.constant 3.200000e+01 : f32
    %429 = vector.broadcast %cst_167 : f32 to vector<1x1xf32>
    %430 = arith.divf %428, %429 : vector<1x1xf32>
    %431 = vector.broadcast %430 : vector<1x1xf32> to vector<1x32xf32>
    %432 = arith.subf %426, %431 : vector<1x32xf32>
    %433 = arith.mulf %432, %432 : vector<1x32xf32>
    %cst_168 = arith.constant dense<0.000000e+00> : vector<1xf32>
    %434 = vector.multi_reduction <add>, %433, %cst_168 [1] : vector<1x32xf32> to vector<1xf32>
    %435 = vector.shape_cast %434 : vector<1xf32> to vector<1x1xf32>
    %cst_169 = arith.constant 3.200000e+01 : f32
    %436 = vector.broadcast %cst_169 : f32 to vector<1x1xf32>
    %437 = arith.divf %435, %436 : vector<1x1xf32>
    %438 = vector.broadcast %430 : vector<1x1xf32> to vector<1x32xf32>
    %439 = arith.subf %426, %438 : vector<1x32xf32>
    %cst_170 = arith.constant 9.99999974E-6 : f32
    %440 = vector.broadcast %cst_170 : f32 to vector<1x1xf32>
    %441 = arith.addf %437, %440 : vector<1x1xf32>
    %442 = math.rsqrt %441 : vector<1x1xf32>
    %443 = vector.broadcast %442 : vector<1x1xf32> to vector<1x32xf32>
    %444 = arith.mulf %439, %443 : vector<1x32xf32>
    %445 = arith.mulf %444, %8 : vector<1x32xf32>
    %446 = arith.addf %445, %9 : vector<1x32xf32>
    %c0_171 = arith.constant 0 : index
    %c0_172 = arith.constant 0 : index
    %447 = vector.load %arg5[%c0_171, %c0_172] : memref<32x128xf32, #tpu.memory_space<vmem>>, vector<32x128xf32>
    %cst_173 = arith.constant dense<0.000000e+00> : vector<1x128xf32>
    %448 = tpu.matmul %446, %447, %cst_173 {dimension_numbers = #tpu.dot_dimension_numbers<[1], [0], [0], [1], [0, 0, 1, 1], [], []>} : vector<1x32xf32>, vector<32x128xf32>, vector<1x128xf32> -> vector<1x128xf32>
    %449 = arith.addf %448, %10 : vector<1x128xf32>
    %c0_174 = arith.constant 0 : index
    %c0_175 = arith.constant 0 : index
    %c0_176 = arith.constant 0 : index
    %450 = vector.load %arg6[%c0_174, %c0_175, %c0_176] : memref<1x1x128xf32, #tpu.memory_space<vmem>>, vector<1x1x128xf32>
    %451 = vector.shape_cast %450 : vector<1x1x128xf32> to vector<1x128xf32>
    %452 = vector.shape_cast %449 : vector<1x128xf32> to vector<1x1x128xf32>
    tpu.vector_store %arg6[%c0_174, %c0_175, %c0_176], %452 {strides = array<i32>} : memref<1x1x128xf32, #tpu.memory_space<vmem>>, vector<1x1x128xf32>,
    return
  }
  func.func @transform_0(%arg0: i32) -> (i32, i32, i32) {
    %c0_i32 = arith.constant 0 : i32
    %c0_i32_0 = arith.constant 0 : i32
    %c0_i32_1 = arith.constant 0 : i32
    return %arg0, %c0_i32, %c0_i32_0 : i32, i32, i32
  }
  func.func @transform_1(%arg0: i32) -> (i32, i32) {
    %c0_i32 = arith.constant 0 : i32
    %c0_i32_0 = arith.constant 0 : i32
    %c0_i32_1 = arith.constant 0 : i32
    return %c0_i32, %c0_i32_0 : i32, i32
  }
  func.func @transform_2(%arg0: i32) -> (i32, i32) {
    %c0_i32 = arith.constant 0 : i32
    %c0_i32_0 = arith.constant 0 : i32
    %c0_i32_1 = arith.constant 0 : i32
    return %c0_i32, %c0_i32_0 : i32, i32
  }
  func.func @transform_3(%arg0: i32) -> (i32, i32, i32) {
    %c0_i32 = arith.constant 0 : i32
    %c0_i32_0 = arith.constant 0 : i32
    %c0_i32_1 = arith.constant 0 : i32
    %c0_i32_2 = arith.constant 0 : i32
    return %c0_i32, %c0_i32_0, %c0_i32_1 : i32, i32, i32
  }
  func.func @transform_4(%arg0: i32) -> (i32, i32) {
    %c0_i32 = arith.constant 0 : i32
    %c0_i32_0 = arith.constant 0 : i32
    %c0_i32_1 = arith.constant 0 : i32
    return %c0_i32, %c0_i32_0 : i32, i32
  }
  func.func @transform_5(%arg0: i32) -> (i32, i32, i32) {
    %c0_i32 = arith.constant 0 : i32
    %c0_i32_0 = arith.constant 0 : i32
    %c0_i32_1 = arith.constant 0 : i32
    return %arg0, %c0_i32, %c0_i32_0 : i32, i32, i32
  }
}

</mosaic_0001>

<bundles_post_ra>
// kernel: tpu_custom_call.1
= control target key start
LH: loop header
LB: loop body
LE: loop exit
PB: predicated region body
PF: predicated region fallthrough
CT: control target
= control target key end

     0   :  { %10 = vsyncpa [#allocation4], 0  ;;  %s6137_s0 = inlined_call_operand.vmem [shape: f32[2,17,48], index: 0, kind: input, shape index: {}]   ;;  %s6138_s1 = inlined_call_operand.vmem [shape: f32[40,128], index: 1, kind: input, shape index: {}]   ;;  %s6139_s2 = inlined_call_operand.vmem [shape: f32[48,32], index: 2, kind: input, shape index: {}]   ;;  %s6140_s3 = inlined_call_operand.hbm [shape: f32[2,96,192], index: 3, kind: input, shape index: {}]   ;;  %s6141_s4 = inlined_call_operand.vmem [shape: f32[32,128], index: 4, kind: input, shape index: {}]   ;;  %s6142_s5 = inlined_call_operand.hbm [shape: f32[2,1,128], index: 5, kind: output, shape index: {}]  }
   0x1   :  { %11 = vsyncpa [#allocation5], 0 }
   0x2   :  { %13 = vsyncpa [#allocation5 + $0x1], 0  ;;  %s4960_s18 = smov 0   ;;  %s4962_s19 = smov 0  }
   0x3   :  { %s4964_s20 = smov 0   ;;  %s4966_s21 = smov 0  }
   0x4 LB: > { %s4981_s22 = sadd.s32 4294967295, %s4906_s21   ;;  %s3846_s23 = sadd.s32 4294967294, %s4906_s21   ;;  %s4906_s21 = sphi %s4966_s21, %s6159_s21   ;;  %s4902_s20 = sphi %s4964_s20, %s6158_s20   ;;  %s4898_s19 = sphi %s4962_s19, %s6157_s19   ;;  %s4894_s18 = sphi %s4960_s18, %s6156_s18  }
   0x5   : > { %s4985_s24 = sadd.s32 1, %s4906_s21   ;;  %s136_s25 = sadd.s32 1, %s4902_s20 }
   0x6   : > { %s133_s26 = ssub.s32 %s4906_s21, %s4985_s24  ;;  %p146_p0 = scmp.ne.s32.totalorder %s4902_s20, %s4898_s19 }
   0x7   : > { %p134_p1 = scmp.eq.s32.totalorder %s133_s26, 0  ;;  %p147_p2 = scmp.eq.s32.totalorder %s4981_s22, 1 }
   0x8   : > { %p152_p3 = scmp.ne.s32.totalorder %s4898_s19, %s4894_s18  ;;  %p153_p4 = scmp.eq.s32.totalorder %s3846_s23, 1 }
   0x9   : > { %s4996_s27 = scalar_select %p134_p1, %s4902_s20, %s136_s25  }
   0xa   : > { %p4998_p5 = por %p147_p2, %p146_p0  ;;  %p5002_p6 = por %p153_p4, %p152_p3 }
   0xb   : > { %p3847_p7 = scmp.ge.s32.totalorder %s4906_s21, 1  ;;  %p160_p8 = scmp.lt.s32.totalorder %s4906_s21, 3 }
   0xc   : > { %s6150_s29 = scalar_select %p5002_p6, 1, 0 }
   0xd   : > { %p4602_p9 = scmp.eq.s32.totalorder %s4981_s22, 0  ;;  %p5009_p10 = pnand %p3847_p7, %p160_p8 }
   0xe   : > { %s4908_s6 = smov [#allocation3]  }
   0xf   : > { %s178_s7 = sshll.u32 %s4908_s6, 4  ;;  %p4594_p11 = pneg %p5009_p10  ;;  %s179_s7 = int_to_ptr.vmem [resolvable:$true] %s178_s7 }
  0x10   : > { %s4827_s8 = scalar_lea.vmem %s179_s7, 6144  ;;  %p4835_p3 = scmp.lt.s32.totalorder %s179_s7, %s179_s7 }
  0x11   : > { %p4595_p12 = pnand %p4602_p9, %p4594_p11  ;;  %p4828_p0 = scmp.ne.s32.totalorder %s179_s7, %s4827_s8 }
  0x12   : > { %p4836_p4 = scmp.lt.s32.totalorder %s4827_s8, %s4827_s8 }
  0x13   : > { %p4818_p13 = pneg %p4595_p12 }
  0x14   : > { %p4837_p6 = por %p4836_p4, %p4835_p3 }
  0x15   : > { %p4830_p1 = pnand %p4828_p0, %p4818_p13 }
  0x17   : > { %p4831_p2 = pneg %p4830_p1 }
  0x19   : > { %p4838_p7 = pnand %p4837_p6, %p4831_p2 }
  0x1b   : > { %4841 = shalt.err (!%p4838_p7)
}
  0x1c   : > { %s4909_s9 = smov 256   ;;  %s4910_s10 = smov 16  }
  0x1d   : > { %4597 = dma.hbm_to_vmem [thread:$0]  (!%p4595_p12), %s6140_s3, 6144, %s179_s7, [#allocation4], %s4909_s9, %s4909_s9, %s4910_s10  }
  0x1e   : > { %205 = sbr.rel (%p5009_p10) target bundleno = 6426 (0x191a), region = 40 }
  0x23   : > { %4885 = dma.done.wait (%p4602_p9), [#allocation4], 6144  }
  0x24   : > { %4887 = vsyncadd (%p4602_p9), [#allocation4], 4294961152  ;;  %p232_p8 = scmp.lt.s32.totalorder %s4981_s22, 1  ;;  %vm252_vm0 = vcmask 392192   ;;  %vm259_vm1 = vcmask 385024   ;;  %v313_v21 = vld [vmem:[%s6139_s2 + $0x28] sm:$0xff] }
  0x25   : > { %v4911_v22 = vmov 0.0   ;;  %v312_v23 = vld [vmem:[%s6139_s2 + $0x20] sm:$0xff]  ;;  %vm4912_vm2 = vmmov 0   ;;  %v311_v24 = vld [vmem:[%s6139_s2 + $0x18] sm:$0xff]  ;;  %v310_v25 = vld [vmem:[%s6139_s2 + $0x10] sm:$0xff]  ;;  %vm407_vm3 = vcmask 261120  }
  0x26   : > { %s233_s13 = scalar_select %p232_p8, %s4981_s22, 1  ;;  %4157 = vmatprep.subr.mxu0 %v4911_v22  ;;  %4169 = vmatprep.mubr.msk.f32.mxu0 %vm4912_vm2, %v4911_v22  ;;  %v309_v26 = vld [vmem:[%s6139_s2 + $0x8] sm:$0xff]  ;;  %v308_v27 = vld [vmem:[%s6139_s2] sm:$0xff]  ;;  %vm414_vm4 = vcmask 253952   ;;  %vm647_vm5 = vcmask 64512   ;;  %vm795_vm6 = vcmask 1040384  }
  0x27   : > { %4158 = vmatpush3.msra.mxu0 %v313_v21  ;;  %4178 = vmatprep.subr.mxu1 %v4911_v22  ;;  %v3853_v38 = vld [vmem:[%s6138_s1] ss:$0 sm:$0xff]  ;;  %v3854_v40 = vld [vmem:[%s6138_s1 + $0x1] ss:$0 sm:$0xff]  ;;  %v3855_v51 = vld [vmem:[%s6138_s1 + $0x2] ss:$0 sm:$0xff] }
  0x28   : > { %s4587_s14 = smul.u32 24, %s233_s13  ;;  %4159 = vmatprep.subr.mxu0 %v4911_v22  ;;  %4186 = vmatprep.mubr.msk.f32.mxu1 %vm4912_vm2, %v4911_v22  ;;  %s4913_s26 = smov 96   ;;  %vm743_vm7 = vcmask 138240   ;;  %vm750_vm8 = vcmask 131072   ;;  %vm1634_vm9 = vcmask 130048   ;;  %vm1638_vm10 = vcmask 195584  }
  0x29   : > { %4160 = vmatpush3.msra.mxu0 %v312_v23  ;;  %s4914_s30 = smov 88   ;;  %s4915_s6 = smov 120   ;;  %vm1985_vm13 = vcmask 523264  }
  0x2a   : > { %s236_s17 = scalar_lea.vmem %s6137_s0, %s4587_s14  ;;  %4161 = vmatprep.subr.mxu0 %v4911_v22  ;;  %s4916_s7 = smov 80  }
  0x2b   : > { %v237_v0 = vld [vmem:[%s236_s17] sm:$0xff]  ;;  %v239_v1 = vld [vmem:[%s236_s17 + $0x10] sm:$0x1]  ;;  %v238_v2 = vld [vmem:[%s236_s17 + $0x8] sm:$0xff]  ;;  %4162 = vmatpush3.msra.mxu0 %v311_v24  ;;  %s4917_s8 = smov 112   ;;  %s4918_s9 = smov 72  }
  0x2c   : > { %v253_v3 = vsel %vm252_vm0, %v237_v0, 0.0  ;;  %v260_v4 = vsel %vm259_vm1, %v239_v1, 0.0  ;;  %v256_v5 = vsel %vm252_vm0, %v238_v2, 0.0  ;;  %4163 = vmatprep.subr.mxu0 %v4911_v22  ;;  %s4919_s10 = smov 104   ;;  %s4920_s11 = smov 64  }
  0x2d   : > { %254 = vadd.xlane.f32.xlu0 %v253_v3  ;;  %261 = vadd.xlane.f32.xlu1 %v260_v4  ;;  %s4921_s12 = smov 56   ;;  %s4922_s13 = smov 48  }
  0x2e   : > { %4164 = vmatpush3.msra.mxu0 %v310_v25  ;;  %s4923_s14 = smov 40   ;;  %s4924_s15 = smov 32  }
  0x2f   : > { %4165 = vmatprep.subr.mxu0 %v4911_v22  ;;  %s6147_s16 = smov 8   ;;  %s6145_s17 = smov 16  }
  0x30   : > { %4166 = vmatpush3.msra.mxu0 %v309_v26  ;;  %v3859_v26 = vld [vmem:[%s6138_s1 + $0x3] ss:$0 sm:$0xff]  ;;  %s6143_s23 = smov 24  }
  0x31   : > { %257 = vadd.xlane.f32.xlu0 %v256_v5  ;;  %4167 = vmatprep.subr.mxu0 %v4911_v22 }
  0x32   : > { %4168 = vmatpush3.msra.mxu0 %v308_v27 }
  0x33   : > { %4210 = vmatprep.subr.mxu0 %v4911_v22 }
  0xb6   : > { %v255_v6 = vpop.xlane.xlu0 %254  ;;  %v262_v7 = vpop.xlane.xlu1 %261 }
  0xb7   : > { %v264_v8 = vmul.f32 0.020833334, %v255_v6  ;;  %v266_v9 = vmul.f32 0.020833334, %v262_v7 }
  0xb9   : > { %v267_v10 = vsub.f32 %v237_v0, %v264_v8  ;;  %v269_v11 = vsub.f32 %v239_v1, %v266_v9 }
  0xba   : > { %v258_v12 = vpop.xlane.xlu0 %257 }
  0xbb   : > { %v265_v13 = vmul.f32 0.020833334, %v258_v12  ;;  %v270_v14 = vmul.f32 %v267_v10, %v267_v10  ;;  %v272_v15 = vmul.f32 %v269_v11, %v269_v11 }
  0xbd   : > { %v268_v16 = vsub.f32 %v238_v2, %v265_v13  ;;  %v273_v17 = vsel %vm252_vm0, %v270_v14, 0.0  ;;  %v279_v18 = vsel %vm259_vm1, %v272_v15, 0.0 }
  0xbe   : > { %274 = vadd.xlane.f32.xlu1 %v273_v17 }
  0xbf   : > { %v271_v19 = vmul.f32 %v268_v16, %v268_v16 }
  0xc1   : > { %v276_v20 = vsel %vm252_vm0, %v271_v19, 0.0 }
  0xc2   : > { %280 = vadd.xlane.f32.xlu1 %v279_v18  ;;  %277 = vadd.xlane.f32.xlu0 %v276_v20 }
 0x147   : > { %v275_v28 = vpop.xlane.xlu1 %274 }
 0x148   : > { %v282_v29 = vmul.f32 0.020833334, %v275_v28  ;;  %v3860_v28 = vld [vmem:[%s6138_s1 + $0x4] ss:$0 sm:$0xff] }
 0x14a   : > { %v285_v30 = vadd.f32 1e-05, %v282_v29 }
 0x14b   : > { %v281_v31 = vpop.xlane.xlu1 %280  ;;  %v278_v32 = vpop.xlane.xlu0 %277 }
 0x14c   : > { %4658 = vrsqrt.f32 %v285_v30  ;;  %v284_v33 = vmul.f32 0.020833334, %v281_v31  ;;  %v283_v34 = vmul.f32 0.020833334, %v278_v32  ;;  %v245_v31 = vld [vmem:[%s6138_s1 + $0x5] sm:$0x1] }
 0x14e   : > { %v287_v35 = vadd.f32 1e-05, %v284_v33  ;;  %v286_v36 = vadd.f32 1e-05, %v283_v34 }
 0x150   : > { %4660 = vrsqrt.f32 %v287_v35 }
 0x151   : > { %4662 = vrsqrt.f32 %v286_v36 }
 0x159   : > { %v4659_v37 = vpop.eup %4658 }
 0x15a   : > { %v291_v39 = vmul.f32 %v4659_v37, %v267_v10 }
 0x15c   : > { %v298_v41 = vmul.f32 %v3853_v38, %v291_v39  ;;  %v249_v39 = vld [vmem:[%s6138_s1 + $0x17] sm:$0xff] }
 0x15d   : > { %v4661_v42 = vpop.eup %4660 }
 0x15e   : > { %v4663_v43 = vpop.eup %4662  ;;  %v305_v44 = vadd.f32 %v3854_v40, %v298_v41  ;;  %v293_v46 = vmul.f32 %v4661_v42, %v269_v11 }
 0x15f   : > { %v292_v45 = vmul.f32 %v4663_v43, %v268_v16  ;;  %v250_v43 = vld [vmem:[%s6138_s1 + $0x1f] sm:$0xff] }
 0x160   : > { %4170 = vmatmul.mubr.msk.f32.vlgmr.msra.gmra.mxu0 %vm252_vm0, %v305_v44  ;;  %v300_v49 = vmul.f32 %v3853_v38, %v293_v46 }
 0x161   : > { %4172 = vmatprep.mubr.msk.f32.mxu0 %vm4912_vm2, %v4911_v22  ;;  %v299_v47 = vmul.f32 %v3853_v38, %v292_v45 }
 0x162   : > { %v307_v50 = vadd.f32 %v3854_v40, %v300_v49 }
 0x163   : > { %v306_v48 = vadd.f32 %v3854_v40, %v299_v47  ;;  %v251_v47 = vld [vmem:[%s6138_s1 + $0x27] sm:$0x1] }
 0x165   : > { %4173 = vmatmul.mubr.msk.f32.gmra.mxu0 %vm252_vm0, %v306_v48 }
 0x166   : > { %4175 = vmatprep.mubr.msk.f32.mxu0 %vm4912_vm2, %v4911_v22 }
 0x169   : > { %4176 = vmatmul.mubr.msk.f32.gmra.mxu0 %vm252_vm0, %v307_v50 }
 0x16a   : > { %4216 = vmatprep.mubr.msk.f32.mxu0 %vm4912_vm2, %v4911_v22 }
 0x220   : > { %v393_v52 = vpop.f32.mrf.mxu0 }
 0x221   : > { %v394_v53 = vadd.f32 %v3855_v51, %v393_v52 }
 0x222   : > { %v4171_v54 = vpop.f32.mrf.mxu0 }
 0x223   : > { %v408_v55 = vsel %vm407_vm3, %v394_v53, 0.0 }
 0x224   : > { %409 = vadd.xlane.f32.xlu0 %v408_v55 }
 0x225   : > { %v398_v56 = vpop.f32.mrf.mxu0 }
 0x226   : > { %v399_v57 = vadd.f32 %v3855_v51, %v398_v56 }
 0x227   : > { %v4174_v58 = vpop.f32.mrf.mxu0 }
 0x228   : > { %v411_v59 = vsel %vm407_vm3, %v399_v57, 0.0 }
 0x229   : > { %412 = vadd.xlane.f32.xlu1 %v411_v59  ;;  %v403_v60 = vpop.f32.mrf.mxu0 }
 0x22a   : > { %v404_v61 = vadd.f32 %v3855_v51, %v403_v60 }
 0x22b   : > { %v4177_v62 = vpop.f32.mrf.mxu0 }
 0x22c   : > { %v415_v63 = vsel %vm414_vm4, %v404_v61, 0.0 }
 0x22d   : > { %416 = vadd.xlane.f32.xlu0 %v415_v63 }
 0x2ad   : > { %v410_v0 = vpop.xlane.xlu0 %409 }
 0x2ae   : > { %v419_v1 = vmul.f32 0.03125, %v410_v0 }
 0x2b0   : > { %v422_v2 = vsub.f32 %v394_v53, %v419_v1 }
 0x2b2   : > { %v413_v3 = vpop.xlane.xlu1 %412  ;;  %v425_v4 = vmul.f32 %v422_v2, %v422_v2 }
 0x2b3   : > { %v420_v5 = vmul.f32 0.03125, %v413_v3  ;;  %v5131_v3 = vld [vmem:[#allocation3 + $0x30] sm:$0xff] }
 0x2b4   : > { %v428_v6 = vsel %vm407_vm3, %v425_v4, 0.0  ;;  %v5133_v4 = vld [vmem:[#allocation3 + $0x20] sm:$0xff]  ;;  %4179 = vmatpush3.msra.mxu1 %v5131_v3 }
 0x2b5   : > { %v423_v7 = vsub.f32 %v399_v57, %v420_v5  ;;  %429 = vadd.xlane.f32.xlu1 %v428_v6  ;;  %4180 = vmatprep.subr.mxu1 %v4911_v22  ;;  %v5137_v5 = vld [vmem:[#allocation3 + $0x10] sm:$0xff]  ;;  %v5141_v6 = vld [vmem:[#allocation3] sm:$0xff] }
 0x2b6   : > { %v417_v8 = vpop.xlane.xlu0 %416  ;;  %4181 = vmatpush3.msra.mxu1 %v5133_v4 }
 0x2b7   : > { %v421_v9 = vmul.f32 0.03125, %v417_v8  ;;  %v426_v10 = vmul.f32 %v423_v7, %v423_v7  ;;  %4182 = vmatprep.subr.mxu1 %v4911_v22 }
 0x2b8   : > { %4183 = vmatpush3.msra.mxu1 %v5137_v5 }
 0x2b9   : > { %v424_v11 = vsub.f32 %v404_v61, %v421_v9  ;;  %v431_v12 = vsel %vm407_vm3, %v426_v10, 0.0  ;;  %4184 = vmatprep.subr.mxu1 %v4911_v22 }
 0x2ba   : > { %432 = vadd.xlane.f32.xlu0 %v431_v12  ;;  %4185 = vmatpush3.msra.mxu1 %v5141_v6 }
 0x2bb   : > { %v427_v13 = vmul.f32 %v424_v11, %v424_v11  ;;  %4195 = vmatprep.subr.mxu1 %v4911_v22 }
 0x2bd   : > { %v434_v14 = vsel %vm414_vm4, %v427_v13, 0.0 }
 0x2be   : > { %435 = vadd.xlane.f32.xlu1 %v434_v14 }
 0x33e   : > { %v430_v15 = vpop.xlane.xlu1 %429 }
 0x33f   : > { %v437_v16 = vmul.f32 0.03125, %v430_v15 }
 0x341   : > { %v440_v17 = vadd.f32 1e-05, %v437_v16 }
 0x343   : > { %4664 = vrsqrt.f32 %v440_v17  ;;  %v433_v18 = vpop.xlane.xlu0 %432  ;;  %v3861_v17 = vld [vmem:[%s6138_s1 + $0x9] ss:$0 sm:$0xff] }
 0x344   : > { %v438_v19 = vmul.f32 0.03125, %v433_v18 }
 0x346   : > { %v441_v20 = vadd.f32 1e-05, %v438_v19  ;;  %v3862_v19 = vld [vmem:[%s6138_s1 + $0xa] ss:$0 sm:$0xff] }
 0x347   : > { %v436_v21 = vpop.xlane.xlu1 %435 }
 0x348   : > { %4666 = vrsqrt.f32 %v441_v20  ;;  %v439_v23 = vmul.f32 0.03125, %v436_v21 }
 0x34a   : > { %v442_v24 = vadd.f32 1e-05, %v439_v23 }
 0x34c   : > { %4668 = vrsqrt.f32 %v442_v24 }
 0x350   : > { %v4665_v25 = vpop.eup %4664 }
 0x351   : > { %v446_v27 = vmul.f32 %v4665_v25, %v422_v2 }
 0x353   : > { %v453_v29 = vmul.f32 %v3859_v26, %v446_v27 }
 0x355   : > { %v4667_v30 = vpop.eup %4666  ;;  %v460_v32 = vadd.f32 %v3860_v28, %v453_v29 }
 0x356   : > { %v447_v33 = vmul.f32 %v4667_v30, %v423_v7 }
 0x357   : > { %463 = vst.msk [vmem:[#allocation2] sm:$0xff] %vm407_vm3, %v460_v32 }
 0x358   : > { %466 = vst.msk [vmem:[#allocation2] sm:$0x1] %vm414_vm4, %v245_v31  ;;  %v454_v34 = vmul.f32 %v3859_v26, %v447_v33 }
 0x359   : > { %v4669_v35 = vpop.eup %4668 }
 0x35a   : > { %v461_v36 = vadd.f32 %v3860_v28, %v454_v34  ;;  %v448_v37 = vmul.f32 %v4669_v35, %v424_v11 }
 0x35c   : > { %464 = vst.msk [vmem:[#allocation2 + $0x8] sm:$0xff] %vm407_vm3, %v461_v36  ;;  %v455_v38 = vmul.f32 %v3859_v26, %v448_v37 }
 0x35e   : > { %v462_v40 = vadd.f32 %v3860_v28, %v455_v38 }
 0x35f   : > { %v467_v41 = vld [vmem:[#allocation2] sm:$0xff] }
 0x360   : > { %465 = vst.msk [vmem:[#allocation2 + $0x10] sm:$0x1] %vm414_vm4, %v462_v40  ;;  %v5107_v42 = vadd.f32 %v467_v41, %v249_v39 }
 0x362   : > { %v496_v44 = vsel %vm407_vm3, %v5107_v42, 0.0 }
 0x363   : > { %497 = vadd.xlane.f32.xlu0 %v496_v44  ;;  %v468_v45 = vld [vmem:[#allocation2 + $0x8] sm:$0xff] }
 0x364   : > { %v5114_v46 = vadd.f32 %v468_v45, %v250_v43 }
 0x366   : > { %v499_v48 = vsel %vm407_vm3, %v5114_v46, 0.0 }
 0x367   : > { %500 = vadd.xlane.f32.xlu1 %v499_v48  ;;  %v469_v49 = vld [vmem:[#allocation2 + $0x10] sm:$0x1] }
 0x368   : > { %v5121_v50 = vadd.f32 %v469_v49, %v251_v47 }
 0x36a   : > { %v502_v51 = vsel %vm414_vm4, %v5121_v50, 0.0 }
 0x36b   : > { %503 = vadd.xlane.f32.xlu0 %v502_v51 }
 0x3ec   : > { %v498_v52 = vpop.xlane.xlu0 %497 }
 0x3ed   : > { %v505_v53 = vmul.f32 0.03125, %v498_v52 }
 0x3ef   : > { %v508_v54 = vsub.f32 %v5107_v42, %v505_v53 }
 0x3f0   : > { %v501_v55 = vpop.xlane.xlu1 %500 }
 0x3f1   : > { %v506_v56 = vmul.f32 0.03125, %v501_v55  ;;  %v511_v57 = vmul.f32 %v508_v54, %v508_v54 }
 0x3f3   : > { %v509_v58 = vsub.f32 %v5114_v46, %v506_v56  ;;  %v514_v59 = vsel %vm407_vm3, %v511_v57, 0.0 }
 0x3f4   : > { %v504_v60 = vpop.xlane.xlu0 %503  ;;  %515 = vadd.xlane.f32.xlu1 %v514_v59 }
 0x3f5   : > { %v507_v61 = vmul.f32 0.03125, %v504_v60  ;;  %v512_v62 = vmul.f32 %v509_v58, %v509_v58 }
 0x3f7   : > { %v510_v63 = vsub.f32 %v5121_v50, %v507_v61  ;;  %v517_v0 = vsel %vm407_vm3, %v512_v62, 0.0 }
 0x3f8   : > { %518 = vadd.xlane.f32.xlu0 %v517_v0 }
 0x3f9   : > { %v513_v1 = vmul.f32 %v510_v63, %v510_v63 }
 0x3fb   : > { %v520_v2 = vsel %vm414_vm4, %v513_v1, 0.0 }
 0x3fc   : > { %521 = vadd.xlane.f32.xlu1 %v520_v2 }
 0x47d   : > { %v516_v7 = vpop.xlane.xlu1 %515 }
 0x47e   : > { %v523_v8 = vmul.f32 0.03125, %v516_v7 }
 0x480   : > { %v526_v9 = vadd.f32 1e-05, %v523_v8 }
 0x481   : > { %v519_v10 = vpop.xlane.xlu0 %518 }
 0x482   : > { %4670 = vrsqrt.f32 %v526_v9  ;;  %v524_v11 = vmul.f32 0.03125, %v519_v10 }
 0x484   : > { %v527_v12 = vadd.f32 1e-05, %v524_v11 }
 0x485   : > { %v522_v13 = vpop.xlane.xlu1 %521 }
 0x486   : > { %4672 = vrsqrt.f32 %v527_v12  ;;  %v525_v14 = vmul.f32 0.03125, %v522_v13 }
 0x488   : > { %v528_v15 = vadd.f32 1e-05, %v525_v14 }
 0x48a   : > { %4674 = vrsqrt.f32 %v528_v15 }
 0x48f   : > { %v4671_v16 = vpop.eup %4670 }
 0x490   : > { %v532_v18 = vmul.f32 %v4671_v16, %v508_v54 }
 0x492   : > { %v539_v20 = vmul.f32 %v3861_v17, %v532_v18 }
 0x493   : > { %v4673_v21 = vpop.eup %4672 }
 0x494   : > { %v546_v23 = vadd.f32 %v3862_v19, %v539_v20  ;;  %v533_v24 = vmul.f32 %v4673_v21, %v509_v58 }
 0x496   : > { %4187 = vmatmul.mubr.msk.f32.vlgmr.msra.gmra.mxu1 %vm407_vm3, %v546_v23  ;;  %v540_v25 = vmul.f32 %v3861_v17, %v533_v24 }
 0x497   : > { %v4675_v26 = vpop.eup %4674  ;;  %4189 = vmatprep.mubr.msk.f32.mxu1 %vm4912_vm2, %v4911_v22 }
 0x498   : > { %v547_v27 = vadd.f32 %v3862_v19, %v540_v25  ;;  %v534_v28 = vmul.f32 %v4675_v26, %v510_v63 }
 0x49a   : > { %4190 = vmatmul.mubr.msk.f32.gmra.mxu1 %vm407_vm3, %v547_v27  ;;  %v541_v29 = vmul.f32 %v3861_v17, %v534_v28 }
 0x49b   : > { %4192 = vmatprep.mubr.msk.f32.mxu1 %vm4912_vm2, %v4911_v22 }
 0x49c   : > { %v548_v30 = vadd.f32 %v3862_v19, %v541_v29 }
 0x49e   : > { %4193 = vmatmul.mubr.msk.f32.gmra.mxu1 %vm407_vm3, %v548_v30 }
 0x49f   : > { %4201 = vmatprep.mubr.msk.f32.mxu1 %vm4912_vm2, %v4911_v22 }
 0x556   : > { %v5162_v31 = vpop.f32.mrf.mxu1 }
 0x558   : > { %v4188_v32 = vpop.f32.mrf.mxu1 }
 0x55a   : > { %v5164_v33 = vpop.f32.mrf.mxu1 }
 0x55b   : > { %643 = vrot.lane.b32.xlu1 %v5164_v33, %s4913_s26 }
 0x55c   : > { %v4191_v34 = vpop.f32.mrf.mxu1 }
 0x55e   : > { %v5168_v35 = vpop.f32.mrf.mxu1 }
 0x55f   : > { %641 = vrot.lane.b32.xlu1 %v5162_v31, %s4913_s26  ;;  %645 = vrot.lane.b32.xlu0 %v5168_v35, %s4913_s26 }
 0x560   : > { %v4194_v36 = vpop.f32.mrf.mxu1 }
 0x563   : > { %888 = vrot.lane.b32.xlu1 %v5168_v35, %s4914_s30  ;;  %886 = vrot.lane.b32.xlu0 %v5164_v33, %s4914_s30 }
 0x567   : > { %884 = vrot.lane.b32.xlu1 %v5162_v31, %s4914_s30  ;;  %878 = vrot.lane.b32.xlu0 %v5162_v31, %s4915_s6 }
 0x56b   : > { %1127 = vrot.lane.b32.xlu1 %v5168_v35, %s4916_s7  ;;  %880 = vrot.lane.b32.xlu0 %v5164_v33, %s4915_s6 }
 0x56f   : > { %1125 = vrot.lane.b32.xlu1 %v5164_v33, %s4916_s7  ;;  %882 = vrot.lane.b32.xlu0 %v5168_v35, %s4915_s6 }
 0x573   : > { %1123 = vrot.lane.b32.xlu1 %v5162_v31, %s4916_s7  ;;  %1117 = vrot.lane.b32.xlu0 %v5162_v31, %s4917_s8 }
 0x577   : > { %1366 = vrot.lane.b32.xlu1 %v5168_v35, %s4918_s9  ;;  %1119 = vrot.lane.b32.xlu0 %v5164_v33, %s4917_s8 }
 0x57b   : > { %1364 = vrot.lane.b32.xlu1 %v5164_v33, %s4918_s9  ;;  %1121 = vrot.lane.b32.xlu0 %v5168_v35, %s4917_s8 }
 0x57f   : > { %1362 = vrot.lane.b32.xlu1 %v5162_v31, %s4918_s9  ;;  %1356 = vrot.lane.b32.xlu0 %v5162_v31, %s4919_s10 }
 0x583   : > { %1358 = vrot.lane.b32.xlu1 %v5164_v33, %s4919_s10  ;;  %1360 = vrot.lane.b32.xlu0 %v5168_v35, %s4919_s10 }
 0x587   : > { %778 = vrot.lane.b32.xlu1 %v5162_v31, %s4920_s11  ;;  %780 = vrot.lane.b32.xlu0 %v5164_v33, %s4920_s11 }
 0x58b   : > { %782 = vrot.lane.b32.xlu1 %v5168_v35, %s4920_s11 }
 0x58f   : > { %1022 = vrot.lane.b32.xlu1 %v5168_v35, %s4921_s12 }
 0x5cd   : > { %v644_v37 = vpop.permute.xlu1 %643 }
 0x5d1   : > { %v642_v38 = vpop.permute.xlu1 %641  ;;  %v646_v39 = vpop.permute.xlu0 %645 }
 0x5d2   : > { %4196 = vmatpush3.xpose.msk.msra.mxu1 %vm647_vm5, %v646_v39 }
 0x5d3   : > { %4197 = vmatprep.subr.mxu1 %v4911_v22 }
 0x5d5   : > { %v889_v40 = vpop.permute.xlu1 %888  ;;  %v887_v41 = vpop.permute.xlu0 %886 }
 0x5d6   : > { %4198 = vmatpush3.xpose.msk.msra.mxu1 %vm647_vm5, %v644_v37 }
 0x5d7   : > { %4199 = vmatprep.subr.mxu1 %v4911_v22 }
 0x5d9   : > { %v885_v43 = vpop.permute.xlu1 %884  ;;  %v879_v44 = vpop.permute.xlu0 %878 }
 0x5da   : > { %4200 = vmatpush3.xpose.msk.msra.mxu1 %vm647_vm5, %v642_v38 }
 0x5db   : > { %4225 = vmatprep.subr.mxu1 %v4911_v22 }
 0x5dd   : > { %v1128_v45 = vpop.permute.xlu1 %1127  ;;  %4202 = vmatmul.mubr.msk.f32.vlgmr.msra.gmra.mxu1 %vm647_vm5, %v5162_v31  ;;  %v881_v47 = vpop.permute.xlu0 %880 }
 0x5de   : > { %4226 = vmatpush3.xpose.msk.msra.mxu1 %vm647_vm5, %v889_v40  ;;  %4204 = vmatprep.mubr.msk.f32.mxu1 %vm4912_vm2, %v4911_v22 }
 0x5df   : > { %4227 = vmatprep.subr.mxu1 %v4911_v22 }
 0x5e1   : > { %v1126_v48 = vpop.permute.xlu1 %1125  ;;  %4205 = vmatmul.mubr.msk.f32.gmra.mxu1 %vm647_vm5, %v5164_v33  ;;  %v883_v49 = vpop.permute.xlu0 %882 }
 0x5e2   : > { %4228 = vmatpush3.xpose.msk.msra.mxu1 %vm647_vm5, %v887_v41  ;;  %4207 = vmatprep.mubr.msk.f32.mxu1 %vm4912_vm2, %v4911_v22 }
 0x5e3   : > { %4229 = vmatprep.subr.mxu1 %v4911_v22 }
 0x5e5   : > { %v1124_v51 = vpop.permute.xlu1 %1123  ;;  %4208 = vmatmul.mubr.msk.f32.gmra.mxu1 %vm647_vm5, %v5168_v35  ;;  %v1118_v52 = vpop.permute.xlu0 %1117 }
 0x5e6   : > { %4230 = vmatpush3.xpose.msk.msra.mxu1 %vm647_vm5, %v885_v43  ;;  %4231 = vmatprep.mubr.msk.f32.mxu1 %vm4912_vm2, %v4911_v22 }
 0x5e7   : > { %4255 = vmatprep.subr.mxu1 %v4911_v22 }
 0x5e9   : > { %v1367_v53 = vpop.permute.xlu1 %1366  ;;  %4232 = vmatmul.mubr.msk.f32.vlgmr.msra.gmra.mxu1 %vm647_vm5, %v879_v44  ;;  %v1120_v54 = vpop.permute.xlu0 %1119 }
 0x5ea   : > { %4256 = vmatpush3.xpose.msk.msra.mxu1 %vm647_vm5, %v1128_v45  ;;  %4234 = vmatprep.mubr.msk.f32.mxu1 %vm4912_vm2, %v4911_v22 }
 0x5eb   : > { %4257 = vmatprep.subr.mxu1 %v4911_v22 }
 0x5ed   : > { %v1365_v55 = vpop.permute.xlu1 %1364  ;;  %4235 = vmatmul.mubr.msk.f32.gmra.mxu1 %vm647_vm5, %v881_v47  ;;  %v1122_v56 = vpop.permute.xlu0 %1121 }
 0x5ee   : > { %4258 = vmatpush3.xpose.msk.msra.mxu1 %vm647_vm5, %v1126_v48  ;;  %4237 = vmatprep.mubr.msk.f32.mxu1 %vm4912_vm2, %v4911_v22 }
 0x5ef   : > { %4259 = vmatprep.subr.mxu1 %v4911_v22 }
 0x5f1   : > { %v1363_v57 = vpop.permute.xlu1 %1362  ;;  %4238 = vmatmul.mubr.msk.f32.gmra.mxu1 %vm647_vm5, %v883_v49  ;;  %v1357_v58 = vpop.permute.xlu0 %1356 }
 0x5f2   : > { %4260 = vmatpush3.xpose.msk.msra.mxu1 %vm647_vm5, %v1124_v51  ;;  %4261 = vmatprep.mubr.msk.f32.mxu1 %vm4912_vm2, %v4911_v22 }
 0x5f3   : > { %4285 = vmatprep.subr.mxu1 %v4911_v22 }
 0x5f5   : > { %v1359_v59 = vpop.permute.xlu1 %1358  ;;  %4262 = vmatmul.mubr.msk.f32.vlgmr.msra.gmra.mxu1 %vm647_vm5, %v1118_v52  ;;  %v1361_v60 = vpop.permute.xlu0 %1360 }
 0x5f6   : > { %4286 = vmatpush3.xpose.msk.msra.mxu1 %vm647_vm5, %v1367_v53  ;;  %4264 = vmatprep.mubr.msk.f32.mxu1 %vm4912_vm2, %v4911_v22 }
 0x5f7   : > { %4287 = vmatprep.subr.mxu1 %v4911_v22 }
 0x5f9   : > { %v779_v61 = vpop.permute.xlu1 %778  ;;  %4265 = vmatmul.mubr.msk.f32.gmra.mxu1 %vm647_vm5, %v1120_v54  ;;  %v781_v63 = vpop.permute.xlu0 %780 }
 0x5fa   : > { %4288 = vmatpush3.xpose.msk.msra.mxu1 %vm647_vm5, %v1365_v55  ;;  %4267 = vmatprep.mubr.msk.f32.mxu1 %vm4912_vm2, %v4911_v22 }
 0x5fb   : > { %4289 = vmatprep.subr.mxu1 %v4911_v22 }
 0x5fd   : > { %v783_v62 = vpop.permute.xlu1 %782  ;;  %4268 = vmatmul.mubr.msk.f32.gmra.mxu1 %vm647_vm5, %v1122_v56 }
 0x5fe   : > { %4211 = vmatpush3.msk.msra.mxu0 %vm795_vm6, %v783_v62  ;;  %4290 = vmatpush3.xpose.msk.msra.mxu1 %vm647_vm5, %v1363_v57 }
 0x5ff   : > { %4212 = vmatprep.subr.mxu0 %v4911_v22  ;;  %4291 = vmatprep.mubr.msk.f32.mxu1 %vm4912_vm2, %v4911_v22 }
 0x600   : > { %4213 = vmatpush3.msra.mxu0 %v781_v63  ;;  %4581 = vmatprep.subr.mxu1 %v4911_v22 }
 0x601   : > { %4214 = vmatprep.subr.mxu0 %v4911_v22  ;;  %4292 = vmatmul.mubr.msk.f32.vlgmr.msra.gmra.mxu1 %vm647_vm5, %v1357_v58 }
 0x602   : > { %4215 = vmatpush3.msra.mxu0 %v779_v61  ;;  %4294 = vmatprep.mubr.msk.f32.mxu1 %vm4912_vm2, %v4911_v22 }
 0x603   : > { %4240 = vmatprep.subr.mxu0 %v4911_v22 }
 0x605   : > { %4295 = vmatmul.mubr.msk.f32.gmra.mxu1 %vm647_vm5, %v1359_v59  ;;  %v5339_v59 = vpop.permute.xlu1 %1022 }
 0x606   : > { %4297 = vmatprep.mubr.msk.f32.mxu1 %vm4912_vm2, %v4911_v22 }
 0x609   : > { %4298 = vmatmul.mubr.msk.f32.gmra.mxu1 %vm647_vm5, %v1361_v60 }
 0x60a   : > { %4312 = vmatprep.mubr.msk.f32.mxu1 %vm4912_vm2, %v4911_v22 }
 0x69d   : > { %v726_v0 = vpop.f32.mrf.mxu1 }
 0x69e   : > { %v5285_v1 = vmul.f32 0.35355338, %v726_v0 }
 0x69f   : > { %v4203_v2 = vpop.f32.mrf.mxu1 }
 0x6a0   : > { %v744_v7 = vsel %vm743_vm7, %v5285_v1, -inf }
 0x6a1   : > { %745 = vmax.xlane.f32.xlu1 %v744_v7  ;;  %v731_v8 = vpop.f32.mrf.mxu1 }
 0x6a2   : > { %v5289_v9 = vmul.f32 0.35355338, %v731_v8 }
 0x6a3   : > { %v4206_v10 = vpop.f32.mrf.mxu1 }
 0x6a4   : > { %v747_v11 = vsel %vm743_vm7, %v5289_v9, -inf }
 0x6a5   : > { %748 = vmax.xlane.f32.xlu0 %v747_v11  ;;  %v736_v12 = vpop.f32.mrf.mxu1 }
 0x6a6   : > { %v5293_v13 = vmul.f32 0.35355338, %v736_v12 }
 0x6a7   : > { %v4209_v14 = vpop.f32.mrf.mxu1 }
 0x6a8   : > { %v751_v15 = vsel %vm750_vm8, %v5293_v13, -inf }
 0x6a9   : > { %752 = vmax.xlane.f32.xlu0 %v751_v15  ;;  %v968_v16 = vpop.f32.mrf.mxu1 }
 0x6aa   : > { %v5297_v17 = vmul.f32 0.35355338, %v968_v16 }
 0x6ab   : > { %v4233_v18 = vpop.f32.mrf.mxu1 }
 0x6ac   : > { %v985_v19 = vsel %vm743_vm7, %v5297_v17, -inf }
 0x6ad   : > { %986 = vmax.xlane.f32.xlu0 %v985_v19  ;;  %v973_v20 = vpop.f32.mrf.mxu1 }
 0x6ae   : > { %v5301_v21 = vmul.f32 0.35355338, %v973_v20 }
 0x6af   : > { %v4236_v23 = vpop.f32.mrf.mxu1 }
 0x6b0   : > { %v988_v24 = vsel %vm743_vm7, %v5301_v21, -inf }
 0x6b1   : > { %989 = vmax.xlane.f32.xlu1 %v988_v24  ;;  %v978_v25 = vpop.f32.mrf.mxu1 }
 0x6b2   : > { %v5305_v26 = vmul.f32 0.35355338, %v978_v25 }
 0x6b3   : > { %v4239_v27 = vpop.f32.mrf.mxu1 }
 0x6b4   : > { %v991_v28 = vsel %vm750_vm8, %v5305_v26, -inf }
 0x6b5   : > { %992 = vmax.xlane.f32.xlu0 %v991_v28  ;;  %v1207_v29 = vpop.f32.mrf.mxu1 }
 0x6b6   : > { %v5309_v30 = vmul.f32 0.35355338, %v1207_v29 }
 0x6b7   : > { %v4263_v32 = vpop.f32.mrf.mxu1 }
 0x6b8   : > { %v1224_v34 = vsel %vm743_vm7, %v5309_v30, -inf }
 0x6b9   : > { %1225 = vmax.xlane.f32.xlu1 %v1224_v34  ;;  %v1212_v36 = vpop.f32.mrf.mxu1 }
 0x6ba   : > { %v5313_v37 = vmul.f32 0.35355338, %v1212_v36 }
 0x6bb   : > { %v4266_v38 = vpop.f32.mrf.mxu1 }
 0x6bc   : > { %v1227_v39 = vsel %vm743_vm7, %v5313_v37, -inf }
 0x6bd   : > { %1228 = vmax.xlane.f32.xlu0 %v1227_v39  ;;  %v1217_v40 = vpop.f32.mrf.mxu1 }
 0x6be   : > { %v5317_v41 = vmul.f32 0.35355338, %v1217_v40 }
 0x6bf   : > { %v4269_v43 = vpop.f32.mrf.mxu1 }
 0x6c0   : > { %v1230_v44 = vsel %vm750_vm8, %v5317_v41, -inf }
 0x6c1   : > { %1231 = vmax.xlane.f32.xlu1 %v1230_v44  ;;  %v1446_v45 = vpop.f32.mrf.mxu1 }
 0x6c2   : > { %v5321_v47 = vmul.f32 0.35355338, %v1446_v45 }
 0x6c3   : > { %v4293_v48 = vpop.f32.mrf.mxu1 }
 0x6c4   : > { %v1463_v49 = vsel %vm743_vm7, %v5321_v47, -inf }
 0x6c5   : > { %1464 = vmax.xlane.f32.xlu0 %v1463_v49  ;;  %v1451_v51 = vpop.f32.mrf.mxu1 }
 0x6c6   : > { %v5331_v55 = vmul.f32 0.35355338, %v1451_v51 }
 0x6c7   : > { %v4296_v52 = vpop.f32.mrf.mxu1 }
 0x6c8   : > { %v1466_v57 = vsel %vm743_vm7, %v5331_v55, -inf }
 0x6c9   : > { %v1456_v53 = vpop.f32.mrf.mxu1 }
 0x6ca   : > { %v5333_v56 = vmul.f32 0.35355338, %v1456_v53 }
 0x6cb   : > { %v4299_v54 = vpop.f32.mrf.mxu1 }
 0x6cc   : > { %v1469_v58 = vsel %vm750_vm8, %v5333_v56, -inf }
 0x6d2   : > { %1018 = vrot.lane.b32.xlu1 %v5162_v31, %s4921_s12 }
 0x6d6   : > { %1261 = vrot.lane.b32.xlu1 %v5168_v35, %s4922_s13 }
 0x6db   : > { %1020 = vrot.lane.b32.xlu0 %v5164_v33, %s4921_s12 }
 0x6fa   : > { %1467 = vmax.xlane.f32.xlu1 %v1466_v57  ;;  %1470 = vmax.xlane.f32.xlu0 %v1469_v58 }
 0x72a   : > { %v746_v60 = vpop.xlane.xlu1 %745 }
 0x72b   : > { %v754_v61 = vsub.f32 %v5285_v1, %v746_v60 }
 0x72d   : > { %v757_v62 = vmul.f32 1.442695, %v754_v61 }
 0x72e   : > { %v749_v63 = vpop.xlane.xlu0 %748 }
 0x72f   : > { %4676 = vpow2.f32 %v757_v62  ;;  %v755_v0 = vsub.f32 %v5289_v9, %v749_v63 }
 0x731   : > { %v759_v2 = vmul.f32 1.442695, %v755_v0 }
 0x732   : > { %v753_v1 = vpop.xlane.xlu0 %752 }
 0x733   : > { %4678 = vpow2.f32 %v759_v2  ;;  %v756_v9 = vsub.f32 %v5293_v13, %v753_v1 }
 0x735   : > { %v761_v16 = vmul.f32 1.442695, %v756_v9 }
 0x736   : > { %v987_v12 = vpop.xlane.xlu0 %986 }
 0x737   : > { %v994_v15 = vsub.f32 %v5297_v17, %v987_v12  ;;  %4680 = vpow2.f32 %v761_v16 }
 0x739   : > { %v997_v20 = vmul.f32 1.442695, %v994_v15 }
 0x73a   : > { %v990_v14 = vpop.xlane.xlu1 %989 }
 0x73b   : > { %v995_v18 = vsub.f32 %v5301_v21, %v990_v14  ;;  %4682 = vpow2.f32 %v997_v20 }
 0x73c   : > { %v5343_v7 = vpop.eup %4676 }
 0x73d   : > { %v763_v8 = vsel %vm743_vm7, %v5343_v7, 0.0  ;;  %v999_v23 = vmul.f32 1.442695, %v995_v18 }
 0x73e   : > { %764 = vadd.xlane.f32.xlu1 %v763_v8  ;;  %v993_v19 = vpop.xlane.xlu0 %992 }
 0x73f   : > { %v996_v24 = vsub.f32 %v5305_v26, %v993_v19  ;;  %4684 = vpow2.f32 %v999_v23 }
 0x740   : > { %v5347_v10 = vpop.eup %4678 }
 0x741   : > { %v766_v11 = vsel %vm743_vm7, %v5347_v10, 0.0  ;;  %v1001_v27 = vmul.f32 1.442695, %v996_v24 }
 0x742   : > { %767 = vadd.xlane.f32.xlu0 %v766_v11  ;;  %v1226_v25 = vpop.xlane.xlu1 %1225 }
 0x743   : > { %v1233_v28 = vsub.f32 %v5309_v30, %v1226_v25  ;;  %4686 = vpow2.f32 %v1001_v27 }
 0x744   : > { %v5362_v38 = vpop.eup %4680 }
 0x745   : > { %v1236_v32 = vmul.f32 1.442695, %v1233_v28  ;;  %v769_v30 = vsel %vm750_vm8, %v5362_v38, 0.0 }
 0x746   : > { %v1229_v13 = vpop.xlane.xlu0 %1228 }
 0x747   : > { %4688 = vpow2.f32 %v1236_v32  ;;  %v1234_v63 = vsub.f32 %v5313_v37, %v1229_v13 }
 0x748   : > { %v5364_v26 = vpop.eup %4682 }
 0x749   : > { %v1003_v43 = vsel %vm743_vm7, %v5364_v26, 0.0  ;;  %v1238_v8 = vmul.f32 1.442695, %v1234_v63 }
 0x74a   : > { %v1232_v29 = vpop.xlane.xlu1 %1231 }
 0x74b   : > { %v1235_v17 = vsub.f32 %v5317_v41, %v1232_v29 }
 0x74c   : > { %v5368_v40 = vpop.eup %4684 }
 0x74d   : > { %v1240_v21 = vmul.f32 1.442695, %v1235_v17  ;;  %v1006_v41 = vsel %vm743_vm7, %v5368_v40, 0.0 }
 0x74e   : > { %v1465_v34 = vpop.xlane.xlu0 %1464  ;;  %v1019_v61 = vpop.permute.xlu1 %1018 }
 0x74f   : > { %1257 = vrot.lane.b32.xlu1 %v5162_v31, %s4922_s13  ;;  %v1472_v36 = vsub.f32 %v5321_v47, %v1465_v34  ;;  %4690 = vpow2.f32 %v1240_v21 }
 0x750   : > { %v5374_v44 = vpop.eup %4686 }
 0x751   : > { %v1475_v39 = vmul.f32 1.442695, %v1472_v36  ;;  %v1009_v45 = vsel %vm750_vm8, %v5374_v44, 0.0 }
 0x752   : > { %v1021_v51 = vpop.permute.xlu0 %1020  ;;  %v1262_v62 = vpop.permute.xlu1 %1261 }
 0x753   : > { %4692 = vpow2.f32 %v1475_v39 }
 0x754   : > { %v5378_v47 = vpop.eup %4688 }
 0x755   : > { %v1242_v48 = vsel %vm743_vm7, %v5378_v47, 0.0 }
 0x758   : > { %1259 = vrot.lane.b32.xlu0 %v5164_v33, %s4922_s13 }
 0x75c   : > { %v5382_v49 = vpop.eup %4690 }
 0x75d   : > { %v1248_v52 = vsel %vm750_vm8, %v5382_v49, 0.0 }
 0x760   : > { %v5386_v53 = vpop.eup %4692 }
 0x761   : > { %v1481_v60 = vsel %vm743_vm7, %v5386_v53, 0.0 }
 0x773   : > { %770 = vadd.xlane.f32.xlu1 %v769_v30 }
 0x777   : > { %1007 = vadd.xlane.f32.xlu1 %v1006_v41  ;;  %1004 = vadd.xlane.f32.xlu0 %v1003_v43 }
 0x77b   : > { %1010 = vadd.xlane.f32.xlu0 %v1009_v45 }
 0x77f   : > { %1243 = vadd.xlane.f32.xlu0 %v1242_v48 }
 0x783   : > { %1249 = vadd.xlane.f32.xlu0 %v1248_v52  ;;  %v1471_v54 = vpop.xlane.xlu0 %1470  ;;  %v1468_v0 = vpop.xlane.xlu1 %1467 }
 0x784   : > { %v1474_v57 = vsub.f32 %v5333_v56, %v1471_v54  ;;  %v1473_v56 = vsub.f32 %v5331_v55, %v1468_v0 }
 0x786   : > { %v1479_v58 = vmul.f32 1.442695, %v1474_v57  ;;  %v1477_v1 = vmul.f32 1.442695, %v1473_v56 }
 0x787   : > { %1482 = vadd.xlane.f32.xlu0 %v1481_v60 }
 0x788   : > { %1500 = vrot.lane.b32.xlu1 %v5168_v35, %s4923_s14  ;;  %4694 = vpow2.f32 %v1479_v58 }
 0x789   : > { %4696 = vpow2.f32 %v1238_v8 }
 0x78a   : > { %4698 = vpow2.f32 %v1477_v1 }
 0x795   : > { %v5394_v2 = vpop.eup %4694 }
 0x796   : > { %v1487_v11 = vsel %vm750_vm8, %v5394_v2, 0.0  ;;  %v5399_v9 = vpop.eup %4696 }
 0x797   : > { %1488 = vadd.xlane.f32.xlu0 %v1487_v11  ;;  %v1245_v35 = vsel %vm743_vm7, %v5399_v9, 0.0  ;;  %v5403_v12 = vpop.eup %4698 }
 0x798   : > { %v1484_v37 = vsel %vm743_vm7, %v5403_v12, 0.0 }
 0x7ac   : > { %1246 = vadd.xlane.f32.xlu1 %v1245_v35 }
 0x7ad   : > { %1496 = vrot.lane.b32.xlu0 %v5162_v31, %s4923_s14 }
 0x7b0   : > { %1485 = vadd.xlane.f32.xlu1 %v1484_v37 }
 0x7b1   : > { %1654 = vrot.lane.b32.xlu0 %v5133_v4, %s4924_s15 }
 0x7b5   : > { %1652 = vrot.lane.b32.xlu0 %v5137_v5, %s4924_s15 }
 0x7c1   : > { %1498 = vrot.lane.b32.xlu1 %v5164_v33, %s4923_s14 }
 0x7c5   : > { %1656 = vrot.lane.b32.xlu1 %v5131_v3, %s4924_s15 }
 0x7c7   : > { %v765_v55 = vpop.xlane.xlu1 %764 }
 0x7c8   : > { %4700 = vrcp.f32 %v765_v55 }
 0x7c9   : > { %1650 = vrot.lane.b32.xlu1 %v5141_v6, %s4924_s15 }
 0x7cb   : > { %v768_v14 = vpop.xlane.xlu0 %767  ;;  %v1258_v33 = vpop.permute.xlu1 %1257 }
 0x7cc   : > { %4702 = vrcp.f32 %v768_v14 }
 0x7d5   : > { %v4701_v15 = vpop.eup %4700 }
 0x7d6   : > { %v775_v16 = vmul.f32 %v4701_v15, %v5343_v7 }
 0x7d8   : > { %4217 = vmatmul.mubr.msk.f32.vlgmr.msra.gmra.mxu0 %vm743_vm7, %v775_v16 }
 0x7d9   : > { %v4703_v18 = vpop.eup %4702  ;;  %4241 = vmatpush3.msk.msra.mxu0 %vm795_vm6, %v5339_v59  ;;  %4219 = vmatprep.mubr.msk.f32.mxu0 %vm4912_vm2, %v4911_v22  ;;  %v1260_v59 = vpop.permute.xlu0 %1259 }
 0x7da   : > { %4242 = vmatprep.subr.mxu0 %v4911_v22  ;;  %v776_v31 = vmul.f32 %v4703_v18, %v5347_v10 }
 0x7db   : > { %4243 = vmatpush3.msra.mxu0 %v1021_v51 }
 0x7dc   : > { %4244 = vmatprep.subr.mxu0 %v4911_v22  ;;  %4220 = vmatmul.mubr.msk.f32.gmra.mxu0 %vm743_vm7, %v776_v31 }
 0x7dd   : > { %4245 = vmatpush3.msra.mxu0 %v1019_v61  ;;  %4222 = vmatprep.mubr.msk.f32.mxu0 %vm4912_vm2, %v4911_v22 }
 0x7de   : > { %4270 = vmatprep.subr.mxu0 %v4911_v22 }
 0x7fc   : > { %v771_v7 = vpop.xlane.xlu1 %770 }
 0x7fd   : > { %4704 = vrcp.f32 %v771_v7 }
 0x800   : > { %v1008_v19 = vpop.xlane.xlu1 %1007  ;;  %v1005_v20 = vpop.xlane.xlu0 %1004 }
 0x801   : > { %4706 = vrcp.f32 %v1005_v20 }
 0x802   : > { %4708 = vrcp.f32 %v1008_v19 }
 0x804   : > { %v1501_v10 = vpop.permute.xlu1 %1500  ;;  %v1011_v23 = vpop.xlane.xlu0 %1010 }
 0x805   : > { %4584 = vmatpush3.msk.msra.mxu1 %vm795_vm6, %v1501_v10  ;;  %4710 = vrcp.f32 %v1011_v23 }
 0x806   : > { %4582 = vmatprep.subr.mxu1 %v4911_v22 }
 0x808   : > { %v1244_v24 = vpop.xlane.xlu0 %1243 }
 0x809   : > { %4712 = vrcp.f32 %v1244_v24 }
 0x80a   : > { %v4705_v25 = vpop.eup %4704 }
 0x80b   : > { %v777_v27 = vmul.f32 %v4705_v25, %v5362_v38 }
 0x80c   : > { %v1250_v38 = vpop.xlane.xlu0 %1249 }
 0x80d   : > { %4223 = vmatmul.mubr.msk.f32.gmra.mxu0 %vm743_vm7, %v777_v27 }
 0x80e   : > { %4246 = vmatprep.mubr.msk.f32.mxu0 %vm4912_vm2, %v4911_v22  ;;  %v4707_v28 = vpop.eup %4706 }
 0x80f   : > { %v1015_v13 = vmul.f32 %v4707_v28, %v5364_v26  ;;  %v4709_v29 = vpop.eup %4708 }
 0x810   : > { %v1016_v32 = vmul.f32 %v4709_v29, %v5368_v40  ;;  %v1483_v26 = vpop.xlane.xlu0 %1482 }
 0x811   : > { %4247 = vmatmul.mubr.msk.f32.vlgmr.msra.gmra.mxu0 %vm743_vm7, %v1015_v13 }
 0x812   : > { %4271 = vmatpush3.msk.msra.mxu0 %vm795_vm6, %v1262_v62  ;;  %4249 = vmatprep.mubr.msk.f32.mxu0 %vm4912_vm2, %v4911_v22  ;;  %v4711_v17 = vpop.eup %4710 }
 0x813   : > { %4272 = vmatprep.subr.mxu0 %v4911_v22  ;;  %v1017_v34 = vmul.f32 %v4711_v17, %v5374_v44 }
 0x814   : > { %4273 = vmatpush3.msra.mxu0 %v1260_v59 }
 0x815   : > { %4274 = vmatprep.subr.mxu0 %v4911_v22  ;;  %4250 = vmatmul.mubr.msk.f32.gmra.mxu0 %vm743_vm7, %v1016_v32 }
 0x816   : > { %4275 = vmatpush3.msra.mxu0 %v1258_v33  ;;  %4252 = vmatprep.mubr.msk.f32.mxu0 %vm4912_vm2, %v4911_v22  ;;  %v4713_v21 = vpop.eup %4712 }
 0x817   : > { %4300 = vmatprep.subr.mxu0 %v4911_v22  ;;  %v1254_v36 = vmul.f32 %v4713_v21, %v5378_v47 }
 0x819   : > { %4253 = vmatmul.mubr.msk.f32.gmra.mxu0 %vm743_vm7, %v1017_v34 }
 0x81a   : > { %4276 = vmatprep.mubr.msk.f32.mxu0 %vm4912_vm2, %v4911_v22 }
 0x81d   : > { %4277 = vmatmul.mubr.msk.f32.vlgmr.msra.gmra.mxu0 %vm743_vm7, %v1254_v36 }
 0x81e   : > { %4301 = vmatpush3.msk.msra.mxu0 %vm795_vm6, %v1501_v10  ;;  %4279 = vmatprep.mubr.msk.f32.mxu0 %vm4912_vm2, %v4911_v22 }
 0x81f   : > { %4302 = vmatprep.subr.mxu0 %v4911_v22 }
 0x820   : > { %v1489_v39 = vpop.xlane.xlu0 %1488 }
 0x821   : > { %4714 = vrcp.f32 %v1489_v39 }
 0x824   : > { %v1497_v43 = vpop.permute.xlu0 %1496 }
 0x828   : > { %v1655_v57 = vpop.permute.xlu0 %1654 }
 0x82c   : > { %v1653_v61 = vpop.permute.xlu0 %1652 }
 0x82e   : > { %v4715_v41 = vpop.eup %4714 }
 0x82f   : > { %v1495_v4 = vmul.f32 %v4715_v41, %v5394_v2 }
 0x835   : > { %v1247_v30 = vpop.xlane.xlu1 %1246 }
 0x836   : > { %4716 = vrcp.f32 %v1247_v30  ;;  %v3906_v30 = vld [vmem:[%s6138_s1 + $0xb] ss:$0 sm:$0xff] }
 0x837   : > { %4718 = vrcp.f32 %v1250_v38 }
 0x838   : > { %4720 = vrcp.f32 %v1483_v26 }
 0x839   : > { %v1486_v40 = vpop.xlane.xlu1 %1485 }
 0x83a   : > { %4722 = vrcp.f32 %v1486_v40 }
 0x83d   : > { %v1499_v3 = vpop.permute.xlu1 %1498 }
 0x83e   : > { %4303 = vmatpush3.msra.mxu0 %v1499_v3  ;;  %4585 = vmatpush3.msra.mxu1 %v1499_v3 }
 0x83f   : > { %4304 = vmatprep.subr.mxu0 %v4911_v22  ;;  %4583 = vmatprep.subr.mxu1 %v4911_v22 }
 0x840   : > { %4305 = vmatpush3.msra.mxu0 %v1497_v43  ;;  %4586 = vmatpush3.msra.mxu1 %v1497_v43 }
 0x841   : > { %4313 = vmatmul.mubr.msk.f32.vlgmr.msra.gmra.mxu1 %vm743_vm7, %v1495_v4  ;;  %4315 = vmatprep.subr.mxu1 %v4911_v22 }
 0x842   : > { %4323 = vmatprep.mubr.msk.f32.mxu1 %vm4912_vm2, %v4911_v22  ;;  %4332 = vmatprep.subr.mxu0 %v4911_v22 }
 0x843   : > { %v4717_v5 = vpop.eup %4716 }
 0x844   : > { %v1255_v6 = vmul.f32 %v4717_v5, %v5399_v9  ;;  %v4719_v44 = vpop.eup %4718 }
 0x845   : > { %v1256_v45 = vmul.f32 %v4719_v44, %v5382_v49  ;;  %v4721_v47 = vpop.eup %4720  ;;  %v1657_v49 = vpop.permute.xlu1 %1656 }
 0x846   : > { %4280 = vmatmul.mubr.msk.f32.gmra.mxu0 %vm743_vm7, %v1255_v6  ;;  %v1493_v48 = vmul.f32 %v4721_v47, %v5386_v53  ;;  %4316 = vmatpush3.msra.mxu1 %v1657_v49 }
 0x847   : > { %4282 = vmatprep.mubr.msk.f32.mxu0 %vm4912_vm2, %v4911_v22  ;;  %v4723_v51 = vpop.eup %4722  ;;  %4317 = vmatprep.subr.mxu1 %v4911_v22 }
 0x848   : > { %v1494_v52 = vmul.f32 %v4723_v51, %v5403_v12  ;;  %4318 = vmatpush3.msra.mxu1 %v1655_v57 }
 0x849   : > { %4319 = vmatprep.subr.mxu1 %v4911_v22  ;;  %v1651_v62 = vpop.permute.xlu1 %1650 }
 0x84a   : > { %4283 = vmatmul.mubr.msk.f32.gmra.mxu0 %vm743_vm7, %v1256_v45  ;;  %4320 = vmatpush3.msra.mxu1 %v1653_v61 }
 0x84b   : > { %4306 = vmatprep.mubr.msk.f32.mxu0 %vm4912_vm2, %v4911_v22  ;;  %4321 = vmatprep.subr.mxu1 %v4911_v22 }
 0x84c   : > { %4322 = vmatpush3.msra.mxu1 %v1651_v62 }
 0x84d   : > { %4349 = vmatprep.subr.mxu1 %v4911_v22 }
 0x84e   : > { %4307 = vmatmul.mubr.msk.f32.vlgmr.msra.gmra.mxu0 %vm743_vm7, %v1493_v48 }
 0x84f   : > { %4309 = vmatprep.mubr.msk.f32.mxu0 %vm4912_vm2, %v4911_v22 }
 0x852   : > { %4310 = vmatmul.mubr.msk.f32.gmra.mxu0 %vm743_vm7, %v1494_v52 }
 0x853   : > { %4340 = vmatprep.mubr.msk.f32.mxu0 %vm4912_vm2, %v4911_v22 }
 0x898   : > { %v864_v54 = vpop.f32.mrf.mxu0 }
 0x89a   : > { %v4218_v53 = vpop.f32.mrf.mxu0 }
 0x89c   : > { %v869_v58 = vpop.f32.mrf.mxu0 }
 0x89e   : > { %v4221_v60 = vpop.f32.mrf.mxu0 }
 0x8cd   : > { %v874_v63 = vpop.f32.mrf.mxu0 }
 0x8cf   : > { %v4224_v0 = vpop.f32.mrf.mxu0 }
 0x8d1   : > { %v1103_v2 = vpop.f32.mrf.mxu0 }
 0x8d2   : > { %1598 = vrot.lane.b32.xlu1 %v1103_v2, %s6147_s16 }
 0x8d3   : > { %v4248_v8 = vpop.f32.mrf.mxu0 }
 0x8d5   : > { %v1108_v56 = vpop.f32.mrf.mxu0 }
 0x8d6   : > { %1600 = vrot.lane.b32.xlu0 %v1108_v56, %s6147_s16 }
 0x8d7   : > { %v4251_v11 = vpop.f32.mrf.mxu0 }
 0x8d9   : > { %v1113_v1 = vpop.f32.mrf.mxu0 }
 0x8db   : > { %v4254_v9 = vpop.f32.mrf.mxu0 }
 0x8dc   : > { %v486_v9 = vld [vmem:[#allocation3 + $0x28] sm:$0xff] }
 0x8dd   : > { %v1342_v35 = vpop.f32.mrf.mxu0 }
 0x8de   : > { %1610 = vrot.lane.b32.xlu1 %v1342_v35, %s6145_s17  ;;  %v485_v35 = vld [vmem:[#allocation3 + $0x18] sm:$0xff] }
 0x8df   : > { %v4278_v12 = vpop.f32.mrf.mxu0 }
 0x8e0   : > { %v484_v12 = vld [vmem:[#allocation3 + $0x8] sm:$0xff] }
 0x901   : > { %v1591_v37 = vpop.f32.mrf.mxu1 }
 0x903   : > { %v4314_v55 = vpop.f32.mrf.mxu1 }
 0x906   : > { %v1347_v14 = vpop.f32.mrf.mxu0 }
 0x907   : > { %1612 = vrot.lane.b32.xlu1 %v1347_v14, %s6145_s17 }
 0x908   : > { %v4281_v15 = vpop.f32.mrf.mxu0 }
 0x90a   : > { %v1352_v16 = vpop.f32.mrf.mxu0 }
 0x90b   : > { %1602 = vrot.lane.b32.xlu1 %v1113_v1, %s6147_s16  ;;  %v487_v1 = vld [vmem:[#allocation3 + $0x38] sm:$0xff]  ;;  %s3980_s16 = sshll.u32 %s4981_s22, 4 }
 0x90c   : > { %v4284_v18 = vpop.f32.mrf.mxu0  ;;  %4333 = vmatpush3.msra.mxu0 %v487_v1 }
 0x90d   : > { %4334 = vmatprep.subr.mxu0 %v4911_v22 }
 0x90e   : > { %v1581_v31 = vpop.f32.mrf.mxu0  ;;  %4335 = vmatpush3.msra.mxu0 %v486_v9 }
 0x90f   : > { %1622 = vrot.lane.b32.xlu0 %v1581_v31, %s6143_s23  ;;  %1626 = vrot.lane.b32.xlu1 %v1591_v37, %s6143_s23 }
 0x910   : > { %v4308_v33 = vpop.f32.mrf.mxu0  ;;  %4336 = vmatprep.subr.mxu0 %v4911_v22 }
 0x911   : > { %4337 = vmatpush3.msra.mxu0 %v485_v35 }
 0x912   : > { %v1586_v59 = vpop.f32.mrf.mxu0  ;;  %4338 = vmatprep.subr.mxu0 %v4911_v22 }
 0x913   : > { %1624 = vrot.lane.b32.xlu0 %v1586_v59, %s6143_s23  ;;  %4339 = vmatpush3.msra.mxu0 %v484_v12 }
 0x914   : > { %v4311_v7 = vpop.f32.mrf.mxu0  ;;  %4374 = vmatprep.subr.mxu0 %v4911_v22 }
 0x917   : > { %1614 = vrot.lane.b32.xlu0 %v1352_v16, %s6145_s17 }
 0x944   : > { %v1599_v19 = vpop.permute.xlu1 %1598 }
 0x945   : > { %v1631_v24 = vsel %vm647_vm5, %v864_v54, %v1599_v19  ;;  %v3910_v19 = vld [vmem:[%s6138_s1 + $0xc] ss:$0 sm:$0xff] }
 0x948   : > { %v1601_v10 = vpop.permute.xlu0 %1600 }
 0x949   : > { %v1632_v13 = vsel %vm647_vm5, %v869_v58, %v1601_v10  ;;  %v3911_v10 = vld [vmem:[%s6138_s1 + $0xd] ss:$0 sm:$0xff] }
 0x950   : > { %v1611_v20 = vpop.permute.xlu1 %1610 }
 0x951   : > { %v1635_v25 = vsel %vm1634_vm9, %v1631_v24, %v1611_v20 }
 0x979   : > { %v1613_v23 = vpop.permute.xlu1 %1612 }
 0x97a   : > { %v1636_v32 = vsel %vm1634_vm9, %v1632_v13, %v1613_v23 }
 0x97d   : > { %v1603_v29 = vpop.permute.xlu1 %1602 }
 0x97e   : > { %v1633_v21 = vsel %vm647_vm5, %v874_v63, %v1603_v29 }
 0x981   : > { %v1623_v27 = vpop.permute.xlu0 %1622  ;;  %v1627_v38 = vpop.permute.xlu1 %1626 }
 0x982   : > { %v1639_v28 = vsel %vm1638_vm10, %v1635_v25, %v1623_v27 }
 0x983   : > { %4324 = vmatmul.mubr.msk.f32.vlgmr.msra.gmra.mxu1 %vm407_vm3, %v1639_v28 }
 0x984   : > { %4326 = vmatprep.mubr.msk.f32.mxu1 %vm4912_vm2, %v4911_v22 }
 0x985   : > { %v1625_v17 = vpop.permute.xlu0 %1624 }
 0x986   : > { %v1640_v34 = vsel %vm1638_vm10, %v1636_v32, %v1625_v17 }
 0x987   : > { %4327 = vmatmul.mubr.msk.f32.gmra.mxu1 %vm407_vm3, %v1640_v34 }
 0x988   : > { %4329 = vmatprep.mubr.msk.f32.mxu1 %vm4912_vm2, %v4911_v22 }
 0x989   : > { %v1615_v36 = vpop.permute.xlu0 %1614 }
 0x98a   : > { %v1637_v26 = vsel %vm1634_vm9, %v1633_v21, %v1615_v36  ;;  %v495_v21 = vld [vmem:[#allocation3 + $0xb0] sm:$0xff]  ;;  %v494_v36 = vld [vmem:[#allocation3 + $0xa0] sm:$0xff] }
 0x98b   : > { %v1641_v39 = vsel %vm1638_vm10, %v1637_v26, %v1627_v38  ;;  %4350 = vmatpush3.msra.mxu1 %v495_v21  ;;  %v493_v38 = vld [vmem:[#allocation3 + $0x90] sm:$0xff]  ;;  %v492_v26 = vld [vmem:[#allocation3 + $0x80] sm:$0xff] }
 0x98c   : > { %4330 = vmatmul.mubr.msk.f32.gmra.mxu1 %vm407_vm3, %v1641_v39  ;;  %4351 = vmatprep.subr.mxu1 %v4911_v22  ;;  %v491_v39 = vld [vmem:[#allocation3 + $0x70] sm:$0xff] }
 0x98d   : > { %4365 = vmatprep.mubr.msk.f32.mxu1 %vm4912_vm2, %v4911_v22  ;;  %4352 = vmatpush3.msra.mxu1 %v494_v36 }
 0x98e   : > { %4353 = vmatprep.subr.mxu1 %v4911_v22 }
 0x98f   : > { %4354 = vmatpush3.msra.mxu1 %v493_v38 }
 0x990   : > { %4355 = vmatprep.subr.mxu1 %v4911_v22 }
 0x991   : > { %4356 = vmatpush3.msra.mxu1 %v492_v26 }
 0x992   : > { %4357 = vmatprep.subr.mxu1 %v4911_v22 }
 0x993   : > { %4358 = vmatpush3.msra.mxu1 %v491_v39 }
 0x994   : > { %4359 = vmatprep.subr.mxu1 %v4911_v22 }
 0xa43   : > { %v1737_v40 = vpop.f32.mrf.mxu1 }
 0xa44   : > { %v1738_v41 = vadd.f32 %v3906_v30, %v1737_v40  ;;  %v489_v40 = vld [vmem:[#allocation3 + $0x50] sm:$0xff] }
 0xa45   : > { %v4325_v3 = vpop.f32.mrf.mxu1 }
 0xa46   : > { %v5519_v4 = vadd.f32 %v1738_v41, %v5107_v42  ;;  %v488_v41 = vld [vmem:[#allocation3 + $0x40] sm:$0xff]  ;;  %v3912_v3 = vld [vmem:[%s6138_s1 + $0xe] ss:$0 sm:$0xff] }
 0xa47   : > { %v1742_v43 = vpop.f32.mrf.mxu1 }
 0xa48   : > { %v1743_v5 = vadd.f32 %v3906_v30, %v1742_v43  ;;  %v1754_v6 = vsel %vm407_vm3, %v5519_v4, 0.0 }
 0xa49   : > { %1755 = vadd.xlane.f32.xlu0 %v1754_v6  ;;  %v4328_v44 = vpop.f32.mrf.mxu1 }
 0xa4a   : > { %v5524_v45 = vadd.f32 %v1743_v5, %v5114_v46 }
 0xa4c   : > { %v1747_v47 = vpop.f32.mrf.mxu1  ;;  %v1757_v48 = vsel %vm407_vm3, %v5524_v45, 0.0 }
 0xa4d   : > { %v1748_v51 = vadd.f32 %v3906_v30, %v1747_v47  ;;  %1758 = vadd.xlane.f32.xlu1 %v1757_v48  ;;  %v490_v30 = vld [vmem:[#allocation3 + $0x60] sm:$0xff] }
 0xa4e   : > { %v4331_v52 = vpop.f32.mrf.mxu1  ;;  %4360 = vmatpush3.msra.mxu1 %v490_v30 }
 0xa4f   : > { %v5529_v42 = vadd.f32 %v1748_v51, %v5121_v50  ;;  %4361 = vmatprep.subr.mxu1 %v4911_v22 }
 0xa50   : > { %4362 = vmatpush3.msra.mxu1 %v489_v40 }
 0xa51   : > { %v1760_v49 = vsel %vm414_vm4, %v5529_v42, 0.0  ;;  %4363 = vmatprep.subr.mxu1 %v4911_v22 }
 0xa52   : > { %1761 = vadd.xlane.f32.xlu0 %v1760_v49  ;;  %4364 = vmatpush3.msra.mxu1 %v488_v41 }
 0xa53   : > { %4406 = vmatprep.subr.mxu1 %v4911_v22 }
 0xad2   : > { %v1756_v54 = vpop.xlane.xlu0 %1755 }
 0xad3   : > { %v1763_v57 = vmul.f32 0.03125, %v1756_v54 }
 0xad5   : > { %v1766_v53 = vsub.f32 %v5519_v4, %v1763_v57 }
 0xad6   : > { %v1759_v46 = vpop.xlane.xlu1 %1758 }
 0xad7   : > { %v1764_v58 = vmul.f32 0.03125, %v1759_v46  ;;  %v1769_v60 = vmul.f32 %v1766_v53, %v1766_v53 }
 0xad9   : > { %v1767_v61 = vsub.f32 %v5524_v45, %v1764_v58  ;;  %v1772_v62 = vsel %vm407_vm3, %v1769_v60, 0.0 }
 0xada   : > { %1773 = vadd.xlane.f32.xlu0 %v1772_v62 }
 0xadb   : > { %v1762_v63 = vpop.xlane.xlu0 %1761  ;;  %v1770_v0 = vmul.f32 %v1767_v61, %v1767_v61 }
 0xadc   : > { %v1765_v50 = vmul.f32 0.03125, %v1762_v63 }
 0xadd   : > { %v1775_v2 = vsel %vm407_vm3, %v1770_v0, 0.0 }
 0xade   : > { %v1768_v8 = vsub.f32 %v5529_v42, %v1765_v50  ;;  %1776 = vadd.xlane.f32.xlu0 %v1775_v2 }
 0xae0   : > { %v1771_v56 = vmul.f32 %v1768_v8, %v1768_v8 }
 0xae2   : > { %v1778_v11 = vsel %vm414_vm4, %v1771_v56, 0.0 }
 0xae3   : > { %1779 = vadd.xlane.f32.xlu1 %v1778_v11 }
 0xb63   : > { %v1774_v37 = vpop.xlane.xlu0 %1773 }
 0xb64   : > { %v1781_v55 = vmul.f32 0.03125, %v1774_v37 }
 0xb66   : > { %v1784_v14 = vadd.f32 1e-05, %v1781_v55 }
 0xb67   : > { %v1777_v15 = vpop.xlane.xlu0 %1776 }
 0xb68   : > { %4724 = vrsqrt.f32 %v1784_v14  ;;  %v1782_v16 = vmul.f32 0.03125, %v1777_v15 }
 0xb6a   : > { %v1785_v18 = vadd.f32 1e-05, %v1782_v16 }
 0xb6c   : > { %4726 = vrsqrt.f32 %v1785_v18  ;;  %v1780_v31 = vpop.xlane.xlu1 %1779 }
 0xb6d   : > { %v1783_v33 = vmul.f32 0.03125, %v1780_v31 }
 0xb6f   : > { %v1786_v59 = vadd.f32 1e-05, %v1783_v33 }
 0xb71   : > { %4728 = vrsqrt.f32 %v1786_v59 }
 0xb75   : > { %v4725_v7 = vpop.eup %4724 }
 0xb76   : > { %v1790_v20 = vmul.f32 %v4725_v7, %v1766_v53 }
 0xb78   : > { %v1797_v23 = vmul.f32 %v3910_v19, %v1790_v20 }
 0xb79   : > { %v4727_v24 = vpop.eup %4726 }
 0xb7a   : > { %v1804_v25 = vadd.f32 %v3911_v10, %v1797_v23  ;;  %v1791_v27 = vmul.f32 %v4727_v24, %v1767_v61 }
 0xb7c   : > { %4341 = vmatmul.mubr.msk.f32.vlgmr.msra.gmra.mxu0 %vm407_vm3, %v1804_v25  ;;  %v1798_v28 = vmul.f32 %v3910_v19, %v1791_v27 }
 0xb7d   : > { %4343 = vmatprep.mubr.msk.f32.mxu0 %vm4912_vm2, %v4911_v22 }
 0xb7e   : > { %v4729_v13 = vpop.eup %4728  ;;  %v1805_v29 = vadd.f32 %v3911_v10, %v1798_v28 }
 0xb7f   : > { %v1792_v32 = vmul.f32 %v4729_v13, %v1768_v8 }
 0xb80   : > { %4344 = vmatmul.mubr.msk.f32.gmra.mxu0 %vm407_vm3, %v1805_v29 }
 0xb81   : > { %4346 = vmatprep.mubr.msk.f32.mxu0 %vm4912_vm2, %v4911_v22  ;;  %v1799_v17 = vmul.f32 %v3910_v19, %v1792_v32 }
 0xb83   : > { %v1806_v34 = vadd.f32 %v3911_v10, %v1799_v17 }
 0xb85   : > { %4347 = vmatmul.mubr.msk.f32.gmra.mxu0 %vm407_vm3, %v1806_v34 }
 0xb86   : > { %4382 = vmatprep.mubr.msk.f32.mxu0 %vm4912_vm2, %v4911_v22 }
 0xc3c   : > { %v1886_v43 = vpop.f32.mrf.mxu0 }
 0xc3d   : > { %v5569_v5 = vadd.f32 %v3912_v3, %v1886_v43 }
 0xc3e   : > { %v4342_v6 = vpop.f32.mrf.mxu0 }
 0xc3f   : > { %v5572_v44 = vmul.f32 0.70710677, %v5569_v5  ;;  %v4928_v6 = vmov -1.0  }
 0xc40   : > { %v1891_v47 = vpop.f32.mrf.mxu0 }
 0xc41   : > { %v1912_v48 = vand.u32 2147483647, %v5572_v44  ;;  %v5575_v51 = vadd.f32 %v3912_v3, %v1891_v47  ;;  %vm1906_vm11 = vcmp.ge.f32.partialorder %v5572_v44, 0.0 }
 0xc42   : > { %v4345_v52 = vpop.f32.mrf.mxu0  ;;  %v1909_v47 = vsel %vm1906_vm11, 1.0, %v4928_v6 }
 0xc43   : > { %v1915_v49 = vmul.f32 0.3275911, %v1912_v48  ;;  %v5578_v54 = vmul.f32 0.70710677, %v5575_v51  ;;  %v1954_v2 = vsub.f32 0.0, %v1912_v48 }
 0xc45   : > { %v1918_v57 = vadd.f32 1.0, %v1915_v49  ;;  %v1913_v53 = vand.u32 2147483647, %v5578_v54  ;;  %v1896_v46 = vpop.f32.mrf.mxu0  ;;  %v1957_v56 = vmul.f32 %v1954_v2, %v1912_v48  ;;  %vm1907_vm12 = vcmp.ge.f32.partialorder %v5578_v54, 0.0 }
 0xc46   : > { %v5581_v58 = vadd.f32 %v3912_v3, %v1896_v46  ;;  %v1910_v44 = vsel %vm1907_vm12, 1.0, %v4928_v6 }
 0xc47   : > { %4730 = vrcp.f32 %v1918_v57  ;;  %v1916_v60 = vmul.f32 0.3275911, %v1913_v53  ;;  %v4348_v61 = vpop.f32.mrf.mxu0  ;;  %v1955_v11 = vsub.f32 0.0, %v1913_v53  ;;  %v1960_v35 = vmul.f32 1.442695, %v1957_v56 }
 0xc48   : > { %v5584_v62 = vmul.f32 0.70710677, %v5581_v58 }
 0xc49   : > { %v1919_v63 = vadd.f32 1.0, %v1916_v60  ;;  %v1958_v12 = vmul.f32 %v1955_v11, %v1913_v53  ;;  %v1900_v53 = vmul.f32 0.5, %v5569_v5 }
 0xc4a   : > { %v1914_v0 = vand.u32 2147483647, %v5584_v62  ;;  %vm1908_vm14 = vcmp.ge.f32.partialorder %v5584_v62, 0.0  ;;  %v3916_v62 = vld [vmem:[%s6138_s1 + $0xf] ss:$0 sm:$0xff] }
 0xc4b   : > { %4732 = vrcp.f32 %v1919_v63  ;;  %v1962_v18 = vmul.f32 1.442695, %v1958_v12  ;;  %v1911_v11 = vsel %vm1908_vm14, 1.0, %v4928_v6 }
 0xc4c   : > { %v1917_v50 = vmul.f32 0.3275911, %v1914_v0  ;;  %v1956_v37 = vsub.f32 0.0, %v1914_v0 }
 0xc4e   : > { %v1920_v8 = vadd.f32 1.0, %v1917_v50  ;;  %v1959_v31 = vmul.f32 %v1956_v37, %v1914_v0 }
 0xc50   : > { %4734 = vrcp.f32 %v1920_v8  ;;  %v1964_v23 = vmul.f32 1.442695, %v1959_v31  ;;  %v1901_v8 = vmul.f32 0.5, %v5575_v51 }
 0xc51   : > { %4736 = vpow2.f32 %v1960_v35 }
 0xc52   : > { %4738 = vpow2.f32 %v1962_v18 }
 0xc53   : > { %4740 = vpow2.f32 %v1964_v23 }
 0xc54   : > { %v4731_v1 = vpop.eup %4730 }
 0xc55   : > { %v1927_v9 = vmul.f32 1.0614054, %v4731_v1 }
 0xc57   : > { %v1930_v55 = vadd.f32 -1.4531521, %v1927_v9  ;;  %v1902_v9 = vmul.f32 0.5, %v5581_v58 }
 0xc58   : > { %v4733_v14 = vpop.eup %4732 }
 0xc59   : > { %v1933_v15 = vmul.f32 %v4731_v1, %v1930_v55  ;;  %v1928_v16 = vmul.f32 1.0614054, %v4733_v14 }
 0xc5b   : > { %v1936_v33 = vadd.f32 1.4214138, %v1933_v15  ;;  %v1931_v59 = vadd.f32 -1.4531521, %v1928_v16 }
 0xc5d   : > { %v4735_v7 = vpop.eup %4734  ;;  %v1939_v19 = vmul.f32 %v4731_v1, %v1936_v33  ;;  %v1934_v20 = vmul.f32 %v4733_v14, %v1931_v59 }
 0xc5e   : > { %v1929_v10 = vmul.f32 1.0614054, %v4735_v7  ;;  %v4737_v38 = vpop.eup %4736 }
 0xc5f   : > { %v1942_v24 = vadd.f32 -0.28449672, %v1939_v19  ;;  %v1937_v25 = vadd.f32 1.4214138, %v1934_v20  ;;  %v4739_v43 = vpop.eup %4738 }
 0xc60   : > { %v1932_v27 = vadd.f32 -1.4531521, %v1929_v10  ;;  %v4741_v63 = vpop.eup %4740 }
 0xc61   : > { %v1945_v28 = vmul.f32 %v4731_v1, %v1942_v24  ;;  %v1940_v13 = vmul.f32 %v4733_v14, %v1937_v25 }
 0xc62   : > { %v1935_v29 = vmul.f32 %v4735_v7, %v1932_v27 }
 0xc63   : > { %v1948_v32 = vadd.f32 0.2548296, %v1945_v28  ;;  %v1943_v17 = vadd.f32 -0.28449672, %v1940_v13 }
 0xc64   : > { %v1938_v34 = vadd.f32 1.4214138, %v1935_v29 }
 0xc65   : > { %v1951_v21 = vmul.f32 %v4731_v1, %v1948_v32  ;;  %v1946_v36 = vmul.f32 %v4733_v14, %v1943_v17 }
 0xc66   : > { %v1941_v26 = vmul.f32 %v4735_v7, %v1938_v34 }
 0xc67   : > { %v1966_v39 = vmul.f32 %v4737_v38, %v1951_v21  ;;  %v1949_v30 = vadd.f32 0.2548296, %v1946_v36  ;;  %v5629_v38 = vld [vmem:[#allocation3 + $0xf0] sm:$0xff] }
 0xc68   : > { %v1944_v40 = vadd.f32 -0.28449672, %v1941_v26  ;;  %4375 = vmatpush3.msra.mxu0 %v5629_v38  ;;  %v5633_v26 = vld [vmem:[#allocation3 + $0xe0] sm:$0xff] }
 0xc69   : > { %v1969_v41 = vsub.f32 1.0, %v1966_v39  ;;  %v1952_v3 = vmul.f32 %v4733_v14, %v1949_v30  ;;  %4376 = vmatprep.subr.mxu0 %v4911_v22  ;;  %v5635_v39 = vld [vmem:[#allocation3 + $0xd0] sm:$0xff]  ;;  %v5639_v30 = vld [vmem:[#allocation3 + $0xc0] sm:$0xff] }
 0xc6a   : > { %v1947_v48 = vmul.f32 %v4735_v7, %v1944_v40  ;;  %4377 = vmatpush3.msra.mxu0 %v5633_v26 }
 0xc6b   : > { %v1972_v52 = vmul.f32 %v1969_v41, %v1909_v47  ;;  %v1967_v49 = vmul.f32 %v4739_v43, %v1952_v3  ;;  %4378 = vmatprep.subr.mxu0 %v4911_v22 }
 0xc6c   : > { %v1950_v57 = vadd.f32 0.2548296, %v1947_v48  ;;  %4379 = vmatpush3.msra.mxu0 %v5635_v39 }
 0xc6d   : > { %v1975_v46 = vadd.f32 1.0, %v1972_v52  ;;  %v1970_v60 = vsub.f32 1.0, %v1967_v49  ;;  %4380 = vmatprep.subr.mxu0 %v4911_v22 }
 0xc6e   : > { %v1953_v61 = vmul.f32 %v4735_v7, %v1950_v57  ;;  %4381 = vmatpush3.msra.mxu0 %v5639_v30 }
 0xc6f   : > { %v1978_v0 = vmul.f32 %v1975_v46, %v1900_v53  ;;  %v1973_v50 = vmul.f32 %v1970_v60, %v1910_v44  ;;  %4391 = vmatprep.subr.mxu0 %v4911_v22  ;;  %v3920_v46 = vld [vmem:[%s6138_s1 + $0x10] ss:$0 sm:$0xff]  ;;  %v3921_v44 = vld [vmem:[%s6138_s1 + $0x11] ss:$0 sm:$0xff] }
 0xc70   : > { %v1968_v2 = vmul.f32 %v4741_v63, %v1953_v61 }
 0xc71   : > { %v1976_v56 = vadd.f32 1.0, %v1973_v50  ;;  %4366 = vmatmul.mubr.msk.f32.vlgmr.msra.gmra.mxu1 %vm1985_vm13, %v1978_v0 }
 0xc72   : > { %v1971_v54 = vsub.f32 1.0, %v1968_v2  ;;  %4368 = vmatprep.mubr.msk.f32.mxu1 %vm4912_vm2, %v4911_v22 }
 0xc73   : > { %v1979_v5 = vmul.f32 %v1976_v56, %v1901_v8 }
 0xc74   : > { %v1974_v1 = vmul.f32 %v1971_v54, %v1911_v11 }
 0xc75   : > { %4369 = vmatmul.mubr.msk.f32.gmra.mxu1 %vm1985_vm13, %v1979_v5 }
 0xc76   : > { %v1977_v35 = vadd.f32 1.0, %v1974_v1  ;;  %4371 = vmatprep.mubr.msk.f32.mxu1 %vm4912_vm2, %v4911_v22 }
 0xc78   : > { %v1980_v51 = vmul.f32 %v1977_v35, %v1902_v9 }
 0xc7a   : > { %4372 = vmatmul.mubr.msk.f32.gmra.mxu1 %vm1985_vm13, %v1980_v51 }
 0xc7b   : > { %4412 = vmatprep.mubr.msk.f32.mxu1 %vm4912_vm2, %v4911_v22 }
 0xd31   : > { %v2061_v12 = vpop.f32.mrf.mxu1 }
 0xd32   : > { %v2062_v37 = vadd.f32 %v3916_v62, %v2061_v12 }
 0xd33   : > { %v4367_v55 = vpop.f32.mrf.mxu1 }
 0xd34   : > { %v5609_v14 = vadd.f32 %v2062_v37, %v5519_v4 }
 0xd35   : > { %v2066_v58 = vpop.f32.mrf.mxu1 }
 0xd36   : > { %v2067_v15 = vadd.f32 %v3916_v62, %v2066_v58  ;;  %v2102_v16 = vsel %vm407_vm3, %v5609_v14, 0.0 }
 0xd37   : > { %2103 = vadd.xlane.f32.xlu0 %v2102_v16  ;;  %v4370_v18 = vpop.f32.mrf.mxu1 }
 0xd38   : > { %v5614_v31 = vadd.f32 %v2067_v15, %v5524_v45 }
 0xd3a   : > { %v2071_v33 = vpop.f32.mrf.mxu1  ;;  %v2105_v59 = vsel %vm407_vm3, %v5614_v31, 0.0 }
 0xd3b   : > { %v2072_v7 = vadd.f32 %v3916_v62, %v2071_v33  ;;  %2106 = vadd.xlane.f32.xlu1 %v2105_v59 }
 0xd3c   : > { %v4373_v19 = vpop.f32.mrf.mxu1 }
 0xd3d   : > { %v5619_v4 = vadd.f32 %v2072_v7, %v5529_v42 }
 0xd3f   : > { %v2108_v20 = vsel %vm414_vm4, %v5619_v4, 0.0 }
 0xd40   : > { %2109 = vadd.xlane.f32.xlu0 %v2108_v20 }
 0xdc0   : > { %v2104_v10 = vpop.xlane.xlu0 %2103 }
 0xdc1   : > { %v2111_v23 = vmul.f32 0.03125, %v2104_v10 }
 0xdc3   : > { %v2114_v24 = vsub.f32 %v5609_v14, %v2111_v23 }
 0xdc4   : > { %v2107_v45 = vpop.xlane.xlu1 %2106 }
 0xdc5   : > { %v2112_v25 = vmul.f32 0.03125, %v2107_v45  ;;  %v2117_v27 = vmul.f32 %v2114_v24, %v2114_v24 }
 0xdc7   : > { %v2115_v28 = vsub.f32 %v5614_v31, %v2112_v25  ;;  %v2120_v13 = vsel %vm407_vm3, %v2117_v27, 0.0 }
 0xdc8   : > { %2121 = vadd.xlane.f32.xlu1 %v2120_v13 }
 0xdc9   : > { %v2110_v29 = vpop.xlane.xlu0 %2109  ;;  %v2118_v32 = vmul.f32 %v2115_v28, %v2115_v28 }
 0xdca   : > { %v2113_v42 = vmul.f32 0.03125, %v2110_v29 }
 0xdcb   : > { %v2123_v17 = vsel %vm407_vm3, %v2118_v32, 0.0 }
 0xdcc   : > { %v2116_v34 = vsub.f32 %v5619_v4, %v2113_v42  ;;  %2124 = vadd.xlane.f32.xlu0 %v2123_v17 }
 0xdce   : > { %v2119_v21 = vmul.f32 %v2116_v34, %v2116_v34 }
 0xdd0   : > { %v2126_v36 = vsel %vm414_vm4, %v2119_v21, 0.0 }
 0xdd1   : > { %2127 = vadd.xlane.f32.xlu1 %v2126_v36 }
 0xe51   : > { %v2122_v40 = vpop.xlane.xlu1 %2121 }
 0xe52   : > { %v2129_v41 = vmul.f32 0.03125, %v2122_v40 }
 0xe54   : > { %v2132_v3 = vadd.f32 1e-05, %v2129_v41 }
 0xe55   : > { %v2125_v43 = vpop.xlane.xlu0 %2124 }
 0xe56   : > { %4742 = vrsqrt.f32 %v2132_v3  ;;  %v2130_v47 = vmul.f32 0.03125, %v2125_v43 }
 0xe58   : > { %v2133_v48 = vadd.f32 1e-05, %v2130_v47 }
 0xe5a   : > { %4744 = vrsqrt.f32 %v2133_v48  ;;  %v2128_v52 = vpop.xlane.xlu1 %2127 }
 0xe5b   : > { %v2131_v49 = vmul.f32 0.03125, %v2128_v52 }
 0xe5d   : > { %v2134_v57 = vadd.f32 1e-05, %v2131_v49 }
 0xe5f   : > { %4746 = vrsqrt.f32 %v2134_v57 }
 0xe63   : > { %v4743_v53 = vpop.eup %4742 }
 0xe64   : > { %v2138_v60 = vmul.f32 %v4743_v53, %v2114_v24 }
 0xe66   : > { %v2145_v61 = vmul.f32 %v3920_v46, %v2138_v60 }
 0xe67   : > { %v4745_v63 = vpop.eup %4744 }
 0xe68   : > { %v2152_v0 = vadd.f32 %v3921_v44, %v2145_v61  ;;  %v2139_v50 = vmul.f32 %v4745_v63, %v2115_v28 }
 0xe6a   : > { %4383 = vmatmul.mubr.msk.f32.vlgmr.msra.gmra.mxu0 %vm407_vm3, %v2152_v0  ;;  %v2146_v2 = vmul.f32 %v3920_v46, %v2139_v50 }
 0xe6b   : > { %4385 = vmatprep.mubr.msk.f32.mxu0 %vm4912_vm2, %v4911_v22 }
 0xe6c   : > { %v4747_v8 = vpop.eup %4746  ;;  %v2153_v56 = vadd.f32 %v3921_v44, %v2146_v2 }
 0xe6d   : > { %v2140_v54 = vmul.f32 %v4747_v8, %v2116_v34 }
 0xe6e   : > { %4386 = vmatmul.mubr.msk.f32.gmra.mxu0 %vm407_vm3, %v2153_v56 }
 0xe6f   : > { %4388 = vmatprep.mubr.msk.f32.mxu0 %vm4912_vm2, %v4911_v22  ;;  %v2147_v5 = vmul.f32 %v3920_v46, %v2140_v54 }
 0xe71   : > { %v2154_v11 = vadd.f32 %v3921_v44, %v2147_v5 }
 0xe73   : > { %4389 = vmatmul.mubr.msk.f32.gmra.mxu0 %vm407_vm3, %v2154_v11 }
 0xe74   : > { %4397 = vmatprep.mubr.msk.f32.mxu0 %vm4912_vm2, %v4911_v22 }
 0xf2a   : > { %v5660_v1 = vpop.f32.mrf.mxu0 }
 0xf2c   : > { %v4384_v9 = vpop.f32.mrf.mxu0 }
 0xf2e   : > { %v5662_v35 = vpop.f32.mrf.mxu0 }
 0xf2f   : > { %2249 = vrot.lane.b32.xlu1 %v5662_v35, %s4913_s26 }
 0xf30   : > { %v4387_v51 = vpop.f32.mrf.mxu0 }
 0xf33   : > { %2247 = vrot.lane.b32.xlu1 %v5660_v1, %s4913_s26  ;;  %v5668_v62 = vpop.f32.mrf.mxu0 }
 0xf34   : > { %2251 = vrot.lane.b32.xlu0 %v5668_v62, %s4913_s26  ;;  %s6152_s26 = smov 8  }
 0xf35   : > { %v4390_v12 = vpop.f32.mrf.mxu0 }
 0xf37   : > { %2490 = vrot.lane.b32.xlu1 %v5668_v62, %s4914_s30 }
 0xf38   : > { %2488 = vrot.lane.b32.xlu0 %v5662_v35, %s4914_s30 }
 0xf3b   : > { %2486 = vrot.lane.b32.xlu1 %v5660_v1, %s4914_s30  ;;  %s6153_s30 = smov 16  }
 0xf3c   : > { %2480 = vrot.lane.b32.xlu0 %v5660_v1, %s4915_s6 }
 0xf3f   : > { %2729 = vrot.lane.b32.xlu1 %v5668_v62, %s4916_s7 }
 0xf40   : > { %2482 = vrot.lane.b32.xlu0 %v5662_v35, %s4915_s6 }
 0xf43   : > { %2727 = vrot.lane.b32.xlu1 %v5662_v35, %s4916_s7 }
 0xf44   : > { %2484 = vrot.lane.b32.xlu0 %v5668_v62, %s4915_s6  ;;  %s6154_s6 = smov 24  }
 0xf47   : > { %2725 = vrot.lane.b32.xlu1 %v5660_v1, %s4916_s7 }
 0xf48   : > { %2719 = vrot.lane.b32.xlu0 %v5660_v1, %s4917_s8 }
 0xf4b   : > { %2968 = vrot.lane.b32.xlu1 %v5668_v62, %s4918_s9 }
 0xf4c   : > { %2721 = vrot.lane.b32.xlu0 %v5662_v35, %s4917_s8 }
 0xf4f   : > { %2966 = vrot.lane.b32.xlu1 %v5662_v35, %s4918_s9 }
 0xf50   : > { %2723 = vrot.lane.b32.xlu0 %v5668_v62, %s4917_s8  ;;  %s4929_s8 = smov [#allocation6]  }
 0xf51   : > { %s4846_s22 = sshll.u32 %s4929_s8, 4  ;;  %s4847_s22 = int_to_ptr.vmem [resolvable:$false] %s4846_s22 }
 0xf53   : > { %2964 = vrot.lane.b32.xlu1 %v5660_v1, %s4918_s9  ;;  %s4848_s9 = scalar_lea.vmem %s4847_s22, 32 }
 0xf54   : > { %2958 = vrot.lane.b32.xlu0 %v5660_v1, %s4919_s10 }
 0xf57   : > { %2381 = vrot.lane.b32.xlu1 %v5660_v1, %s4920_s11 }
 0xf58   : > { %2383 = vrot.lane.b32.xlu0 %v5662_v35, %s4920_s11 }
 0xf5b   : > { %2620 = vrot.lane.b32.xlu1 %v5660_v1, %s4921_s12 }
 0xf5c   : > { %2622 = vrot.lane.b32.xlu0 %v5662_v35, %s4921_s12 }
 0xf5f   : > { %2861 = vrot.lane.b32.xlu1 %v5662_v35, %s4922_s13 }
 0xf63   : > { %2385 = vrot.lane.b32.xlu1 %v5668_v62, %s4920_s11 }
 0xf67   : > { %2624 = vrot.lane.b32.xlu1 %v5668_v62, %s4921_s12 }
 0xf6b   : > { %2863 = vrot.lane.b32.xlu1 %v5668_v62, %s4922_s13 }
 0xfa1   : > { %v2250_v37 = vpop.permute.xlu1 %2249 }
 0xfa5   : > { %v2248_v55 = vpop.permute.xlu1 %2247 }
 0xfa6   : > { %v2252_v58 = vpop.permute.xlu0 %2251 }
 0xfa7   : > { %4392 = vmatpush3.xpose.msk.msra.mxu0 %vm647_vm5, %v2252_v58 }
 0xfa8   : > { %4393 = vmatprep.subr.mxu0 %v4911_v22 }
 0xfa9   : > { %v2491_v15 = vpop.permute.xlu1 %2490 }
 0xfaa   : > { %v2489_v16 = vpop.permute.xlu0 %2488 }
 0xfab   : > { %4394 = vmatpush3.xpose.msk.msra.mxu0 %vm647_vm5, %v2250_v37 }
 0xfac   : > { %4395 = vmatprep.subr.mxu0 %v4911_v22 }
 0xfad   : > { %v2487_v18 = vpop.permute.xlu1 %2486 }
 0xfae   : > { %v2481_v33 = vpop.permute.xlu0 %2480 }
 0xfaf   : > { %4396 = vmatpush3.xpose.msk.msra.mxu0 %vm647_vm5, %v2248_v55 }
 0xfb0   : > { %4421 = vmatprep.subr.mxu0 %v4911_v22 }
 0xfb1   : > { %v2730_v59 = vpop.permute.xlu1 %2729 }
 0xfb2   : > { %4398 = vmatmul.mubr.msk.f32.vlgmr.msra.gmra.mxu0 %vm647_vm5, %v5660_v1  ;;  %v2483_v7 = vpop.permute.xlu0 %2482 }
 0xfb3   : > { %4422 = vmatpush3.xpose.msk.msra.mxu0 %vm647_vm5, %v2491_v15  ;;  %4400 = vmatprep.mubr.msk.f32.mxu0 %vm4912_vm2, %v4911_v22 }
 0xfb4   : > { %4423 = vmatprep.subr.mxu0 %v4911_v22 }
 0xfb5   : > { %v2728_v19 = vpop.permute.xlu1 %2727 }
 0xfb6   : > { %4401 = vmatmul.mubr.msk.f32.gmra.mxu0 %vm647_vm5, %v5662_v35  ;;  %v2485_v20 = vpop.permute.xlu0 %2484 }
 0xfb7   : > { %4424 = vmatpush3.xpose.msk.msra.mxu0 %vm647_vm5, %v2489_v16  ;;  %4403 = vmatprep.mubr.msk.f32.mxu0 %vm4912_vm2, %v4911_v22 }
 0xfb8   : > { %4425 = vmatprep.subr.mxu0 %v4911_v22 }
 0xfb9   : > { %v2726_v10 = vpop.permute.xlu1 %2725 }
 0xfba   : > { %4404 = vmatmul.mubr.msk.f32.gmra.mxu0 %vm647_vm5, %v5668_v62  ;;  %v2720_v24 = vpop.permute.xlu0 %2719 }
 0xfbb   : > { %4426 = vmatpush3.xpose.msk.msra.mxu0 %vm647_vm5, %v2487_v18  ;;  %4427 = vmatprep.mubr.msk.f32.mxu0 %vm4912_vm2, %v4911_v22 }
 0xfbc   : > { %4451 = vmatprep.subr.mxu0 %v4911_v22 }
 0xfbd   : > { %v2969_v23 = vpop.permute.xlu1 %2968 }
 0xfbe   : > { %4428 = vmatmul.mubr.msk.f32.vlgmr.msra.gmra.mxu0 %vm647_vm5, %v2481_v33  ;;  %v2722_v25 = vpop.permute.xlu0 %2721 }
 0xfbf   : > { %4452 = vmatpush3.xpose.msk.msra.mxu0 %vm647_vm5, %v2730_v59  ;;  %4430 = vmatprep.mubr.msk.f32.mxu0 %vm4912_vm2, %v4911_v22 }
 0xfc0   : > { %4453 = vmatprep.subr.mxu0 %v4911_v22 }
 0xfc1   : > { %v2967_v45 = vpop.permute.xlu1 %2966 }
 0xfc2   : > { %4431 = vmatmul.mubr.msk.f32.gmra.mxu0 %vm647_vm5, %v2483_v7  ;;  %v2724_v13 = vpop.permute.xlu0 %2723 }
 0xfc3   : > { %4454 = vmatpush3.xpose.msk.msra.mxu0 %vm647_vm5, %v2728_v19  ;;  %4433 = vmatprep.mubr.msk.f32.mxu0 %vm4912_vm2, %v4911_v22 }
 0xfc4   : > { %4455 = vmatprep.subr.mxu0 %v4911_v22 }
 0xfc5   : > { %v2965_v27 = vpop.permute.xlu1 %2964 }
 0xfc6   : > { %4434 = vmatmul.mubr.msk.f32.gmra.mxu0 %vm647_vm5, %v2485_v20  ;;  %v2959_v32 = vpop.permute.xlu0 %2958 }
 0xfc7   : > { %4456 = vmatpush3.xpose.msk.msra.mxu0 %vm647_vm5, %v2726_v10  ;;  %4457 = vmatprep.mubr.msk.f32.mxu0 %vm4912_vm2, %v4911_v22 }
 0xfc8   : > { %4481 = vmatprep.subr.mxu0 %v4911_v22 }
 0xfc9   : > { %v2382_v28 = vpop.permute.xlu1 %2381 }
 0xfca   : > { %4458 = vmatmul.mubr.msk.f32.vlgmr.msra.gmra.mxu0 %vm647_vm5, %v2720_v24  ;;  %v2384_v34 = vpop.permute.xlu0 %2383 }
 0xfcb   : > { %4482 = vmatpush3.xpose.msk.msra.mxu0 %vm647_vm5, %v2969_v23  ;;  %4460 = vmatprep.mubr.msk.f32.mxu0 %vm4912_vm2, %v4911_v22 }
 0xfcc   : > { %4483 = vmatprep.subr.mxu0 %v4911_v22 }
 0xfcd   : > { %v5764_v29 = vpop.permute.xlu1 %2620 }
 0xfce   : > { %4461 = vmatmul.mubr.msk.f32.gmra.mxu0 %vm647_vm5, %v2722_v25 }
 0xfcf   : > { %4484 = vmatpush3.xpose.msk.msra.mxu0 %vm647_vm5, %v2967_v45  ;;  %4463 = vmatprep.mubr.msk.f32.mxu0 %vm4912_vm2, %v4911_v22  ;;  %v5812_v45 = vpop.permute.xlu0 %2622 }
 0xfd0   : > { %4485 = vmatprep.subr.mxu0 %v4911_v22 }
 0xfd1   : > { %v5771_v42 = vpop.permute.xlu1 %2861 }
 0xfd2   : > { %4464 = vmatmul.mubr.msk.f32.gmra.mxu0 %vm647_vm5, %v2724_v13 }
 0xfd3   : > { %4486 = vmatpush3.xpose.msk.msra.mxu0 %vm647_vm5, %v2965_v27  ;;  %4487 = vmatprep.mubr.msk.f32.mxu0 %vm4912_vm2, %v4911_v22 }
 0xfd4   : > { %4511 = vmatprep.subr.mxu0 %v4911_v22 }
 0xfd5   : > { %v2386_v17 = vpop.permute.xlu1 %2385 }
 0xfd6   : > { %4407 = vmatpush3.msk.msra.mxu1 %vm795_vm6, %v2386_v17  ;;  %4488 = vmatmul.mubr.msk.f32.vlgmr.msra.gmra.mxu0 %vm647_vm5, %v2959_v32 }
 0xfd7   : > { %4408 = vmatprep.subr.mxu1 %v4911_v22  ;;  %4490 = vmatprep.mubr.msk.f32.mxu0 %vm4912_vm2, %v4911_v22 }
 0xfd8   : > { %4409 = vmatpush3.msra.mxu1 %v2384_v34 }
 0xfd9   : > { %4410 = vmatprep.subr.mxu1 %v4911_v22  ;;  %v5808_v23 = vpop.permute.xlu1 %2624 }
 0xfda   : > { %4411 = vmatpush3.msra.mxu1 %v2382_v28 }
 0xfdb   : > { %4436 = vmatprep.subr.mxu1 %v4911_v22 }
 0xfdd   : > { %v5810_v24 = vpop.permute.xlu1 %2863 }
0x1072   : > { %v2331_v21 = vpop.f32.mrf.mxu0 }
0x1073   : > { %v2345_v36 = vmul.f32 0.35355338, %v2331_v21 }
0x1074   : > { %v4399_v40 = vpop.f32.mrf.mxu0 }
0x1075   : > { %v2348_v41 = vsel %vm743_vm7, %v2345_v36, -inf }
0x1076   : > { %2349 = vmax.xlane.f32.xlu1 %v2348_v41  ;;  %v2336_v3 = vpop.f32.mrf.mxu0 }
0x1077   : > { %v2346_v43 = vmul.f32 0.35355338, %v2336_v3 }
0x1078   : > { %v4402_v47 = vpop.f32.mrf.mxu0 }
0x1079   : > { %v2351_v48 = vsel %vm743_vm7, %v2346_v43, -inf }
0x107a   : > { %2352 = vmax.xlane.f32.xlu0 %v2351_v48  ;;  %v2341_v52 = vpop.f32.mrf.mxu0 }
0x107b   : > { %v2347_v49 = vmul.f32 0.35355338, %v2341_v52 }
0x107c   : > { %v4405_v57 = vpop.f32.mrf.mxu0 }
0x107d   : > { %v2354_v53 = vsel %vm750_vm8, %v2347_v49, -inf }
0x107e   : > { %2355 = vmax.xlane.f32.xlu0 %v2354_v53  ;;  %v2570_v46 = vpop.f32.mrf.mxu0 }
0x107f   : > { %v2584_v60 = vmul.f32 0.35355338, %v2570_v46 }
0x1080   : > { %v4429_v44 = vpop.f32.mrf.mxu0 }
0x1081   : > { %v2587_v61 = vsel %vm743_vm7, %v2584_v60, -inf }
0x1082   : > { %2588 = vmax.xlane.f32.xlu0 %v2587_v61  ;;  %v2575_v63 = vpop.f32.mrf.mxu0 }
0x1083   : > { %v2585_v0 = vmul.f32 0.35355338, %v2575_v63 }
0x1084   : > { %v4432_v50 = vpop.f32.mrf.mxu0 }
0x1085   : > { %v2590_v2 = vsel %vm743_vm7, %v2585_v0, -inf }
0x1086   : > { %2591 = vmax.xlane.f32.xlu1 %v2590_v2  ;;  %v2580_v8 = vpop.f32.mrf.mxu0 }
0x1087   : > { %v2586_v56 = vmul.f32 0.35355338, %v2580_v8 }
0x1088   : > { %v4435_v54 = vpop.f32.mrf.mxu0 }
0x1089   : > { %v2593_v5 = vsel %vm750_vm8, %v2586_v56, -inf }
0x108a   : > { %2594 = vmax.xlane.f32.xlu0 %v2593_v5  ;;  %v2809_v11 = vpop.f32.mrf.mxu0 }
0x108b   : > { %v2823_v9 = vmul.f32 0.35355338, %v2809_v11 }
0x108c   : > { %v4459_v51 = vpop.f32.mrf.mxu0 }
0x108d   : > { %v2826_v12 = vsel %vm743_vm7, %v2823_v9, -inf }
0x108e   : > { %2827 = vmax.xlane.f32.xlu1 %v2826_v12  ;;  %v2814_v37 = vpop.f32.mrf.mxu0 }
0x108f   : > { %v5792_v55 = vmul.f32 0.35355338, %v2814_v37 }
0x1090   : > { %v4462_v58 = vpop.f32.mrf.mxu0 }
0x1091   : > { %v2829_v15 = vsel %vm743_vm7, %v5792_v55, -inf }
0x1092   : > { %2830 = vmax.xlane.f32.xlu0 %v2829_v15  ;;  %v2819_v16 = vpop.f32.mrf.mxu0 }
0x1093   : > { %v5796_v18 = vmul.f32 0.35355338, %v2819_v16 }
0x1094   : > { %v4465_v33 = vpop.f32.mrf.mxu0 }
0x1095   : > { %v2832_v59 = vsel %vm750_vm8, %v5796_v18, -inf }
0x1096   : > { %2833 = vmax.xlane.f32.xlu1 %v2832_v59  ;;  %v3048_v7 = vpop.f32.mrf.mxu0 }
0x1097   : > { %v5800_v19 = vmul.f32 0.35355338, %v3048_v7 }
0x1098   : > { %v4489_v20 = vpop.f32.mrf.mxu0 }
0x1099   : > { %v3065_v10 = vsel %vm743_vm7, %v5800_v19, -inf }
0x109a   : > { %3066 = vmax.xlane.f32.xlu0 %v3065_v10 }
0x10a7   : > { %2859 = vrot.lane.b32.xlu1 %v5660_v1, %s4922_s13  ;;  %s230_s13 = sand.u32 1, %s4898_s19  }
0x10a8   : > { %s231_s17 = scalar_lea.vmem [#allocation6], %s230_s13 }
0x10a9   : > { %s3779_s23 = sshll.u32 %s231_s17, 4  ;;  %s3780_s23 = int_to_ptr.vmem [resolvable:$true] %s3779_s23 }
0x10aa   : > { %s4842_s7 = scalar_lea.vmem %s3780_s23, 16  ;;  %p4849_p11 = scmp.lt.s32.totalorder %s3780_s23, %s4847_s22 }
0x10ab   : > { %p4843_p6 = scmp.ne.s32.totalorder %s3780_s23, %s4842_s7  ;;  %p4850_p12 = scmp.lt.s32.totalorder %s4848_s9, %s4842_s7 }
0x10ad   : > { %p4844_p9 = pnand %p4843_p6, %p4998_p5  ;;  %p4851_p13 = por %p4850_p12, %p4849_p11 }
0x10af   : > { %p4845_p10 = pneg %p4844_p9 }
0x10b0   : > { %3102 = vrot.lane.b32.xlu0 %v5668_v62, %s4923_s14 }
0x10b1   : > { %p4852_p0 = pnand %p4851_p13, %p4845_p10 }
0x10ff   : > { %v2350_v25 = vpop.xlane.xlu1 %2349 }
0x1100   : > { %v2357_v27 = vsub.f32 %v2345_v36, %v2350_v25 }
0x1102   : > { %v2360_v28 = vmul.f32 1.442695, %v2357_v27 }
0x1103   : > { %v2353_v13 = vpop.xlane.xlu0 %2352 }
0x1104   : > { %4748 = vpow2.f32 %v2360_v28  ;;  %v2358_v32 = vsub.f32 %v2346_v43, %v2353_v13 }
0x1106   : > { %v2362_v17 = vmul.f32 1.442695, %v2358_v32 }
0x1107   : > { %v2356_v34 = vpop.xlane.xlu0 %2355 }
0x1108   : > { %4750 = vpow2.f32 %v2362_v17  ;;  %v2359_v21 = vsub.f32 %v2347_v49, %v2356_v34 }
0x110a   : > { %v2364_v40 = vmul.f32 1.442695, %v2359_v21 }
0x110b   : > { %v2589_v41 = vpop.xlane.xlu0 %2588 }
0x110c   : > { %4752 = vpow2.f32 %v2364_v40  ;;  %v2596_v3 = vsub.f32 %v2584_v60, %v2589_v41 }
0x110e   : > { %v2599_v47 = vmul.f32 1.442695, %v2596_v3 }
0x110f   : > { %v2592_v48 = vpop.xlane.xlu1 %2591 }
0x1110   : > { %4754 = vpow2.f32 %v2599_v47  ;;  %v2597_v52 = vsub.f32 %v2585_v0, %v2592_v48 }
0x1111   : > { %v5814_v57 = vpop.eup %4748 }
0x1112   : > { %v2601_v53 = vmul.f32 1.442695, %v2597_v52  ;;  %v2366_v36 = vsel %vm743_vm7, %v5814_v57, 0.0 }
0x1113   : > { %v2595_v46 = vpop.xlane.xlu0 %2594  ;;  %2367 = vadd.xlane.f32.xlu1 %v2366_v36 }
0x1114   : > { %4756 = vpow2.f32 %v2601_v53  ;;  %v2598_v43 = vsub.f32 %v2586_v56, %v2595_v46 }
0x1115   : > { %v5818_v44 = vpop.eup %4750 }
0x1116   : > { %v2603_v49 = vmul.f32 1.442695, %v2598_v43  ;;  %v2369_v60 = vsel %vm743_vm7, %v5818_v44, 0.0 }
0x1117   : > { %v2828_v61 = vpop.xlane.xlu1 %2827  ;;  %2370 = vadd.xlane.f32.xlu0 %v2369_v60 }
0x1118   : > { %4758 = vpow2.f32 %v2603_v49  ;;  %v2835_v63 = vsub.f32 %v2823_v9, %v2828_v61 }
0x1119   : > { %v5822_v0 = vpop.eup %4752 }
0x111a   : > { %v2838_v50 = vmul.f32 1.442695, %v2835_v63  ;;  %v2372_v2 = vsel %vm750_vm8, %v5822_v0, 0.0 }
0x111b   : > { %2373 = vadd.xlane.f32.xlu1 %v2372_v2  ;;  %v2831_v37 = vpop.xlane.xlu0 %2830 }
0x111c   : > { %4760 = vpow2.f32 %v2838_v50  ;;  %v2836_v58 = vsub.f32 %v5792_v55, %v2831_v37 }
0x111d   : > { %v5826_v8 = vpop.eup %4754 }
0x111e   : > { %v2605_v56 = vsel %vm743_vm7, %v5826_v8, 0.0  ;;  %v2840_v15 = vmul.f32 1.442695, %v2836_v58 }
0x111f   : > { %2606 = vadd.xlane.f32.xlu0 %v2605_v56  ;;  %v2834_v16 = vpop.xlane.xlu1 %2833 }
0x1120   : > { %4762 = vpow2.f32 %v2840_v15  ;;  %v2837_v33 = vsub.f32 %v5796_v18, %v2834_v16 }
0x1121   : > { %v5830_v54 = vpop.eup %4756 }
0x1122   : > { %v2608_v5 = vsel %vm743_vm7, %v5830_v54, 0.0  ;;  %v2842_v7 = vmul.f32 1.442695, %v2837_v33 }
0x1123   : > { %2609 = vadd.xlane.f32.xlu1 %v2608_v5  ;;  %v3067_v59 = vpop.xlane.xlu0 %3066 }
0x1124   : > { %v3074_v20 = vsub.f32 %v5800_v19, %v3067_v59  ;;  %4764 = vpow2.f32 %v2842_v7  ;;  %v2860_v19 = vpop.permute.xlu1 %2859 }
0x1125   : > { %v5834_v11 = vpop.eup %4758 }
0x1126   : > { %v2611_v9 = vsel %vm750_vm8, %v5834_v11, 0.0  ;;  %v3077_v10 = vmul.f32 1.442695, %v3074_v20 }
0x1127   : > { %2612 = vadd.xlane.f32.xlu0 %v2611_v9  ;;  %v3103_v13 = vpop.permute.xlu0 %3102 }
0x1128   : > { %4766 = vpow2.f32 %v3077_v10 }
0x1129   : > { %v5838_v51 = vpop.eup %4760 }
0x112a   : > { %v2844_v12 = vsel %vm743_vm7, %v5838_v51, 0.0 }
0x112b   : > { %2845 = vadd.xlane.f32.xlu0 %v2844_v12 }
0x112d   : > { %v5849_v25 = vpop.eup %4762 }
0x112e   : > { %v2847_v55 = vsel %vm743_vm7, %v5849_v25, 0.0 }
0x1131   : > { %v5853_v27 = vpop.eup %4764 }
0x1134   : > { %2960 = vrot.lane.b32.xlu1 %v5662_v35, %s4919_s10 }
0x1135   : > { %v5857_v28 = vpop.eup %4766 }
0x1136   : > { %v3083_v18 = vsel %vm743_vm7, %v5857_v28, 0.0 }
0x1141   : > { %3100 = vrot.lane.b32.xlu0 %v5662_v35, %s4923_s14  ;;  %v2850_v35 = vsel %vm750_vm8, %v5853_v27, 0.0 }
0x1158   : > { %2848 = vadd.xlane.f32.xlu1 %v2847_v55 }
0x1160   : > { %2851 = vadd.xlane.f32.xlu0 %v2850_v35 }
0x1164   : > { %3084 = vadd.xlane.f32.xlu0 %v3083_v18 }
0x1169   : > { %3098 = vrot.lane.b32.xlu1 %v5660_v1, %s4923_s14 }
0x116d   : > { %3256 = vrot.lane.b32.xlu1 %v5629_v38, %s4924_s15 }
0x117a   : > { %2962 = vrot.lane.b32.xlu0 %v5668_v62, %s4919_s10 }
0x117e   : > { %3254 = vrot.lane.b32.xlu0 %v5633_v26, %s4924_s15 }
0x1182   : > { %3252 = vrot.lane.b32.xlu0 %v5635_v39, %s4924_s15 }
0x1186   : > { %3250 = vrot.lane.b32.xlu0 %v5639_v30, %s4924_s15 }
0x119c   : > { %v2368_v32 = vpop.xlane.xlu1 %2367 }
0x119d   : > { %4768 = vrcp.f32 %v2368_v32 }
0x11a0   : > { %v2371_v1 = vpop.xlane.xlu0 %2370 }
0x11a1   : > { %4770 = vrcp.f32 %v2371_v1 }
0x11a4   : > { %v2374_v17 = vpop.xlane.xlu1 %2373 }
0x11a5   : > { %4772 = vrcp.f32 %v2374_v17 }
0x11a8   : > { %v2607_v38 = vpop.xlane.xlu0 %2606 }
0x11a9   : > { %4774 = vrcp.f32 %v2607_v38 }
0x11aa   : > { %v4769_v62 = vpop.eup %4768 }
0x11ab   : > { %v2378_v34 = vmul.f32 %v4769_v62, %v5814_v57 }
0x11ac   : > { %v2610_v26 = vpop.xlane.xlu1 %2609 }
0x11ad   : > { %4776 = vrcp.f32 %v2610_v26  ;;  %4413 = vmatmul.mubr.msk.f32.vlgmr.msra.gmra.mxu1 %vm743_vm7, %v2378_v34 }
0x11ae   : > { %v4771_v39 = vpop.eup %4770  ;;  %4437 = vmatpush3.msk.msra.mxu1 %vm795_vm6, %v5808_v23  ;;  %4415 = vmatprep.mubr.msk.f32.mxu1 %vm4912_vm2, %v4911_v22 }
0x11af   : > { %4438 = vmatprep.subr.mxu1 %v4911_v22  ;;  %v2379_v30 = vmul.f32 %v4771_v39, %v5818_v44 }
0x11b0   : > { %4439 = vmatpush3.msra.mxu1 %v5812_v45  ;;  %v2961_v21 = vpop.permute.xlu1 %2960  ;;  %v2613_v40 = vpop.xlane.xlu0 %2612 }
0x11b1   : > { %4440 = vmatprep.subr.mxu1 %v4911_v22  ;;  %4778 = vrcp.f32 %v2613_v40  ;;  %4416 = vmatmul.mubr.msk.f32.gmra.mxu1 %vm743_vm7, %v2379_v30 }
0x11b2   : > { %v4773_v41 = vpop.eup %4772  ;;  %4441 = vmatpush3.msra.mxu1 %v5764_v29  ;;  %4491 = vmatmul.mubr.msk.f32.gmra.mxu0 %vm647_vm5, %v2961_v21 }
0x11b3   : > { %4418 = vmatprep.mubr.msk.f32.mxu1 %vm4912_vm2, %v4911_v22  ;;  %v2380_v23 = vmul.f32 %v4773_v41, %v5822_v0  ;;  %4466 = vmatprep.subr.mxu1 %v4911_v22 }
0x11b4   : > { %v2846_v45 = vpop.xlane.xlu0 %2845  ;;  %4493 = vmatprep.mubr.msk.f32.mxu0 %vm4912_vm2, %v4911_v22 }
0x11b5   : > { %4780 = vrcp.f32 %v2846_v45  ;;  %4419 = vmatmul.mubr.msk.f32.gmra.mxu1 %vm743_vm7, %v2380_v23 }
0x11b6   : > { %v4775_v3 = vpop.eup %4774  ;;  %4442 = vmatprep.mubr.msk.f32.mxu1 %vm4912_vm2, %v4911_v22 }
0x11b7   : > { %v2617_v29 = vmul.f32 %v4775_v3, %v5826_v8 }
0x11b8   : > { %v3101_v53 = vpop.permute.xlu0 %3100 }
0x11b9   : > { %4443 = vmatmul.mubr.msk.f32.vlgmr.msra.gmra.mxu1 %vm743_vm7, %v2617_v29 }
0x11ba   : > { %v4777_v47 = vpop.eup %4776  ;;  %4467 = vmatpush3.msk.msra.mxu1 %vm795_vm6, %v5810_v24  ;;  %4445 = vmatprep.mubr.msk.f32.mxu1 %vm4912_vm2, %v4911_v22 }
0x11bb   : > { %4468 = vmatprep.subr.mxu1 %v4911_v22  ;;  %v2618_v48 = vmul.f32 %v4777_v47, %v5830_v54 }
0x11bc   : > { %4469 = vmatpush3.msra.mxu1 %v5771_v42 }
0x11bd   : > { %4470 = vmatprep.subr.mxu1 %v4911_v22  ;;  %4446 = vmatmul.mubr.msk.f32.gmra.mxu1 %vm743_vm7, %v2618_v48 }
0x11be   : > { %v4779_v52 = vpop.eup %4778  ;;  %4471 = vmatpush3.msra.mxu1 %v2860_v19  ;;  %4448 = vmatprep.mubr.msk.f32.mxu1 %vm4912_vm2, %v4911_v22 }
0x11bf   : > { %v2619_v24 = vmul.f32 %v4779_v52, %v5834_v11  ;;  %4496 = vmatprep.subr.mxu1 %v4911_v22 }
0x11c1   : > { %4449 = vmatmul.mubr.msk.f32.gmra.mxu1 %vm743_vm7, %v2619_v24 }
0x11c2   : > { %v4781_v57 = vpop.eup %4780  ;;  %4472 = vmatprep.mubr.msk.f32.mxu1 %vm4912_vm2, %v4911_v22 }
0x11c3   : > { %v2856_v42 = vmul.f32 %v4781_v57, %v5838_v51 }
0x11c5   : > { %4473 = vmatmul.mubr.msk.f32.vlgmr.msra.gmra.mxu1 %vm743_vm7, %v2856_v42 }
0x11c6   : > { %4497 = vmatpush3.msk.msra.mxu1 %vm795_vm6, %v3103_v13  ;;  %4475 = vmatprep.mubr.msk.f32.mxu1 %vm4912_vm2, %v4911_v22 }
0x11c7   : > { %4498 = vmatprep.subr.mxu1 %v4911_v22 }
0x11c8   : > { %4499 = vmatpush3.msra.mxu1 %v3101_v53 }
0x11c9   : > { %4500 = vmatprep.subr.mxu1 %v4911_v22 }
0x11e1   : > { %v2849_v36 = vpop.xlane.xlu1 %2848 }
0x11e2   : > { %4782 = vrcp.f32 %v2849_v36 }
0x11e5   : > { %v3099_v46 = vpop.permute.xlu1 %3098 }
0x11e6   : > { %4501 = vmatpush3.msra.mxu1 %v3099_v46 }
0x11e7   : > { %4528 = vmatprep.subr.mxu1 %v4911_v22 }
0x11e9   : > { %v2852_v43 = vpop.xlane.xlu0 %2851  ;;  %v3257_v8 = vpop.permute.xlu1 %3256 }
0x11ea   : > { %4784 = vrcp.f32 %v2852_v43  ;;  %4512 = vmatpush3.msra.mxu0 %v3257_v8 }
0x11eb   : > { %4513 = vmatprep.subr.mxu0 %v4911_v22 }
0x11ed   : > { %v3085_v44 = vpop.xlane.xlu0 %3084 }
0x11ee   : > { %4786 = vrcp.f32 %v3085_v44  ;;  %v5966_v44 = vld [vmem:[%s6138_s1 + $0x12] ss:$0 sm:$0xff] }
0x11ef   : > { %v4783_v49 = vpop.eup %4782 }
0x11f0   : > { %v2857_v60 = vmul.f32 %v4783_v49, %v5849_v25 }
0x11f1   : > { %v2963_v61 = vpop.permute.xlu0 %2962 }
0x11f2   : > { %4476 = vmatmul.mubr.msk.f32.gmra.mxu1 %vm743_vm7, %v2857_v60  ;;  %4494 = vmatmul.mubr.msk.f32.gmra.mxu0 %vm647_vm5, %v2963_v61 }
0x11f3   : > { %4478 = vmatprep.mubr.msk.f32.mxu1 %vm4912_vm2, %v4911_v22  ;;  %4519 = vmatprep.mubr.msk.f32.mxu0 %vm4912_vm2, %v4911_v22 }
0x11f5   : > { %v3255_v56 = vpop.permute.xlu0 %3254 }
0x11f6   : > { %4514 = vmatpush3.msra.mxu0 %v3255_v56 }
0x11f7   : > { %v4785_v63 = vpop.eup %4784  ;;  %4515 = vmatprep.subr.mxu0 %v4911_v22 }
0x11f8   : > { %v2858_v0 = vmul.f32 %v4785_v63, %v5853_v27 }
0x11f9   : > { %v3253_v5 = vpop.permute.xlu0 %3252 }
0x11fa   : > { %4479 = vmatmul.mubr.msk.f32.gmra.mxu1 %vm743_vm7, %v2858_v0  ;;  %4516 = vmatpush3.msra.mxu0 %v3253_v5 }
0x11fb   : > { %v4787_v50 = vpop.eup %4786  ;;  %4502 = vmatprep.mubr.msk.f32.mxu1 %vm4912_vm2, %v4911_v22  ;;  %4517 = vmatprep.subr.mxu0 %v4911_v22 }
0x11fc   : > { %v3095_v2 = vmul.f32 %v4787_v50, %v5857_v28 }
0x11fd   : > { %v3251_v51 = vpop.permute.xlu0 %3250 }
0x11fe   : > { %4503 = vmatmul.mubr.msk.f32.vlgmr.msra.gmra.mxu1 %vm743_vm7, %v3095_v2  ;;  %4518 = vmatpush3.msra.mxu0 %v3251_v51 }
0x11ff   : > { %4505 = vmatprep.mubr.msk.f32.mxu1 %vm4912_vm2, %v4911_v22  ;;  %4545 = vmatprep.subr.mxu0 %v4911_v22 }
0x126d   : > { %v2466_v54 = vpop.f32.mrf.mxu1 }
0x126f   : > { %v4414_v11 = vpop.f32.mrf.mxu1 }
0x1271   : > { %v5939_v9 = vpop.f32.mrf.mxu1 }
0x1272   : > { %v3053_v12 = vpop.f32.mrf.mxu0 }
0x1273   : > { %v4417_v37 = vpop.f32.mrf.mxu1  ;;  %v3063_v35 = vmul.f32 0.35355338, %v3053_v12 }
0x1274   : > { %v4492_v58 = vpop.f32.mrf.mxu0 }
0x1275   : > { %v5942_v15 = vpop.f32.mrf.mxu1  ;;  %v3068_v28 = vsel %vm743_vm7, %v3063_v35, -inf  ;;  %v2093_v58 = vld [vmem:[#allocation3 + $0xf8] sm:$0xff] }
0x1276   : > { %4529 = vmatpush3.msra.mxu1 %v2093_v58 }
0x1277   : > { %v4420_v16 = vpop.f32.mrf.mxu1  ;;  %4530 = vmatprep.subr.mxu1 %v4911_v22 }
0x1279   : > { %v2705_v33 = vpop.f32.mrf.mxu1 }
0x127a   : > { %3200 = vrot.lane.b32.xlu1 %v2705_v33, %s6152_s26  ;;  %v2092_v33 = vld [vmem:[#allocation3 + $0xe8] sm:$0xff] }
0x127b   : > { %v4444_v59 = vpop.f32.mrf.mxu1  ;;  %4531 = vmatpush3.msra.mxu1 %v2092_v33 }
0x127c   : > { %v2091_v59 = vld [vmem:[#allocation3 + $0xd8] sm:$0xff]  ;;  %4532 = vmatprep.subr.mxu1 %v4911_v22 }
0x127d   : > { %v2710_v7 = vpop.f32.mrf.mxu1  ;;  %4533 = vmatpush3.msra.mxu1 %v2091_v59 }
0x127e   : > { %4534 = vmatprep.subr.mxu1 %v4911_v22 }
0x127f   : > { %v4447_v20 = vpop.f32.mrf.mxu1 }
0x1281   : > { %v5945_v10 = vpop.f32.mrf.mxu1 }
0x1283   : > { %v4450_v25 = vpop.f32.mrf.mxu1 }
0x1285   : > { %v2944_v55 = vpop.f32.mrf.mxu1 }
0x1286   : > { %3212 = vrot.lane.b32.xlu0 %v2944_v55, %s6153_s30 }
0x1287   : > { %v4474_v27 = vpop.f32.mrf.mxu1 }
0x129e   : > { %3069 = vmax.xlane.f32.xlu1 %v3068_v28 }
0x12b2   : > { %v2949_v18 = vpop.f32.mrf.mxu1  ;;  %v3058_v19 = vpop.f32.mrf.mxu0 }
0x12b3   : > { %v3064_v34 = vmul.f32 0.35355338, %v3058_v19 }
0x12b4   : > { %v4477_v13 = vpop.f32.mrf.mxu1  ;;  %v4495_v32 = vpop.f32.mrf.mxu0 }
0x12b5   : > { %v3071_v26 = vsel %vm750_vm8, %v3064_v34, -inf }
0x12ba   : > { %v2954_v1 = vpop.f32.mrf.mxu1 }
0x12bc   : > { %v4480_v17 = vpop.f32.mrf.mxu1 }
0x12be   : > { %v3183_v38 = vpop.f32.mrf.mxu1 }
0x12bf   : > { %3224 = vrot.lane.b32.xlu0 %v3183_v38, %s6154_s6 }
0x12c0   : > { %v4504_v62 = vpop.f32.mrf.mxu1 }
0x12de   : > { %3072 = vmax.xlane.f32.xlu0 %v3071_v26 }
0x12ec   : > { %v3201_v39 = vpop.permute.xlu1 %3200 }
0x12ed   : > { %v3233_v23 = vsel %vm647_vm5, %v2466_v54, %v3201_v39 }
0x12f8   : > { %v3213_v41 = vpop.permute.xlu0 %3212 }
0x12f9   : > { %v3236_v45 = vsel %vm1634_vm9, %v3233_v23, %v3213_v41  ;;  %v2099_v41 = vld [vmem:[#allocation3 + $0x150] sm:$0xff]  ;;  %v2098_v23 = vld [vmem:[#allocation3 + $0x140] sm:$0xff] }
0x1327   : > { %v3070_v30 = vpop.xlane.xlu1 %3069 }
0x1328   : > { %v3075_v21 = vsub.f32 %v3063_v35, %v3070_v30 }
0x132a   : > { %v3079_v40 = vmul.f32 1.442695, %v3075_v21  ;;  %v2101_v21 = vld [vmem:[#allocation3 + $0x170] sm:$0xff] }
0x132c   : > { %4788 = vpow2.f32 %v3079_v40  ;;  %v2100_v40 = vld [vmem:[#allocation3 + $0x160] sm:$0xff] }
0x1331   : > { %v3225_v3 = vpop.permute.xlu0 %3224 }
0x1332   : > { %v3239_v29 = vsel %vm1638_vm10, %v3236_v45, %v3225_v3 }
0x1333   : > { %4520 = vmatmul.mubr.msk.f32.vlgmr.msra.gmra.mxu0 %vm407_vm3, %v3239_v29  ;;  %v2097_v29 = vld [vmem:[#allocation3 + $0x130] sm:$0xff] }
0x1334   : > { %4522 = vmatprep.mubr.msk.f32.mxu0 %vm4912_vm2, %v4911_v22  ;;  %4546 = vmatpush3.msra.mxu0 %v2101_v21 }
0x1335   : > { %4547 = vmatprep.subr.mxu0 %v4911_v22 }
0x1336   : > { %4548 = vmatpush3.msra.mxu0 %v2100_v40 }
0x1337   : > { %4549 = vmatprep.subr.mxu0 %v4911_v22 }
0x1338   : > { %4550 = vmatpush3.msra.mxu0 %v2099_v41 }
0x1339   : > { %v4789_v47 = vpop.eup %4788  ;;  %4551 = vmatprep.subr.mxu0 %v4911_v22 }
0x133a   : > { %v3086_v48 = vsel %vm743_vm7, %v4789_v47, 0.0  ;;  %4552 = vmatpush3.msra.mxu0 %v2098_v23 }
0x133b   : > { %3087 = vadd.xlane.f32.xlu1 %v3086_v48  ;;  %4553 = vmatprep.subr.mxu0 %v4911_v22 }
0x133c   : > { %4554 = vmatpush3.msra.mxu0 %v2097_v29 }
0x133d   : > { %4555 = vmatprep.subr.mxu0 %v4911_v22 }
0x1367   : > { %v3073_v52 = vpop.xlane.xlu0 %3072 }
0x1368   : > { %v3076_v24 = vsub.f32 %v3064_v34, %v3073_v52  ;;  %v6006_v34 = vld [vmem:[%s6138_s1 + $0x13] ss:$0 sm:$0xff]  ;;  %v2096_v52 = vld [vmem:[#allocation3 + $0x120] sm:$0xff] }
0x1369   : > { %4556 = vmatpush3.msra.mxu0 %v2096_v52 }
0x136a   : > { %v3081_v57 = vmul.f32 1.442695, %v3076_v24  ;;  %4557 = vmatprep.subr.mxu0 %v4911_v22 }
0x136c   : > { %4790 = vpow2.f32 %v3081_v57  ;;  %v2095_v57 = vld [vmem:[#allocation3 + $0x110] sm:$0xff] }
0x136d   : > { %4558 = vmatpush3.msra.mxu0 %v2095_v57 }
0x136e   : > { %4559 = vmatprep.subr.mxu0 %v4911_v22 }
0x1379   : > { %v4791_v42 = vpop.eup %4790 }
0x137a   : > { %v3089_v53 = vsel %vm750_vm8, %v4791_v42, 0.0 }
0x137b   : > { %3090 = vadd.xlane.f32.xlu1 %v3089_v53 }
0x138c   : > { %3214 = vrot.lane.b32.xlu1 %v2949_v18, %s6153_s30 }
0x13c4   : > { %v3088_v36 = vpop.xlane.xlu1 %3087 }
0x13c5   : > { %4792 = vrcp.f32 %v3088_v36 }
0x13d2   : > { %v4793_v46 = vpop.eup %4792 }
0x13d3   : > { %v3096_v43 = vmul.f32 %v4793_v46, %v4789_v47 }
0x13d5   : > { %4506 = vmatmul.mubr.msk.f32.gmra.mxu1 %vm743_vm7, %v3096_v43 }
0x13d6   : > { %4508 = vmatprep.mubr.msk.f32.mxu1 %vm4912_vm2, %v4911_v22 }
0x13f3   : > { %v3337_v49 = vpop.f32.mrf.mxu0 }
0x13f4   : > { %v3338_v60 = vadd.f32 %v5966_v44, %v3337_v49  ;;  %v6034_v49 = vld [vmem:[%s6138_s1 + $0x15] ss:$0 sm:$0xff] }
0x13f5   : > { %v4521_v61 = vpop.f32.mrf.mxu0 }
0x13f6   : > { %v5970_v63 = vadd.f32 %v3338_v60, %v5609_v14 }
0x13f8   : > { %v3354_v0 = vsel %vm407_vm3, %v5970_v63, 0.0 }
0x13f9   : > { %3355 = vadd.xlane.f32.xlu0 %v3354_v0 }
0x1404   : > { %v3091_v50 = vpop.xlane.xlu1 %3090 }
0x1405   : > { %4794 = vrcp.f32 %v3091_v50 }
0x140f   : > { %3202 = vrot.lane.b32.xlu0 %v2710_v7, %s6152_s26  ;;  %v2090_v7 = vld [vmem:[#allocation3 + $0xc8] sm:$0xff] }
0x1410   : > { %4535 = vmatpush3.msra.mxu1 %v2090_v7 }
0x1411   : > { %4570 = vmatprep.subr.mxu1 %v4911_v22 }
0x1412   : > { %v4795_v2 = vpop.eup %4794 }
0x1413   : > { %3216 = vrot.lane.b32.xlu0 %v2954_v1, %s6153_s30  ;;  %v3097_v8 = vmul.f32 %v4795_v2, %v4791_v42  ;;  %v2094_v42 = vld [vmem:[#allocation3 + $0x100] sm:$0xff]  ;;  %s6102_s30 = scalar_lea.hbm %s6142_s5, %s3980_s16 }
0x1414   : > { %4560 = vmatpush3.msra.mxu0 %v2094_v42 }
0x1415   : > { %4509 = vmatmul.mubr.msk.f32.gmra.mxu1 %vm743_vm7, %v3097_v8 }
0x1416   : > { %4536 = vmatprep.mubr.msk.f32.mxu1 %vm4912_vm2, %v4911_v22 }
0x1482   : > { %v3356_v54 = vpop.xlane.xlu0 %3355 }
0x1483   : > { %v3363_v5 = vmul.f32 0.03125, %v3356_v54 }
0x1485   : > { %v3366_v11 = vsub.f32 %v5970_v63, %v3363_v5 }
0x1486   : > { %v3203_v20 = vpop.permute.xlu0 %3202 }
0x1487   : > { %v3369_v51 = vmul.f32 %v3366_v11, %v3366_v11  ;;  %v3234_v25 = vsel %vm647_vm5, %v5939_v9, %v3203_v20 }
0x1489   : > { %v3372_v12 = vsel %vm407_vm3, %v3369_v51, 0.0 }
0x148a   : > { %v3217_v1 = vpop.permute.xlu0 %3216 }
0x1495   : > { %v3188_v56 = vpop.f32.mrf.mxu1 }
0x1496   : > { %3226 = vrot.lane.b32.xlu1 %v3188_v56, %s6154_s6 }
0x1497   : > { %v4507_v14 = vpop.f32.mrf.mxu1 }
0x14ba   : > { %3373 = vadd.xlane.f32.xlu1 %v3372_v12 }
0x14cb   : > { %3204 = vrot.lane.b32.xlu1 %v5945_v10, %s6152_s26  ;;  %v3215_v10 = vpop.permute.xlu1 %3214 }
0x14cc   : > { %v3237_v55 = vsel %vm1634_vm9, %v3234_v25, %v3215_v10 }
0x14d5   : > { %v3193_v37 = vpop.f32.mrf.mxu1 }
0x14d6   : > { %3228 = vrot.lane.b32.xlu1 %v3193_v37, %s6154_s6  ;;  %s3767_s6 = scalar_lea.sflag [#allocation5], %s230_s13 }
0x14d7   : > { %v4510_v16 = vpop.f32.mrf.mxu1 }
0x1508   : > { %v3227_v27 = vpop.permute.xlu1 %3226 }
0x1509   : > { %v3240_v35 = vsel %vm1638_vm10, %v3237_v55, %v3227_v27 }
0x150a   : > { %4523 = vmatmul.mubr.msk.f32.gmra.mxu0 %vm407_vm3, %v3240_v35 }
0x150b   : > { %4525 = vmatprep.mubr.msk.f32.mxu0 %vm4912_vm2, %v4911_v22 }
0x1543   : > { %v3374_v28 = vpop.xlane.xlu1 %3373 }
0x1544   : > { %v3381_v18 = vmul.f32 0.03125, %v3374_v28 }
0x1546   : > { %v3384_v19 = vadd.f32 1e-05, %v3381_v18 }
0x1547   : > { %v3205_v13 = vpop.permute.xlu1 %3204 }
0x1548   : > { %4796 = vrsqrt.f32 %v3384_v19  ;;  %v3235_v32 = vsel %vm647_vm5, %v5942_v15, %v3205_v13  ;;  %v6011_v15 = vld [vmem:[%s6138_s1 + $0x14] ss:$0 sm:$0xff] }
0x1549   : > { %v3238_v9 = vsel %vm1634_vm9, %v3235_v32, %v3217_v1 }
0x154b   : > { %v3229_v17 = vpop.permute.xlu1 %3228 }
0x154c   : > { %v3241_v38 = vsel %vm1638_vm10, %v3238_v9, %v3229_v17 }
0x154d   : > { %4526 = vmatmul.mubr.msk.f32.gmra.mxu0 %vm407_vm3, %v3241_v38 }
0x154e   : > { %4561 = vmatprep.mubr.msk.f32.mxu0 %vm4912_vm2, %v4911_v22 }
0x1555   : > { %v4797_v62 = vpop.eup %4796 }
0x1556   : > { %v3390_v26 = vmul.f32 %v4797_v62, %v3366_v11 }
0x1558   : > { %v3397_v39 = vmul.f32 %v6006_v34, %v3390_v26 }
0x155a   : > { %v3404_v30 = vadd.f32 %v6011_v15, %v3397_v39 }
0x155c   : > { %4537 = vmatmul.mubr.msk.f32.vlgmr.msra.gmra.mxu1 %vm407_vm3, %v3404_v30 }
0x155d   : > { %4539 = vmatprep.mubr.msk.f32.mxu1 %vm4912_vm2, %v4911_v22 }
0x15ca   : > { %v3342_v45 = vpop.f32.mrf.mxu0 }
0x15cb   : > { %v3343_v3 = vadd.f32 %v5966_v44, %v3342_v45 }
0x15cc   : > { %v4524_v47 = vpop.f32.mrf.mxu0 }
0x15cd   : > { %v3352_v48 = vadd.f32 %v3343_v3, %v5614_v31  ;;  %v3975_v3 = vld [vmem:[%s6138_s1 + $0x16] ss:$0 sm:$0xff] }
0x15cf   : > { %v3357_v24 = vsel %vm407_vm3, %v3352_v48, 0.0 }
0x15d0   : > { %3358 = vadd.xlane.f32.xlu0 %v3357_v24 }
0x160d   : > { %v3347_v53 = vpop.f32.mrf.mxu0 }
0x160e   : > { %v3348_v36 = vadd.f32 %v5966_v44, %v3347_v53 }
0x160f   : > { %v4527_v46 = vpop.f32.mrf.mxu0 }
0x1610   : > { %v3353_v31 = vadd.f32 %v3348_v36, %v5619_v4 }
0x1612   : > { %v3360_v43 = vsel %vm414_vm4, %v3353_v31, 0.0 }
0x1613   : > { %3361 = vadd.xlane.f32.xlu1 %v3360_v43 }
0x161c   : > { %v3486_v60 = vpop.f32.mrf.mxu1 }
0x161d   : > { %v3487_v61 = vadd.f32 %v6034_v49, %v3486_v60 }
0x161e   : > { %v4538_v0 = vpop.f32.mrf.mxu1 }
0x161f   : > { %v3503_v50 = vmul.f32 0.70710677, %v3487_v61  ;;  %v3500_v27 = vmul.f32 0.5, %v3487_v61 }
0x1621   : > { %v3512_v2 = vand.u32 2147483647, %v3503_v50  ;;  %vm3506_vm15 = vcmp.ge.f32.partialorder %v3503_v50, 0.0 }
0x1622   : > { %v3509_v25 = vsel %vm3506_vm15, 1.0, %v4928_v6 }
0x1623   : > { %v3515_v8 = vmul.f32 0.3275911, %v3512_v2  ;;  %v3554_v44 = vsub.f32 0.0, %v3512_v2 }
0x1625   : > { %v3518_v56 = vadd.f32 1.0, %v3515_v8  ;;  %v3557_v14 = vmul.f32 %v3554_v44, %v3512_v2  ;;  %v3690_v44 = vld [vmem:[%s6141_s4 + $0x10] sm:$0xff] }
0x1627   : > { %4798 = vrcp.f32 %v3518_v56  ;;  %v3560_v5 = vmul.f32 1.442695, %v3557_v14  ;;  %v3689_v14 = vld [vmem:[%s6141_s4 + $0x8] sm:$0xff] }
0x1629   : > { %4800 = vpow2.f32 %v3560_v5 }
0x1634   : > { %v4799_v4 = vpop.eup %4798 }
0x1635   : > { %v3527_v54 = vmul.f32 1.0614054, %v4799_v4 }
0x1636   : > { %v4801_v7 = vpop.eup %4800 }
0x1637   : > { %v3530_v11 = vadd.f32 -1.4531521, %v3527_v54  ;;  %v3688_v54 = vld [vmem:[%s6141_s4] sm:$0xff] }
0x1639   : > { %v3533_v51 = vmul.f32 %v4799_v4, %v3530_v11 }
0x163b   : > { %v3536_v12 = vadd.f32 1.4214138, %v3533_v51 }
0x163d   : > { %v3539_v37 = vmul.f32 %v4799_v4, %v3536_v12 }
0x163f   : > { %v3542_v58 = vadd.f32 -0.28449672, %v3539_v37 }
0x1641   : > { %v3545_v16 = vmul.f32 %v4799_v4, %v3542_v58 }
0x1643   : > { %v3548_v33 = vadd.f32 0.2548296, %v3545_v16 }
0x1645   : > { %v3551_v59 = vmul.f32 %v4799_v4, %v3548_v33 }
0x1647   : > { %v3566_v20 = vmul.f32 %v4801_v7, %v3551_v59 }
0x1649   : > { %v3569_v10 = vsub.f32 1.0, %v3566_v20 }
0x164b   : > { %v3572_v55 = vmul.f32 %v3569_v10, %v3509_v25 }
0x164d   : > { %v3575_v35 = vadd.f32 1.0, %v3572_v55 }
0x164f   : > { %v3578_v28 = vmul.f32 %v3575_v35, %v3500_v27 }
0x1651   : > { %4562 = vmatmul.mubr.msk.f32.vlgmr.msra.gmra.mxu0 %vm1985_vm13, %v3578_v28 }
0x1652   : > { %4564 = vmatprep.mubr.msk.f32.mxu0 %vm4912_vm2, %v4911_v22 }
0x1659   : > { %v3359_v18 = vpop.xlane.xlu0 %3358 }
0x165a   : > { %v3364_v19 = vmul.f32 0.03125, %v3359_v18 }
0x165c   : > { %v3367_v13 = vsub.f32 %v3352_v48, %v3364_v19 }
0x165e   : > { %v3370_v32 = vmul.f32 %v3367_v13, %v3367_v13 }
0x1660   : > { %v3375_v1 = vsel %vm407_vm3, %v3370_v32, 0.0 }
0x1661   : > { %3376 = vadd.xlane.f32.xlu0 %v3375_v1 }
0x169c   : > { %v3362_v9 = vpop.xlane.xlu1 %3361 }
0x169d   : > { %v3365_v17 = vmul.f32 0.03125, %v3362_v9 }
0x169f   : > { %v3368_v38 = vsub.f32 %v3353_v31, %v3365_v17 }
0x16a1   : > { %v3371_v62 = vmul.f32 %v3368_v38, %v3368_v38 }
0x16a3   : > { %v3378_v26 = vsel %vm414_vm4, %v3371_v62, 0.0 }
0x16a4   : > { %3379 = vadd.xlane.f32.xlu0 %v3378_v26 }
0x16ea   : > { %v3377_v39 = vpop.xlane.xlu0 %3376 }
0x16eb   : > { %v3382_v30 = vmul.f32 0.03125, %v3377_v39 }
0x16ed   : > { %v3385_v21 = vadd.f32 1e-05, %v3382_v30 }
0x16ef   : > { %4802 = vrsqrt.f32 %v3385_v21 }
0x16fc   : > { %v4803_v40 = vpop.eup %4802 }
0x16fd   : > { %v3391_v41 = vmul.f32 %v4803_v40, %v3367_v13 }
0x16ff   : > { %v3398_v23 = vmul.f32 %v6006_v34, %v3391_v41 }
0x1701   : > { %v3405_v45 = vadd.f32 %v6011_v15, %v3398_v23 }
0x1703   : > { %4540 = vmatmul.mubr.msk.f32.gmra.mxu1 %vm407_vm3, %v3405_v45 }
0x1704   : > { %4542 = vmatprep.mubr.msk.f32.mxu1 %vm4912_vm2, %v4911_v22 }
0x1711   : > { %v3660_v29 = vpop.f32.mrf.mxu0 }
0x1712   : > { %v3661_v47 = vadd.f32 %v3975_v3, %v3660_v29 }
0x1713   : > { %v4563_v48 = vpop.f32.mrf.mxu0 }
0x1714   : > { %v3672_v52 = vadd.f32 %v3661_v47, %v5970_v63 }
0x1716   : > { %v3673_v24 = vsel %vm414_vm4, %v3672_v52, 0.0 }
0x1717   : > { %3674 = vadd.xlane.f32.xlu0 %v3673_v24 }
0x172d   : > { %v3380_v57 = vpop.xlane.xlu0 %3379 }
0x172e   : > { %v3383_v42 = vmul.f32 0.03125, %v3380_v57 }
0x1730   : > { %v3386_v53 = vadd.f32 1e-05, %v3383_v42 }
0x1732   : > { %4804 = vrsqrt.f32 %v3386_v53 }
0x173f   : > { %v4805_v36 = vpop.eup %4804 }
0x1740   : > { %v3392_v46 = vmul.f32 %v4805_v36, %v3368_v38 }
0x1742   : > { %v3399_v31 = vmul.f32 %v6006_v34, %v3392_v46 }
0x1744   : > { %v3406_v43 = vadd.f32 %v6011_v15, %v3399_v31  ;;  %v3691_v15 = vld [vmem:[%s6141_s4 + $0x18] sm:$0xff] }
0x1745   : > { %4571 = vmatpush3.msra.mxu1 %v3691_v15  ;;  %v246_v15 = vld [vmem:[%s6138_s1 + $0x6] sm:$0x1] }
0x1746   : > { %4543 = vmatmul.mubr.msk.f32.gmra.mxu1 %vm407_vm3, %v3406_v43  ;;  %4572 = vmatprep.subr.mxu1 %v4911_v22 }
0x1747   : > { %4578 = vmatprep.mubr.msk.f32.mxu1 %vm4912_vm2, %v4911_v22  ;;  %4573 = vmatpush3.msra.mxu1 %v3690_v44 }
0x1748   : > { %4574 = vmatprep.subr.mxu1 %v4911_v22 }
0x1749   : > { %4575 = vmatpush3.msra.mxu1 %v3689_v14 }
0x174a   : > { %4576 = vmatprep.subr.mxu1 %v4911_v22 }
0x174b   : > { %4577 = vmatpush3.msra.mxu1 %v3688_v54 }
0x17a0   : > { %v3675_v60 = vpop.xlane.xlu0 %3674 }
0x17a1   : > { %v3676_v63 = vmul.f32 0.03125, %v3675_v60 }
0x17a3   : > { %v6058_v61 = vsub.f32 %v3672_v52, %v3676_v63 }
0x17a5   : > { %v3678_v0 = vmul.f32 %v6058_v61, %v6058_v61 }
0x17a7   : > { %v3679_v50 = vsel %vm414_vm4, %v3678_v0, 0.0 }
0x17a8   : > { %3680 = vadd.xlane.f32.xlu1 %v3679_v50 }
0x17c3   : > { %v3491_v2 = vpop.f32.mrf.mxu1 }
0x17c4   : > { %v3492_v34 = vadd.f32 %v6034_v49, %v3491_v2 }
0x17c5   : > { %v4541_v8 = vpop.f32.mrf.mxu1 }
0x17c6   : > { %v3504_v56 = vmul.f32 0.70710677, %v3492_v34  ;;  %v3501_v32 = vmul.f32 0.5, %v3492_v34 }
0x17c8   : > { %v3513_v4 = vand.u32 2147483647, %v3504_v56  ;;  %vm3507_vm0 = vcmp.ge.f32.partialorder %v3504_v56, 0.0 }
0x17c9   : > { %v3510_v19 = vsel %vm3507_vm0, 1.0, %v4928_v6 }
0x17ca   : > { %v3516_v5 = vmul.f32 0.3275911, %v3513_v4  ;;  %v3555_v51 = vsub.f32 0.0, %v3513_v4 }
0x17cc   : > { %v3519_v11 = vadd.f32 1.0, %v3516_v5  ;;  %v3558_v12 = vmul.f32 %v3555_v51, %v3513_v4 }
0x17ce   : > { %4806 = vrcp.f32 %v3519_v11  ;;  %v3562_v16 = vmul.f32 1.442695, %v3558_v12  ;;  %v248_v11 = vld [vmem:[%s6138_s1 + $0x8] sm:$0x1] }
0x17d0   : > { %4808 = vpow2.f32 %v3562_v16 }
0x17db   : > { %v4807_v37 = vpop.eup %4806 }
0x17dc   : > { %v3528_v58 = vmul.f32 1.0614054, %v4807_v37 }
0x17dd   : > { %v4809_v35 = vpop.eup %4808 }
0x17de   : > { %v3531_v33 = vadd.f32 -1.4531521, %v3528_v58 }
0x17e0   : > { %v3534_v59 = vmul.f32 %v4807_v37, %v3531_v33 }
0x17e2   : > { %v3537_v7 = vadd.f32 1.4214138, %v3534_v59 }
0x17e4   : > { %v3540_v20 = vmul.f32 %v4807_v37, %v3537_v7 }
0x17e6   : > { %v3543_v10 = vadd.f32 -0.28449672, %v3540_v20 }
0x17e8   : > { %v3546_v25 = vmul.f32 %v4807_v37, %v3543_v10 }
0x17ea   : > { %v3549_v55 = vadd.f32 0.2548296, %v3546_v25 }
0x17ec   : > { %v3552_v27 = vmul.f32 %v4807_v37, %v3549_v55 }
0x17ee   : > { %v3567_v28 = vmul.f32 %v4809_v35, %v3552_v27 }
0x17f0   : > { %v3570_v18 = vsub.f32 1.0, %v3567_v28 }
0x17f2   : > { %v3573_v13 = vmul.f32 %v3570_v18, %v3510_v19 }
0x17f4   : > { %v3576_v1 = vadd.f32 1.0, %v3573_v13 }
0x17f6   : > { %v3579_v9 = vmul.f32 %v3576_v1, %v3501_v32 }
0x17f8   : > { %4565 = vmatmul.mubr.msk.f32.gmra.mxu0 %vm1985_vm13, %v3579_v9 }
0x17f9   : > { %4567 = vmatprep.mubr.msk.f32.mxu0 %vm4912_vm2, %v4911_v22 }
0x1806   : > { %v3496_v17 = vpop.f32.mrf.mxu1 }
0x1807   : > { %v3497_v38 = vadd.f32 %v6034_v49, %v3496_v17 }
0x1808   : > { %v4544_v62 = vpop.f32.mrf.mxu1 }
0x1809   : > { %v3505_v26 = vmul.f32 0.70710677, %v3497_v38  ;;  %v3502_v0 = vmul.f32 0.5, %v3497_v38 }
0x180b   : > { %v3514_v39 = vand.u32 2147483647, %v3505_v26  ;;  %vm3508_vm1 = vcmp.ge.f32.partialorder %v3505_v26, 0.0 }
0x180c   : > { %v3511_v43 = vsel %vm3508_vm1, 1.0, %v4928_v6  ;;  %v247_v6 = vld [vmem:[%s6138_s1 + $0x7] sm:$0x1] }
0x180d   : > { %v3517_v30 = vmul.f32 0.3275911, %v3514_v39  ;;  %v3556_v40 = vsub.f32 0.0, %v3514_v39 }
0x180f   : > { %v3520_v21 = vadd.f32 1.0, %v3517_v30  ;;  %v3559_v41 = vmul.f32 %v3556_v40, %v3514_v39 }
0x1811   : > { %4810 = vrcp.f32 %v3520_v21  ;;  %v3564_v3 = vmul.f32 1.442695, %v3559_v41 }
0x1813   : > { %4812 = vpow2.f32 %v3564_v3 }
0x181e   : > { %v4811_v23 = vpop.eup %4810 }
0x181f   : > { %v3529_v45 = vmul.f32 1.0614054, %v4811_v23 }
0x1820   : > { %v4813_v42 = vpop.eup %4812 }
0x1821   : > { %v3532_v29 = vadd.f32 -1.4531521, %v3529_v45 }
0x1823   : > { %v3535_v47 = vmul.f32 %v4811_v23, %v3532_v29 }
0x1825   : > { %v3538_v48 = vadd.f32 1.4214138, %v3535_v47 }
0x1827   : > { %v3541_v52 = vmul.f32 %v4811_v23, %v3538_v48 }
0x1829   : > { %v3544_v22 = vadd.f32 -0.28449672, %v3541_v52 }
0x182b   : > { %v3547_v24 = vmul.f32 %v4811_v23, %v3544_v22 }
0x182d   : > { %v3550_v57 = vadd.f32 0.2548296, %v3547_v24 }
0x182f   : > { %v3553_v49 = vmul.f32 %v4811_v23, %v3550_v57 }
0x1831   : > { %v3568_v53 = vmul.f32 %v4813_v42, %v3553_v49  ;;  %v3681_v36 = vpop.xlane.xlu1 %3680 }
0x1832   : > { %v3682_v46 = vmul.f32 0.03125, %v3681_v36 }
0x1833   : > { %v3571_v31 = vsub.f32 1.0, %v3568_v53 }
0x1834   : > { %v3683_v60 = vadd.f32 1e-05, %v3682_v46 }
0x1835   : > { %v3574_v63 = vmul.f32 %v3571_v31, %v3511_v43 }
0x1836   : > { %4814 = vrsqrt.f32 %v3683_v60 }
0x1837   : > { %v3577_v50 = vadd.f32 1.0, %v3574_v63 }
0x1839   : > { %v3580_v2 = vmul.f32 %v3577_v50, %v3502_v0 }
0x183b   : > { %4568 = vmatmul.mubr.msk.f32.gmra.mxu0 %vm1985_vm13, %v3580_v2 }
0x1843   : > { %v4815_v34 = vpop.eup %4814 }
0x1844   : > { %v3685_v8 = vmul.f32 %v4815_v34, %v6058_v61 }
0x1846   : > { %v3686_v56 = vmul.f32 %v3685_v8, %v246_v15 }
0x1848   : > { %v3687_v44 = vadd.f32 %v3686_v56, %v247_v6 }
0x184a   : > { %4579 = vmatmul.mubr.msk.f32.vlgmr.msra.gmra.mxu1 %vm407_vm3, %v3687_v44 }
0x18b8   : > { %v3665_v14 = vpop.f32.mrf.mxu0 }
0x18ba   : > { %v4566_v4 = vpop.f32.mrf.mxu0 }
0x18fb   : > { %v3669_v54 = vpop.f32.mrf.mxu0 }
0x18fd   : > { %v4569_v5 = vpop.f32.mrf.mxu0 }
0x190a   : > { %v3761_v61 = vpop.f32.mrf.mxu1 }
0x190b   : > { %v3762_v51 = vadd.f32 %v3761_v61, %v248_v11 }
0x190c   : > { %v4580_v12 = vpop.f32.mrf.mxu1 }
0x190d   : > { %3765 = vst [vmem:[%s231_s17] sm:$0x1] %v3762_v51 }
0x190e   : > { %4855 = shalt.err (!%p4852_p0)
}
0x190f   : > { %s4856_s10 = scalar_lea.hbm %s6102_s30, 16  ;;  %s4860_s13 = scalar_lea.hbm %s6142_s5, 32 }
0x1910   : > { %p4857_p1 = scmp.ne.s32.totalorder %s6102_s30, %s4856_s10  ;;  %p4861_p4 = scmp.lt.s32.totalorder %s6102_s30, %s6142_s5 }
0x1911   : > { %p4862_p7 = scmp.lt.s32.totalorder %s4860_s13, %s4856_s10 }
0x1912   : > { %p4858_p2 = pnand %p4857_p1, %p4998_p5 }
0x1913   : > { %p4863_p8 = por %p4862_p7, %p4861_p4 }
0x1914   : > { %p4859_p3 = pneg %p4858_p2 }
0x1916   : > { %p4864_p6 = pnand %p4863_p8, %p4859_p3 }
0x1918   : > { %4867 = shalt.err (!%p4864_p6)
}
0x1919   : > { %4592 = dma.vmem_to_hbm [thread:$0]  (%p4998_p5), %s3780_s23, 16, %s6102_s30, %s3767_s6  }
0x191a PF: > { %p4604_p9 = scmp.ge.s32.totalorder %s4906_s21, 2  ;;  %s3791_s16 = sand.u32 1, %s4894_s18  }
0x191b   : > { %p6155_p10 = scmp.ne.s32.totalorder %s6150_s29, 0  ;;  %s3792_s17 = scalar_lea.sflag [#allocation5], %s3791_s16 }
0x191d   : > { %p4599_p11 = pnand %p4604_p9, %p6155_p10 }
0x191f   : > { %p4600_p12 = pneg %p4599_p11 }
0x1921   : > { %4889 = dma.done.wait (%p4600_p12), %s3792_s17, 16  }
0x1922   : > { %4891 = vsyncadd (%p4600_p12), %s3792_s17, 4294967280  ;;  %p16_p13 = scmp.ge.s32.totalorder %s4985_s24, 4   ;;  %s6156_s18 = smov %s4898_s19 }
0x1923   : > { %s6157_s19 = smov %s4902_s20  ;;  %s6158_s20 = smov %s4996_s27 }
0x1924   : > { %s6159_s21 = smov %s4985_s24  ;;  %18 = sbr.rel (!%p16_p13) target bundleno = 4 (0x4), region = 81 }
0x1929   :  { %3796 = vsyncpa [#allocation4], 1 }
0x192a   :  { %3798 = vsyncpa [#allocation4 + $0x1], 1 }
0x192b   :  { %3799 = vsyncpa [#allocation5], 1 }
0x192c   :  { %3801 = vsyncpa [#allocation5 + $0x1], 1 }

</bundles_post_ra>
